<compile_context>
chip_gen: v7x
topology: tpu7x:2x2x1
jax: 0.10.0
libtpu: 0.0.40
codegen_flags: <defaults>
</compile_context>

<pallas_src>
import jax
import jax.numpy as jnp
from jax import lax
from jax.experimental import pallas as pl
from jax.experimental.pallas import tpu as pltpu

# ----- SMARTLoss hyper-parameters (match PyTorch defaults) -----
NUM_STEPS = 1
STEP_SIZE = 1e-3
EPSILON = 1e-6
NOISE_VAR = 1e-5

# ----- problem sizes (small but lane-dense / MXU-aligned) -----
B, H, C = 256, 128, 128      # batch, hidden, classes


def _pick_b_tile(bsz):
    """Full-batch tile on single-TC chips (v5e/v6e); split in two on v7x (2 TCs)."""
    try:
        kind = jax.devices()[0].device_kind.lower()
    except Exception:
        kind = ""
    if "v7" in kind and bsz % 2 == 0 and (bsz // 2) % 8 == 0:
        return bsz // 2
    return bsz


# ---------------- kernel ----------------
def _make_kernel(total_batch):
    inv_b = 1.0 / float(total_batch)        # batchmean over the FULL batch
    step_scale = STEP_SIZE * inv_b          # 1/B folded into the step constant

    def kernel(embed_ref, noise_ref, state_ref, w_ref, b_ref, loss_ref):
        embed = embed_ref[...]              # (Bt, H) f32 tile
        noise = noise_ref[...]              # (Bt, H) f32 tile
        w = w_ref[...]                      # (H, C)  bf16, VMEM-resident
        bias = b_ref[...]                   # (1, C)  f32,  VMEM-resident

        # target distribution q = softmax(state) (state is detached -> constant).
        # Entropy term is reduced to a scalar right away so log_q never stays live.
        st = state_ref[...]
        m_q = jnp.max(st, axis=-1, keepdims=True)
        e_q = jnp.exp(st - m_q)
        s_q = jnp.sum(e_q, axis=-1, keepdims=True)
        q = e_q * pl.reciprocal(s_q)                              # exact (final loss path)
        ent = jnp.sum(q * ((st - m_q) - jnp.log(s_q)))            # sum q*log q  (scalar)

        # adversarial ascent on the noise (NUM_STEPS tiny -> static unroll).
        # NOTE: closed-form gradient hard-codes linear eval_fn + forward-KL loss.
        for _ in range(NUM_STEPS):
            x = (embed + noise).astype(jnp.bfloat16)
            logits = jnp.dot(x, w, preferred_element_type=jnp.float32) + bias
            m = jnp.max(logits, axis=-1, keepdims=True)
            e = jnp.exp(logits - m)
            s = jnp.sum(e, axis=-1, keepdims=True)
            p = e * pl.reciprocal(s, approx=True)                 # gradient-only softmax
            # (Bt,C) x (H,C) contracting C -> (Bt,H): reuses resident bf16 W.
            grad_noise = lax.dot_general(
                (p - q).astype(jnp.bfloat16), w, (((1,), (1,)), ((), ())),
                preferred_element_type=jnp.float32)
            step = noise + step_scale * grad_noise
            denom = jnp.max(jnp.abs(step), axis=-1, keepdims=True) + EPSILON
            noise = step * pl.reciprocal(denom, approx=True)      # inf-norm projection

        # final perturbed eval + loss_last_fn (KL batchmean), log_p never materialized:
        #   per row: sum_c q*log_p = sum_c q*(logits - m) - log(s)   (since sum_c q = 1)
        x = (embed + noise).astype(jnp.bfloat16)
        logits = jnp.dot(x, w, preferred_element_type=jnp.float32) + bias
        m = jnp.max(logits, axis=-1, keepdims=True)
        z = logits - m
        s = jnp.sum(jnp.exp(z), axis=-1, keepdims=True)
        kl_sum = ent - jnp.sum(q * z) + jnp.sum(jnp.log(s))
        # lane-dense per-block partial (unmasked (8,128) store); wrapper reads [i,0,0].
        loss_ref[...] = jnp.full(loss_ref.shape, kl_sum * inv_b, jnp.float32)

    return kernel


# ---------------- wrapper ----------------
def smart_loss_pallas(embed, noise, state, w, b, *, b_tile=None):
    bsz, hidden = embed.shape
    n_classes = w.shape[1]
    if b_tile is None:
        b_tile = _pick_b_tile(bsz)
    assert bsz % b_tile == 0 and b_tile % 8 == 0
    n_blocks = bsz // b_tile

    w_bf16 = w.astype(jnp.bfloat16)               # bf16 MXU operand, passed once
    b2 = b.reshape(1, -1).astype(jnp.float32)

    cost = pl.CostEstimate(
        flops=2 * bsz * hidden * n_classes * (2 * NUM_STEPS + 1),
        transcendentals=bsz * n_classes * (NUM_STEPS + 2),
        bytes_accessed=(4 * (2 * bsz * hidden + bsz * n_classes + n_classes)
                        + 2 * hidden * n_classes
                        + 4 * n_blocks * 8 * 128),
    )

    partials = pl.pallas_call(
        _make_kernel(bsz),
        out_shape=jax.ShapeDtypeStruct((n_blocks, 8, 128), jnp.float32),
        grid=(n_blocks,),
        in_specs=[
            pl.BlockSpec((b_tile, hidden), lambda i: (i, 0)),       # embed tile
            pl.BlockSpec((b_tile, hidden), lambda i: (i, 0)),       # noise tile
            pl.BlockSpec((b_tile, n_classes), lambda i: (i, 0)),    # state tile
            pl.BlockSpec((hidden, n_classes), lambda i: (0, 0)),    # W (bf16, resident)
            pl.BlockSpec((1, n_classes), lambda i: (0, 0)),         # b (resident)
        ],
        # per-block, lane-dense partials -> batch tiles are independent, so the grid
        # axis can be megacore-sharded on v7x.
        out_specs=pl.BlockSpec((1, 8, 128), lambda i: (i, 0, 0)),
        compiler_params=pltpu.CompilerParams(dimension_semantics=("parallel",)),
        cost_estimate=cost,
    )(embed, noise, state, w_bf16, b2)
    return jnp.sum(partials[:, 0, 0])


# ---------------- pure-JAX reference (real autodiff for the noise gradient) ----------------
def _kl_batchmean(logits_p, logits_t):
    log_p = jax.nn.log_softmax(logits_p, axis=-1)
    qq = jax.nn.softmax(logits_t, axis=-1)
    log_q = jax.nn.log_softmax(logits_t, axis=-1)
    return jnp.sum(qq * (log_q - log_p)) / logits_p.shape[0]


def smart_loss_ref(embed, noise0, state, w, b):
    eval_fn = lambda e: e @ w + b
    noise = noise0
    for _ in range(NUM_STEPS):
        loss_of_noise = lambda n: _kl_batchmean(
            eval_fn(embed + n), jax.lax.stop_gradient(state))
        g = jax.grad(loss_of_noise)(noise)
        step = noise + STEP_SIZE * g
        noise = step / (jnp.max(jnp.abs(step), axis=-1, keepdims=True) + EPSILON)
    return _kl_batchmean(eval_fn(embed + noise), state)


if __name__ == "__main__":
    key = jax.random.PRNGKey(0)
    k_embed, k_w, k_b, k_noise = jax.random.split(key, 4)

    embed = jax.random.normal(k_embed, (B, H), dtype=jnp.float32)
    w = jax.random.normal(k_w, (H, C), dtype=jnp.float32) * 0.05
    b = jax.random.normal(k_b, (C,), dtype=jnp.float32) * 0.01
    # state = eval_fn(embed): the (unperturbed) model output
    state = embed @ w + b
    # torch.randn_like(embed) * noise_var -> generated deterministically in glue
    noise0 = jax.random.normal(k_noise, (B, H), dtype=jnp.float32) * NOISE_VAR

    loss = smart_loss_pallas(embed, noise0, state, w, b)
    jax.block_until_ready(loss)

    ref = smart_loss_ref(embed, noise0, state, w, b)
    # rtol widened from 2e-3 -> 5e-3 to cover bf16 MXU operands (review item).
    assert jnp.allclose(loss, ref, rtol=5e-3, atol=1e-5), (loss, ref)

    # NOTE: at B=256, H=C=128 (~19 MFLOP) this kernel is launch/fixed-overhead
    # bound; benchmark with min-of-N xprof wall clock vs. a fused XLA baseline
    # before further micro-optimizing (review item).
    print("KERNEL_OK")
</pallas_src>

<mosaic_0001>
module attributes {stable_mosaic.version = 11 : i64} {
  func.func @kernel(%arg0: i32, %arg1: memref<256x128xf32, #tpu.memory_space<vmem>>, %arg2: memref<256x128xf32, #tpu.memory_space<vmem>>, %arg3: memref<256x128xf32, #tpu.memory_space<vmem>>, %arg4: memref<128x128xbf16, #tpu.memory_space<vmem>>, %arg5: memref<1x128xf32, #tpu.memory_space<vmem>>, %arg6: memref<1x8x128xf32, #tpu.memory_space<vmem>>) attributes {dimension_semantics = [#tpu.dimension_semantics<parallel>], iteration_bounds = array<i64: 1>, scalar_prefetch = 0 : i64, scratch_operands = 0 : i64, tpu.core_type = #tpu.core_type<tc>, window_params = [{transform_indices = @transform_0, window_bounds = array<i64: 256, 128>}, {transform_indices = @transform_1, window_bounds = array<i64: 256, 128>}, {transform_indices = @transform_2, window_bounds = array<i64: 256, 128>}, {pipeline_mode = #tpu.pipeline_mode<synchronous>, transform_indices = @transform_3, window_bounds = array<i64: 128, 128>}, {pipeline_mode = #tpu.pipeline_mode<synchronous>, transform_indices = @transform_4, window_bounds = array<i64: 1, 128>}, {transform_indices = @transform_5, window_bounds = array<i64: 1, 8, 128>}]} {
    %c0 = arith.constant 0 : index
    %c0_0 = arith.constant 0 : index
    %0 = vector.load %arg1[%c0, %c0_0] : memref<256x128xf32, #tpu.memory_space<vmem>>, vector<256x128xf32>
    %c0_1 = arith.constant 0 : index
    %c0_2 = arith.constant 0 : index
    %1 = vector.load %arg2[%c0_1, %c0_2] : memref<256x128xf32, #tpu.memory_space<vmem>>, vector<256x128xf32>
    %c0_3 = arith.constant 0 : index
    %c0_4 = arith.constant 0 : index
    %2 = vector.load %arg4[%c0_3, %c0_4] : memref<128x128xbf16, #tpu.memory_space<vmem>>, vector<128x128xbf16>
    %c0_5 = arith.constant 0 : index
    %c0_6 = arith.constant 0 : index
    %3 = vector.load %arg5[%c0_5, %c0_6] : memref<1x128xf32, #tpu.memory_space<vmem>>, vector<1x128xf32>
    %c0_7 = arith.constant 0 : index
    %c0_8 = arith.constant 0 : index
    %4 = vector.load %arg3[%c0_7, %c0_8] : memref<256x128xf32, #tpu.memory_space<vmem>>, vector<256x128xf32>
    %cst = arith.constant dense<0xFF800000> : vector<256xf32>
    %5 = vector.multi_reduction <maximumf>, %4, %cst [1] : vector<256x128xf32> to vector<256xf32>
    %6 = vector.shape_cast %5 : vector<256xf32> to vector<256x1xf32>
    %7 = vector.broadcast %6 : vector<256x1xf32> to vector<256x128xf32>
    %8 = arith.subf %4, %7 : vector<256x128xf32>
    %9 = math.exp %8 : vector<256x128xf32>
    %cst_9 = arith.constant dense<0.000000e+00> : vector<256xf32>
    %10 = vector.multi_reduction <add>, %9, %cst_9 [1] : vector<256x128xf32> to vector<256xf32>
    %11 = vector.shape_cast %10 : vector<256xf32> to vector<256x1xf32>
    %12 = tpu.reciprocal %11 : vector<256x1xf32> -> vector<256x1xf32>
    %13 = vector.broadcast %12 : vector<256x1xf32> to vector<256x128xf32>
    %14 = arith.mulf %9, %13 : vector<256x128xf32>
    %15 = vector.broadcast %6 : vector<256x1xf32> to vector<256x128xf32>
    %16 = arith.subf %4, %15 : vector<256x128xf32>
    %17 = math.log %11 : vector<256x1xf32>
    %18 = vector.broadcast %17 : vector<256x1xf32> to vector<256x128xf32>
    %19 = arith.subf %16, %18 : vector<256x128xf32>
    %20 = arith.mulf %14, %19 : vector<256x128xf32>
    %21 = vector.shape_cast %20 : vector<256x128xf32> to vector<1x256x128xf32>
    %cst_10 = arith.constant dense<0.000000e+00> : vector<1xf32>
    %22 = vector.multi_reduction <add>, %21, %cst_10 [1, 2] : vector<1x256x128xf32> to vector<1xf32>
    %23 = vector.shape_cast %22 : vector<1xf32> to vector<1x1x1xf32>
    %24 = vector.extract %23[0, 0, 0] : f32 from vector<1x1x1xf32>
    %25 = arith.addf %0, %1 : vector<256x128xf32>
    %26 = arith.truncf %25 : vector<256x128xf32> to vector<256x128xbf16>
    %cst_11 = arith.constant dense<0.000000e+00> : vector<256x128xf32>
    %27 = tpu.matmul %26, %2, %cst_11 {dimension_numbers = #tpu.dot_dimension_numbers<[1], [0], [0], [1], [0, 0, 1, 1], [], []>} : vector<256x128xbf16>, vector<128x128xbf16>, vector<256x128xf32> -> vector<256x128xf32>
    %28 = vector.broadcast %3 : vector<1x128xf32> to vector<256x128xf32>
    %29 = arith.addf %27, %28 : vector<256x128xf32>
    %cst_12 = arith.constant dense<0xFF800000> : vector<256xf32>
    %30 = vector.multi_reduction <maximumf>, %29, %cst_12 [1] : vector<256x128xf32> to vector<256xf32>
    %31 = vector.shape_cast %30 : vector<256xf32> to vector<256x1xf32>
    %32 = vector.broadcast %31 : vector<256x1xf32> to vector<256x128xf32>
    %33 = arith.subf %29, %32 : vector<256x128xf32>
    %34 = math.exp %33 : vector<256x128xf32>
    %cst_13 = arith.constant dense<0.000000e+00> : vector<256xf32>
    %35 = vector.multi_reduction <add>, %34, %cst_13 [1] : vector<256x128xf32> to vector<256xf32>
    %36 = vector.shape_cast %35 : vector<256xf32> to vector<256x1xf32>
    %37 = tpu.reciprocal %36 {approx = true} : vector<256x1xf32> -> vector<256x1xf32>
    %38 = vector.broadcast %37 : vector<256x1xf32> to vector<256x128xf32>
    %39 = arith.mulf %34, %38 : vector<256x128xf32>
    %40 = arith.subf %39, %14 : vector<256x128xf32>
    %41 = arith.truncf %40 : vector<256x128xf32> to vector<256x128xbf16>
    %cst_14 = arith.constant dense<0.000000e+00> : vector<256x128xf32>
    %42 = tpu.matmul %41, %2, %cst_14 {dimension_numbers = #tpu.dot_dimension_numbers<[1], [1], [0], [0], [0, 0, 1, 0], [], []>} : vector<256x128xbf16>, vector<128x128xbf16>, vector<256x128xf32> -> vector<256x128xf32>
    %cst_15 = arith.constant 3.906250e-06 : f32
    %43 = vector.broadcast %cst_15 : f32 to vector<256x128xf32>
    %44 = arith.mulf %43, %42 : vector<256x128xf32>
    %45 = arith.addf %1, %44 : vector<256x128xf32>
    %46 = math.absf %45 : vector<256x128xf32>
    %cst_16 = arith.constant dense<0xFF800000> : vector<256xf32>
    %47 = vector.multi_reduction <maximumf>, %46, %cst_16 [1] : vector<256x128xf32> to vector<256xf32>
    %48 = vector.shape_cast %47 : vector<256xf32> to vector<256x1xf32>
    %cst_17 = arith.constant 9.99999997E-7 : f32
    %49 = vector.broadcast %cst_17 : f32 to vector<256x1xf32>
    %50 = arith.addf %48, %49 : vector<256x1xf32>
    %51 = tpu.reciprocal %50 {approx = true} : vector<256x1xf32> -> vector<256x1xf32>
    %52 = vector.broadcast %51 : vector<256x1xf32> to vector<256x128xf32>
    %53 = arith.mulf %45, %52 : vector<256x128xf32>
    %54 = arith.addf %0, %53 : vector<256x128xf32>
    %55 = arith.truncf %54 : vector<256x128xf32> to vector<256x128xbf16>
    %cst_18 = arith.constant dense<0.000000e+00> : vector<256x128xf32>
    %56 = tpu.matmul %55, %2, %cst_18 {dimension_numbers = #tpu.dot_dimension_numbers<[1], [0], [0], [1], [0, 0, 1, 1], [], []>} : vector<256x128xbf16>, vector<128x128xbf16>, vector<256x128xf32> -> vector<256x128xf32>
    %57 = vector.broadcast %3 : vector<1x128xf32> to vector<256x128xf32>
    %58 = arith.addf %56, %57 : vector<256x128xf32>
    %cst_19 = arith.constant dense<0xFF800000> : vector<256xf32>
    %59 = vector.multi_reduction <maximumf>, %58, %cst_19 [1] : vector<256x128xf32> to vector<256xf32>
    %60 = vector.shape_cast %59 : vector<256xf32> to vector<256x1xf32>
    %61 = vector.broadcast %60 : vector<256x1xf32> to vector<256x128xf32>
    %62 = arith.subf %58, %61 : vector<256x128xf32>
    %63 = math.exp %62 : vector<256x128xf32>
    %cst_20 = arith.constant dense<0.000000e+00> : vector<256xf32>
    %64 = vector.multi_reduction <add>, %63, %cst_20 [1] : vector<256x128xf32> to vector<256xf32>
    %65 = vector.shape_cast %64 : vector<256xf32> to vector<256x1xf32>
    %66 = arith.mulf %14, %62 : vector<256x128xf32>
    %67 = vector.shape_cast %66 : vector<256x128xf32> to vector<1x256x128xf32>
    %cst_21 = arith.constant dense<0.000000e+00> : vector<1xf32>
    %68 = vector.multi_reduction <add>, %67, %cst_21 [1, 2] : vector<1x256x128xf32> to vector<1xf32>
    %69 = vector.shape_cast %68 : vector<1xf32> to vector<1x1x1xf32>
    %70 = vector.extract %69[0, 0, 0] : f32 from vector<1x1x1xf32>
    %71 = arith.subf %24, %70 : f32
    %72 = math.log %65 : vector<256x1xf32>
    %73 = vector.shape_cast %72 : vector<256x1xf32> to vector<1x256x1xf32>
    %cst_22 = arith.constant dense<0.000000e+00> : vector<1xf32>
    %74 = vector.multi_reduction <add>, %73, %cst_22 [1, 2] : vector<1x256x1xf32> to vector<1xf32>
    %75 = vector.shape_cast %74 : vector<1xf32> to vector<1x1x1xf32>
    %76 = vector.extract %75[0, 0, 0] : f32 from vector<1x1x1xf32>
    %77 = arith.addf %71, %76 : f32
    %cst_23 = arith.constant 3.906250e-03 : f32
    %78 = arith.mulf %77, %cst_23 : f32
    %79 = vector.broadcast %78 : f32 to vector<1x8x128xf32>
    %c0_24 = arith.constant 0 : index
    %c0_25 = arith.constant 0 : index
    %c0_26 = arith.constant 0 : index
    %80 = vector.load %arg6[%c0_24, %c0_25, %c0_26] : memref<1x8x128xf32, #tpu.memory_space<vmem>>, vector<1x8x128xf32>
    tpu.vector_store %arg6[%c0_24, %c0_25, %c0_26], %79 {strides = array<i32>} : memref<1x8x128xf32, #tpu.memory_space<vmem>>, vector<1x8x128xf32>,
    return
  }
  func.func @transform_0(%arg0: i32) -> (i32, i32) {
    %c0_i32 = arith.constant 0 : i32
    %c0_i32_0 = arith.constant 0 : i32
    return %arg0, %c0_i32 : i32, i32
  }
  func.func @transform_1(%arg0: i32) -> (i32, i32) {
    %c0_i32 = arith.constant 0 : i32
    %c0_i32_0 = arith.constant 0 : i32
    return %arg0, %c0_i32 : i32, i32
  }
  func.func @transform_2(%arg0: i32) -> (i32, i32) {
    %c0_i32 = arith.constant 0 : i32
    %c0_i32_0 = arith.constant 0 : i32
    return %arg0, %c0_i32 : i32, i32
  }
  func.func @transform_3(%arg0: i32) -> (i32, i32) {
    %c0_i32 = arith.constant 0 : i32
    %c0_i32_0 = arith.constant 0 : i32
    %c0_i32_1 = arith.constant 0 : i32
    return %c0_i32, %c0_i32_0 : i32, i32
  }
  func.func @transform_4(%arg0: i32) -> (i32, i32) {
    %c0_i32 = arith.constant 0 : i32
    %c0_i32_0 = arith.constant 0 : i32
    %c0_i32_1 = arith.constant 0 : i32
    return %c0_i32, %c0_i32_0 : i32, i32
  }
  func.func @transform_5(%arg0: i32) -> (i32, i32, i32) {
    %c0_i32 = arith.constant 0 : i32
    %c0_i32_0 = arith.constant 0 : i32
    %c0_i32_1 = arith.constant 0 : i32
    return %arg0, %c0_i32, %c0_i32_0 : i32, i32, i32
  }
}

</mosaic_0001>

<bundles_post_ra>
// kernel: tpu_custom_call.1
= control target key start
LH: loop header
LB: loop body
LE: loop exit
PB: predicated region body
PF: predicated region fallthrough
CT: control target
= control target key end

     0   :  { %10 = vsyncpa [#allocation3], 0  ;;  %s4773_s0 = inlined_call_operand.hbm [shape: f32[256,128], index: 0, kind: input, shape index: {}]   ;;  %s4774_s1 = inlined_call_operand.hbm [shape: f32[256,128], index: 1, kind: input, shape index: {}]   ;;  %s4775_s2 = inlined_call_operand.hbm [shape: f32[256,128], index: 2, kind: input, shape index: {}]   ;;  %s4776_s3 = inlined_call_operand.hbm [shape: bf16[128,128], index: 3, kind: input, shape index: {}]   ;;  %s4777_s4 = inlined_call_operand.vmem [shape: f32[1,128], index: 4, kind: input, shape index: {}]   ;;  %s4778_s5 = inlined_call_operand.hbm [shape: f32[1,8,128], index: 5, kind: output, shape index: {}]  }
   0x1   :  { %11 = vsyncpa [#allocation6], 0 }
   0x2   :  { %12 = vsyncpa [#allocation9], 0 }
   0x3   :  { %13 = vsyncpa [#allocation4], 0  ;;  %s3294_s18 = smov [#allocation5]   ;;  %s3295_s20 = smov [#allocation2]  }
   0x4   :  { %s31_s19 = sshll.u32 %s3294_s18, 4  ;;  %s19_s21 = sshll.u32 %s3295_s20, 4  ;;  %s32_s19 = int_to_ptr.vmem [resolvable:$true] %s31_s19  ;;  %s3333_s21 = int_to_ptr.vmem [resolvable:$true] %s19_s21 }
   0x5   :  { %s3176_s24 = scalar_lea.hbm %s4774_s1, 4096 }
   0x6   :  { %p3177_p0 = scmp.ne.s32.totalorder %s4774_s1, %s3176_s24  ;;  %p3180_p1 = scmp.lt.u32.totalorder %s3176_s24, %s4774_s1 }
   0x8   :  { %p3182_p2 = pnand %p3180_p1, %p3177_p0 }
   0xa   :  { %3185 = shalt.err (!%p3182_p2)
}
   0xb   :  { %s3186_s29 = scalar_lea.vmem %s32_s19, 4096  ;;  %p3191_p4 = scmp.lt.s32.totalorder %s32_s19, %s32_s19 }
   0xc   :  { %p3187_p3 = scmp.ne.s32.totalorder %s32_s19, %s3186_s29  ;;  %p3192_p5 = scmp.lt.s32.totalorder %s3186_s29, %s3186_s29 }
   0xe   :  { %p3193_p6 = por %p3192_p5, %p3191_p4 }
  0x10   :  { %p3194_p7 = pnand %p3193_p6, %p3187_p3 }
  0x12   :  { %3197 = shalt.err (!%p3194_p7)
}
  0x13   :  { %s3296_s30 = smov 128   ;;  %s3297_s6 = smov 8  }
  0x14   :  { %37 = dma.hbm_to_vmem [thread:$0]  %s4774_s1, 4096, %s32_s19, [#allocation6], %s3296_s30, %s3296_s30, %s3297_s6  }
  0x15   :  { %s3198_s11 = scalar_lea.hbm %s4773_s0, 4096 }
  0x16   :  { %p3199_p8 = scmp.ne.s32.totalorder %s4773_s0, %s3198_s11  ;;  %p3202_p9 = scmp.lt.u32.totalorder %s3198_s11, %s4773_s0 }
  0x18   :  { %p3204_p10 = pnand %p3202_p9, %p3199_p8 }
  0x1a   :  { %3207 = shalt.err (!%p3204_p10)
}
  0x1b   :  { %s3208_s16 = scalar_lea.vmem %s3333_s21, 4096  ;;  %p3213_p12 = scmp.lt.s32.totalorder %s3333_s21, %s3333_s21 }
  0x1c   :  { %p3209_p11 = scmp.ne.s32.totalorder %s3333_s21, %s3208_s16  ;;  %p3214_p13 = scmp.lt.s32.totalorder %s3208_s16, %s3208_s16 }
  0x1e   :  { %p3215_p0 = por %p3214_p13, %p3213_p12 }
  0x20   :  { %p3216_p1 = pnand %p3215_p0, %p3209_p11 }
  0x22   :  { %3219 = shalt.err (!%p3216_p1)
}
  0x23   :  { %25 = dma.hbm_to_vmem [thread:$0]  %s4773_s0, 4096, %s3333_s21, [#allocation3], %s3296_s30, %s3296_s30, %s3297_s6  }
  0x24   :  { %s3298_s18 = smov [#allocation7]   ;;  %s3299_s20 = smov [#allocation8]  }
  0x25   :  { %s43_s19 = sshll.u32 %s3298_s18, 4  ;;  %s55_s22 = sshll.u32 %s3299_s20, 4  ;;  %s44_s19 = int_to_ptr.vmem [resolvable:$true] %s43_s19  ;;  %s3370_s22 = int_to_ptr.vmem [resolvable:$true] %s55_s22 }
  0x26   :  { %s3220_s25 = scalar_lea.hbm %s4775_s2, 4096 }
  0x27   :  { %p3221_p2 = scmp.ne.s32.totalorder %s4775_s2, %s3220_s25  ;;  %p3224_p3 = scmp.lt.u32.totalorder %s3220_s25, %s4775_s2 }
  0x29   :  { %p3226_p4 = pnand %p3224_p3, %p3221_p2 }
  0x2b   :  { %3229 = shalt.err (!%p3226_p4)
}
  0x2c   :  { %s3230_s0 = scalar_lea.vmem %s44_s19, 4096  ;;  %p3235_p6 = scmp.lt.s32.totalorder %s44_s19, %s44_s19 }
  0x2d   :  { %p3231_p5 = scmp.ne.s32.totalorder %s44_s19, %s3230_s0  ;;  %p3236_p7 = scmp.lt.s32.totalorder %s3230_s0, %s3230_s0 }
  0x2f   :  { %p3237_p8 = por %p3236_p7, %p3235_p6 }
  0x31   :  { %p3238_p9 = pnand %p3237_p8, %p3231_p5 }
  0x33   :  { %3241 = shalt.err (!%p3238_p9)
}
  0x34   :  { %49 = dma.hbm_to_vmem [thread:$0]  %s4775_s2, 4096, %s44_s19, [#allocation6], %s3296_s30, %s3296_s30, %s3297_s6  }
  0x35   :  { %s3242_s10 = scalar_lea.hbm %s4776_s3, 1024 }
  0x36   :  { %p3243_p10 = scmp.ne.s32.totalorder %s4776_s3, %s3242_s10  ;;  %p3246_p11 = scmp.lt.u32.totalorder %s3242_s10, %s4776_s3 }
  0x38   :  { %p3248_p12 = pnand %p3246_p11, %p3243_p10 }
  0x3a   :  { %3251 = shalt.err (!%p3248_p12)
}
  0x3b   :  { %s3252_s15 = scalar_lea.vmem %s3370_s22, 1024  ;;  %p3257_p0 = scmp.lt.s32.totalorder %s3370_s22, %s3370_s22 }
  0x3c   :  { %p3253_p13 = scmp.ne.s32.totalorder %s3370_s22, %s3252_s15  ;;  %p3258_p1 = scmp.lt.s32.totalorder %s3252_s15, %s3252_s15 }
  0x3e   :  { %p3259_p2 = por %p3258_p1, %p3257_p0 }
  0x40   :  { %p3260_p3 = pnand %p3259_p2, %p3253_p13 }
  0x42   :  { %3263 = shalt.err (!%p3260_p3)
}
  0x43   :  { %s3300_s2 = smov 64   ;;  %s3301_s30 = smov 4  }
  0x44   :  { %61 = dma.hbm_to_vmem [thread:$0]  %s4776_s3, 1024, %s3370_s22, [#allocation9], %s3300_s2, %s3300_s2, %s3301_s30  }
  0x45   :  { %3286 = dma.done.wait [#allocation3], 4096  }
  0x46   :  { %3287 = vsyncadd [#allocation3], 4294963200 }
  0x47   :  { %3288 = dma.done.wait [#allocation6], 8192  }
  0x48   :  { %3289 = vsyncadd [#allocation6], 4294959104 }
  0x49   :  { %3290 = dma.done.wait [#allocation9], 1024  }
  0x4a   :  { %3291 = vsyncadd [#allocation9], 4294966272  ;;  %v3404_v0 = vld [vmem:[#allocation7] sm:$0xff]  ;;  %v3409_v2 = vld [vmem:[#allocation7 + $0x8] sm:$0xff]  ;;  %vm2232_vm0 = vcmask 7168   ;;  %s3302_s24 = smov [#allocation10]  }
  0x4b   :  { %190 = vmax.xlane.f32.xlu0 %v3404_v0  ;;  %v3407_v1 = vld [vmem:[#allocation8] sm:$0xff]   ;;  %v3411_v3 = vld [vmem:[#allocation8 + $0x8] sm:$0xff]   ;;  %v3413_v4 = vld [vmem:[#allocation7 + $0x18] sm:$0xff]  ;;  %s2315_s25 = sshll.u32 %s3302_s24, 4  ;;  %s2316_s25 = int_to_ptr.vmem [resolvable:$true] %s2315_s25 }
  0x4c   :  { %2407 = vmatprep.subr.bf16.mxu0 %v3407_v1  ;;  %196 = vmax.xlane.f32.xlu1 %v3413_v4  ;;  %v3418_v5 = vld [vmem:[#allocation7 + $0x28] sm:$0xff]  ;;  %v3423_v6 = vld [vmem:[#allocation8 + $0x10] sm:$0xff]   ;;  %v3431_v8 = vld [vmem:[#allocation7 + $0x38] sm:$0xff]  ;;  %s3264_s27 = scalar_lea.vmem %s2316_s25, 128  ;;  %p3269_p5 = scmp.lt.s32.totalorder %s2316_s25, %s2316_s25 }
  0x4d   :  { %2408 = vmatpush3.bf16.msra.mxu0 %v3407_v1  ;;  %2455 = vmatprep.subr.bf16.mxu1 %v3407_v1  ;;  %v3425_v7 = vld [vmem:[#allocation7 + $0x10] sm:$0xff]  ;;  %v3435_v9 = vld [vmem:[#allocation8 + $0x18] sm:$0xff]   ;;  %v3437_v10 = vld [vmem:[#allocation7 + $0x20] sm:$0xff]  ;;  %p3265_p4 = scmp.ne.s32.totalorder %s2316_s25, %s3264_s27  ;;  %p3270_p6 = scmp.lt.s32.totalorder %s3264_s27, %s3264_s27 }
  0x4e   :  { %2409 = vmatprep.subr.bf16.mxu0 %v3411_v3  ;;  %2456 = vmatpush3.bf16.xpose.msra.mxu1 %v3407_v1  ;;  %v3441_v11 = vld [vmem:[#allocation7 + $0x48] sm:$0xff]  ;;  %v3445_v12 = vld [vmem:[#allocation8 + $0x20] sm:$0xff]   ;;  %v3447_v15 = vld [vmem:[#allocation7 + $0x30] sm:$0xff] }
  0x4f   :  { %192 = vmax.xlane.f32.xlu0 %v3409_v2  ;;  %2457 = vmatprep.subr.bf16.mxu1 %v3411_v3  ;;  %v77_v13 = vld [vmem:[#allocation2] sm:$0xff]  ;;  %v78_v14 = vld [vmem:[#allocation2 + $0x8] sm:$0xff]  ;;  %v3453_v20 = vld [vmem:[#allocation7 + $0x58] sm:$0xff]  ;;  %p3271_p7 = por %p3270_p6, %p3269_p5 }
  0x50   :  { %200 = vmax.xlane.f32.xlu1 %v3418_v5  ;;  %v109_v16 = vld [vmem:[#allocation5] sm:$0xff]  ;;  %v110_v17 = vld [vmem:[#allocation5 + $0x8] sm:$0xff]  ;;  %v3467_v25 = vld [vmem:[#allocation8 + $0x30] sm:$0xff]  }
  0x51   :  { %2410 = vmatpush3.bf16.msra.mxu0 %v3411_v3  ;;  %v646_v18 = vadd.f32 %v109_v16, %v77_v13  ;;  %v647_v19 = vadd.f32 %v110_v17, %v78_v14  ;;  %v3457_v21 = vld [vmem:[#allocation8 + $0x28] sm:$0xff]   ;;  %v3459_v23 = vld [vmem:[#allocation7 + $0x40] sm:$0xff]  ;;  %v3469_v26 = vld [vmem:[#allocation7 + $0x50] sm:$0xff]  ;;  %p3272_p8 = pnand %p3271_p7, %p3265_p4 }
  0x52   :  { %2411 = vmatprep.subr.bf16.mxu0 %v3423_v6  ;;  %v3463_v24 = vld [vmem:[#allocation7 + $0x68] sm:$0xff]  ;;  %v3473_v27 = vld [vmem:[#allocation8 + $0x38] sm:$0xff]   ;;  %v79_v29 = vld [vmem:[#allocation2 + $0x10] sm:$0xff] }
  0x53   :  { %194 = vmax.xlane.f32.xlu0 %v3425_v7  ;;  %v678_v22 = vpack.c.bf16 %v647_v19, %v646_v18  ;;  %v3475_v28 = vld [vmem:[#allocation7 + $0x78] sm:$0xff]  ;;  %v111_v31 = vld [vmem:[#allocation5 + $0x10] sm:$0xff]  ;;  %v81_v33 = vld [vmem:[#allocation2 + $0x20] sm:$0xff] }
  0x54   :  { %204 = vmax.xlane.f32.xlu1 %v3431_v8  ;;  %v80_v30 = vld [vmem:[#allocation2 + $0x18] sm:$0xff]  ;;  %v82_v34 = vld [vmem:[#allocation2 + $0x28] sm:$0xff]  ;;  %v113_v35 = vld [vmem:[#allocation5 + $0x20] sm:$0xff]  ;;  %v648_v38 = vadd.f32 %v111_v31, %v79_v29 }
  0x55   :  { %2412 = vmatpush3.bf16.msra.mxu0 %v3423_v6  ;;  %2423 = vmatprep.mubr.bf16.mxu0 %v678_v22  ;;  %v112_v32 = vld [vmem:[#allocation5 + $0x18] sm:$0xff]  ;;  %v114_v36 = vld [vmem:[#allocation5 + $0x28] sm:$0xff]  ;;  %v3481_v37 = vld [vmem:[#allocation7 + $0x60] sm:$0xff]  ;;  %v650_v41 = vadd.f32 %v113_v35, %v81_v33 }
  0x56   :  { %2413 = vmatprep.subr.bf16.mxu0 %v3435_v9  ;;  %2458 = vmatpush3.bf16.xpose.msra.mxu1 %v3411_v3  ;;  %v649_v39 = vadd.f32 %v112_v32, %v80_v30  ;;  %v3485_v40 = vld [vmem:[#allocation7 + $0x88] sm:$0xff]  ;;  %v651_v42 = vadd.f32 %v114_v36, %v82_v34  ;;  %v3489_v43 = vld [vmem:[#allocation7 + $0x70] sm:$0xff]  ;;  %v3493_v45 = vld [vmem:[#allocation7 + $0x98] sm:$0xff] }
  0x57   :  { %198 = vmax.xlane.f32.xlu0 %v3437_v10  ;;  %2459 = vmatprep.subr.bf16.mxu1 %v3423_v6  ;;  %v83_v46 = vld [vmem:[#allocation2 + $0x30] sm:$0xff]  ;;  %v84_v47 = vld [vmem:[#allocation2 + $0x38] sm:$0xff]  ;;  %v85_v51 = vld [vmem:[#allocation2 + $0x40] sm:$0xff] }
  0x58   :  { %208 = vmax.xlane.f32.xlu1 %v3441_v11  ;;  %v679_v44 = vpack.c.bf16 %v649_v39, %v648_v38  ;;  %v680_v48 = vpack.c.bf16 %v651_v42, %v650_v41  ;;  %v115_v49 = vld [vmem:[#allocation5 + $0x30] sm:$0xff]  ;;  %v116_v50 = vld [vmem:[#allocation5 + $0x38] sm:$0xff]  ;;  %v86_v52 = vld [vmem:[#allocation2 + $0x48] sm:$0xff] }
  0x59   :  { %2414 = vmatpush3.bf16.msra.mxu0 %v3435_v9  ;;  %v117_v53 = vld [vmem:[#allocation5 + $0x40] sm:$0xff]  ;;  %v118_v54 = vld [vmem:[#allocation5 + $0x48] sm:$0xff]  ;;  %v652_v56 = vadd.f32 %v115_v49, %v83_v46  ;;  %v653_v57 = vadd.f32 %v116_v50, %v84_v47  ;;  %v3507_v61 = vld [vmem:[#allocation7 + $0x90] sm:$0xff] }
  0x5a   :  { %2415 = vmatprep.subr.bf16.mxu0 %v3445_v12  ;;  %v3499_v55 = vld [vmem:[#allocation7 + $0x80] sm:$0xff]  ;;  %v654_v58 = vadd.f32 %v117_v53, %v85_v51  ;;  %v655_v59 = vadd.f32 %v118_v54, %v86_v52  ;;  %v3502_v60 = vld [vmem:[#allocation7 + $0xa8] sm:$0xff]  ;;  %v87_v63 = vld [vmem:[#allocation2 + $0x50] sm:$0xff] }
  0x5b   :  { %202 = vmax.xlane.f32.xlu0 %v3447_v15  ;;  %v681_v62 = vpack.c.bf16 %v653_v57, %v652_v56  ;;  %v88_v13 = vld [vmem:[#allocation2 + $0x58] sm:$0xff]  ;;  %v119_v14 = vld [vmem:[#allocation5 + $0x50] sm:$0xff]  ;;  %v89_v18 = vld [vmem:[#allocation2 + $0x60] sm:$0xff] }
  0x5c   :  { %212 = vmax.xlane.f32.xlu1 %v3453_v20  ;;  %v682_v16 = vpack.c.bf16 %v655_v59, %v654_v58  ;;  %v120_v17 = vld [vmem:[#allocation5 + $0x58] sm:$0xff]  ;;  %v90_v22 = vld [vmem:[#allocation2 + $0x68] sm:$0xff]  ;;  %v121_v29 = vld [vmem:[#allocation5 + $0x60] sm:$0xff]  ;;  %v656_v32 = vadd.f32 %v119_v14, %v87_v63 }
  0x5d   :  { %2416 = vmatpush3.bf16.msra.mxu0 %v3445_v12  ;;  %v3512_v19 = vld [vmem:[#allocation7 + $0xb8] sm:$0xff]  ;;  %v122_v30 = vld [vmem:[#allocation5 + $0x68] sm:$0xff]  ;;  %v3517_v31 = vld [vmem:[#allocation7 + $0xa0] sm:$0xff]  ;;  %v657_v33 = vadd.f32 %v120_v17, %v88_v13  ;;  %v658_v34 = vadd.f32 %v121_v29, %v89_v18 }
  0x5e   :  { %2417 = vmatprep.subr.bf16.mxu0 %v3457_v21  ;;  %2460 = vmatpush3.bf16.xpose.msra.mxu1 %v3423_v6  ;;  %v659_v35 = vadd.f32 %v122_v30, %v90_v22  ;;  %v3520_v36 = vld [vmem:[#allocation7 + $0xc8] sm:$0xff]  ;;  %v91_v39 = vld [vmem:[#allocation2 + $0x70] sm:$0xff]  ;;  %v92_v41 = vld [vmem:[#allocation2 + $0x78] sm:$0xff] }
  0x5f   :  { %206 = vmax.xlane.f32.xlu0 %v3459_v23  ;;  %2461 = vmatprep.subr.bf16.mxu1 %v3435_v9  ;;  %v683_v38 = vpack.c.bf16 %v657_v33, %v656_v32  ;;  %v123_v42 = vld [vmem:[#allocation5 + $0x70] sm:$0xff]  ;;  %v124_v46 = vld [vmem:[#allocation5 + $0x78] sm:$0xff]  ;;  %v93_v47 = vld [vmem:[#allocation2 + $0x80] sm:$0xff] }
  0x60   :  { %216 = vmax.xlane.f32.xlu1 %v3463_v24  ;;  %v125_v49 = vld [vmem:[#allocation5 + $0x80] sm:$0xff]  ;;  %v126_v50 = vld [vmem:[#allocation5 + $0x88] sm:$0xff]  ;;  %v660_v52 = vadd.f32 %v123_v42, %v91_v39  ;;  %v661_v53 = vadd.f32 %v124_v46, %v92_v41  ;;  %v95_v59 = vld [vmem:[#allocation2 + $0x90] sm:$0xff] }
  0x61   :  { %2418 = vmatpush3.bf16.msra.mxu0 %v3457_v21  ;;  %v3535_v51 = vld [vmem:[#allocation7 + $0xc0] sm:$0xff]  ;;  %v662_v54 = vadd.f32 %v125_v49, %v93_v47  ;;  %v3538_v57 = vld [vmem:[#allocation7 + $0xe8] sm:$0xff]  ;;  %v127_v63 = vld [vmem:[#allocation5 + $0x90] sm:$0xff] }
  0x62   :  { %2419 = vmatprep.subr.bf16.mxu0 %v3467_v25  ;;  %v685_v58 = vpack.c.bf16 %v661_v53, %v660_v52  ;;  %v128_v14 = vld [vmem:[#allocation5 + $0x98] sm:$0xff]  ;;  %v98_v17 = vld [vmem:[#allocation2 + $0xa8] sm:$0xff]  ;;  %v129_v18 = vld [vmem:[#allocation5 + $0xa0] sm:$0xff]  ;;  %v664_v30 = vadd.f32 %v127_v63, %v95_v59 }
  0x63   :  { %210 = vmax.xlane.f32.xlu0 %v3469_v26  ;;  %v130_v22 = vld [vmem:[#allocation5 + $0xa8] sm:$0xff]  ;;  %v3551_v29 = vld [vmem:[#allocation7 + $0xe0] sm:$0xff]  ;;  %v100_v39 = vld [vmem:[#allocation2 + $0xb8] sm:$0xff] }
  0x64   :  { %220 = vmax.xlane.f32.xlu1 %v3475_v28  ;;  %v131_v42 = vld [vmem:[#allocation5 + $0xb0] sm:$0xff]  ;;  %v101_v46 = vld [vmem:[#allocation2 + $0xc0] sm:$0xff] }
  0x65   :  { %2420 = vmatpush3.bf16.msra.mxu0 %v3467_v25  ;;  %v133_v47 = vld [vmem:[#allocation5 + $0xc0] sm:$0xff]  ;;  %v135_v59 = vld [vmem:[#allocation5 + $0xd0] sm:$0xff] }
  0x66   :  { %2421 = vmatprep.subr.bf16.mxu0 %v3473_v27  ;;  %2462 = vmatpush3.bf16.xpose.msra.mxu1 %v3435_v9  ;;  %v670_v52 = vadd.f32 %v133_v47, %v101_v46  ;;  %v105_v63 = vld [vmem:[#allocation2 + $0xe0] sm:$0xff] }
  0x67   :  { %214 = vmax.xlane.f32.xlu0 %v3481_v37  ;;  %2463 = vmatprep.subr.bf16.mxu1 %v3445_v12 }
  0x68   :  { %224 = vmax.xlane.f32.xlu1 %v3485_v40 }
  0x69   :  { %2422 = vmatpush3.bf16.msra.mxu0 %v3473_v27 }
  0x6a   :  { %2503 = vmatprep.subr.bf16.mxu0 %v3407_v1 }
  0x6b   :  { %218 = vmax.xlane.f32.xlu0 %v3489_v43 }
  0x6c   :  { %2424 = vmatmul.mubr.bf16.vlgmr.msra.gmra.mrb[0].mxu0 %v679_v44  ;;  %228 = vmax.xlane.f32.xlu1 %v3493_v45  ;;  %v684_v44 = vpack.c.bf16 %v659_v35, %v658_v34  ;;  %v667_v34 = vadd.f32 %v130_v22, %v98_v17 }
  0x6d   :  { %2427 = vmatprep.mubr.bf16.mxu0 %v680_v48  ;;  %2504 = vmatpush3.bf16.msra.mxu0 %v3407_v1  ;;  %v94_v48 = vld [vmem:[#allocation2 + $0x88] sm:$0xff] }
  0x6e   :  { %2505 = vmatprep.subr.bf16.mxu0 %v3411_v3  ;;  %2464 = vmatpush3.bf16.xpose.msra.mxu1 %v3445_v12  ;;  %v663_v56 = vadd.f32 %v126_v50, %v94_v48  ;;  %v134_v48 = vld [vmem:[#allocation5 + $0xc8] sm:$0xff] }
  0x6f   :  { %222 = vmax.xlane.f32.xlu0 %v3499_v55  ;;  %2465 = vmatprep.subr.bf16.mxu1 %v3457_v21 }
  0x70   :  { %232 = vmax.xlane.f32.xlu1 %v3502_v60  ;;  %v686_v13 = vpack.c.bf16 %v663_v56, %v662_v54  ;;  %v103_v56 = vld [vmem:[#allocation2 + $0xd0] sm:$0xff] }
  0x71   :  { %2506 = vmatpush3.bf16.msra.mxu0 %v3411_v3  ;;  %v3525_v3 = vld [vmem:[#allocation7 + $0xb0] sm:$0xff] }
  0x72   :  { %2507 = vmatprep.subr.bf16.mxu0 %v3423_v6 }
  0x73   :  { %226 = vmax.xlane.f32.xlu0 %v3507_v61 }
  0x74   :  { %2428 = vmatmul.mubr.bf16.gmra.mrb[4].mxu0 %v681_v62  ;;  %236 = vmax.xlane.f32.xlu1 %v3512_v19  ;;  %v96_v62 = vld [vmem:[#allocation2 + $0x98] sm:$0xff] }
  0x75   :  { %2431 = vmatprep.mubr.bf16.mxu0 %v682_v16  ;;  %2508 = vmatpush3.bf16.msra.mxu0 %v3423_v6  ;;  %v3530_v6 = vld [vmem:[#allocation7 + $0xd8] sm:$0xff]  ;;  %v97_v16 = vld [vmem:[#allocation2 + $0xa0] sm:$0xff]  ;;  %v665_v32 = vadd.f32 %v128_v14, %v96_v62  ;;  %v138_v14 = vld [vmem:[#allocation5 + $0xe8] sm:$0xff] }
  0x76   :  { %2509 = vmatprep.subr.bf16.mxu0 %v3435_v9  ;;  %2466 = vmatpush3.bf16.xpose.msra.mxu1 %v3457_v21  ;;  %v666_v33 = vadd.f32 %v129_v18, %v97_v16  ;;  %v136_v62 = vld [vmem:[#allocation5 + $0xd8] sm:$0xff]  ;;  %v672_v16 = vadd.f32 %v135_v59, %v103_v56 }
  0x77   :  { %230 = vmax.xlane.f32.xlu0 %v3517_v31  ;;  %2467 = vmatprep.subr.bf16.mxu1 %v3467_v25  ;;  %v687_v35 = vpack.c.bf16 %v665_v32, %v664_v30  ;;  %v107_v30 = vld [vmem:[#allocation2 + $0xf0] sm:$0xff] }
  0x78   :  { %240 = vmax.xlane.f32.xlu1 %v3520_v36  ;;  %v688_v41 = vpack.c.bf16 %v667_v34, %v666_v33  ;;  %v108_v33 = vld [vmem:[#allocation2 + $0xf8] sm:$0xff]  ;;  %v139_v34 = vld [vmem:[#allocation5 + $0xf0] sm:$0xff] }
  0x79   :  { %2510 = vmatpush3.bf16.msra.mxu0 %v3435_v9  ;;  %v3543_v9 = vld [vmem:[#allocation7 + $0xd0] sm:$0xff] }
  0x7a   :  { %2511 = vmatprep.subr.bf16.mxu0 %v3445_v12 }
  0x7b   :  { %234 = vmax.xlane.f32.xlu0 %v3525_v3 }
  0x7c   :  { %2432 = vmatmul.mubr.bf16.gmra.mrb[8].mxu0 %v683_v38  ;;  %244 = vmax.xlane.f32.xlu1 %v3530_v6  ;;  %v99_v38 = vld [vmem:[#allocation2 + $0xb0] sm:$0xff] }
  0x7d   :  { %2435 = vmatprep.mubr.bf16.mxu0 %v684_v44  ;;  %2512 = vmatpush3.bf16.msra.mxu0 %v3445_v12  ;;  %v189_v12 = vld [vmem:[#allocation7 + $0xf8] sm:$0xff]  ;;  %v668_v49 = vadd.f32 %v131_v42, %v99_v38  ;;  %v676_v38 = vadd.f32 %v139_v34, %v107_v30 }
  0x7e   :  { %2513 = vmatprep.subr.bf16.mxu0 %v3457_v21  ;;  %2468 = vmatpush3.bf16.xpose.msra.mxu1 %v3467_v25  ;;  %v132_v44 = vld [vmem:[#allocation5 + $0xb8] sm:$0xff] }
  0x7f   :  { %238 = vmax.xlane.f32.xlu0 %v3535_v51  ;;  %2469 = vmatprep.subr.bf16.mxu1 %v3473_v27  ;;  %v669_v50 = vadd.f32 %v132_v44, %v100_v39 }
  0x80   :  { %248 = vmax.xlane.f32.xlu1 %v3538_v57 }
  0x81   :  { %2514 = vmatpush3.bf16.msra.mxu0 %v3457_v21  ;;  %v3556_v21 = vld [vmem:[#allocation7 + $0xf0] sm:$0xff]  ;;  %v689_v54 = vpack.c.bf16 %v669_v50, %v668_v49 }
  0x82   :  { %2515 = vmatprep.subr.bf16.mxu0 %v3467_v25 }
  0x83   :  { %242 = vmax.xlane.f32.xlu0 %v3543_v9 }
  0x84   :  { %2436 = vmatmul.mubr.bf16.gmra.mrb[12].mxu0 %v685_v58  ;;  %252 = vmax.xlane.f32.xlu1 %v189_v12 }
  0x85   :  { %2439 = vmatprep.mubr.bf16.mxu0 %v686_v13  ;;  %2516 = vmatpush3.bf16.msra.mxu0 %v3467_v25  ;;  %v102_v25 = vld [vmem:[#allocation2 + $0xc8] sm:$0xff] }
  0x86   :  { %2517 = vmatprep.subr.bf16.mxu0 %v3473_v27  ;;  %2470 = vmatpush3.bf16.xpose.msra.mxu1 %v3473_v27  ;;  %v671_v53 = vadd.f32 %v134_v48, %v102_v25  ;;  %v106_v13 = vld [vmem:[#allocation2 + $0xe8] sm:$0xff] }
  0x87   :  { %246 = vmax.xlane.f32.xlu0 %v3551_v29  ;;  %2551 = vmatprep.subr.bf16.mxu1 %v3407_v1  ;;  %v104_v1 = vld [vmem:[#allocation2 + $0xd8] sm:$0xff]  ;;  %v675_v18 = vadd.f32 %v138_v14, %v106_v13 }
  0x88   :  { %v690_v58 = vpack.c.bf16 %v671_v53, %v670_v52  ;;  %v673_v12 = vadd.f32 %v136_v62, %v104_v1 }
  0x89   :  { %2518 = vmatpush3.bf16.msra.mxu0 %v3473_v27  ;;  %v137_v27 = vld [vmem:[#allocation5 + $0xe0] sm:$0xff] }
  0x8a   :  { %v674_v17 = vadd.f32 %v137_v27, %v105_v63  ;;  %v691_v22 = vpack.c.bf16 %v673_v12, %v672_v16 }
  0x8b   :  { %250 = vmax.xlane.f32.xlu0 %v3556_v21 }
  0x8c   :  { %2440 = vmatmul.mubr.bf16.gmra.mrb[16].mxu0 %v687_v35  ;;  %v692_v32 = vpack.c.bf16 %v675_v18, %v674_v17  ;;  %v140_v35 = vld [vmem:[#allocation5 + $0xf8] sm:$0xff] }
  0x8d   :  { %2443 = vmatprep.mubr.bf16.mxu0 %v688_v41  ;;  %v677_v39 = vadd.f32 %v140_v35, %v108_v33 }
  0x8f   :  { %v693_v41 = vpack.c.bf16 %v677_v39, %v676_v38 }
  0x94   :  { %2444 = vmatmul.mubr.bf16.gmra.mrb[20].mxu0 %v689_v54 }
  0x95   :  { %2447 = vmatprep.mubr.bf16.mxu0 %v690_v58 }
  0x9c   :  { %2448 = vmatmul.mubr.bf16.gmra.mrb[24].mxu0 %v691_v22 }
  0x9d   :  { %2451 = vmatprep.mubr.bf16.mxu0 %v692_v32 }
  0xa4   :  { %2452 = vmatmul.mubr.bf16.gmra.mrb[28].mxu0 %v693_v41 }
  0xd8   :  { %v191_v42 = vpop.xlane.xlu0 %190 }
  0xd9   :  { %v3563_v44 = vsub.f32 %v3404_v0, %v191_v42  ;;  %v197_v46 = vpop.xlane.xlu1 %196 }
  0xda   :  { %v3567_v47 = vsub.f32 %v3413_v4, %v197_v46 }
  0xdb   :  { %4916 = vst [vmem:[#allocation15_spill] sm:$0xff] %v3563_v44  ;;  %v286_v25 = vmul.f32 1.442695, %v3563_v44 }
  0xdc   :  { %4917 = vst [vmem:[#allocation16_spill] sm:$0xff] %v3567_v47  ;;  %v193_v48 = vpop.xlane.xlu0 %192  ;;  %v292_v53 = vmul.f32 1.442695, %v3567_v47 }
  0xdd   :  { %2590 = vpow2.f32 %v286_v25  ;;  %v3570_v49 = vsub.f32 %v3409_v2, %v193_v48  ;;  %v201_v50 = vpop.xlane.xlu1 %200 }
  0xde   :  { %v3575_v54 = vsub.f32 %v3418_v5, %v201_v50 }
  0xdf   :  { %4918 = vst [vmem:[#allocation17_spill] sm:$0xff] %v3570_v49  ;;  %v288_v52 = vmul.f32 1.442695, %v3570_v49 }
  0xe0   :  { %4919 = vst [vmem:[#allocation18_spill] sm:$0xff] %v3575_v54  ;;  %v195_v0 = vpop.xlane.xlu0 %194  ;;  %v296_v2 = vmul.f32 1.442695, %v3575_v54 }
  0xe1   :  { %2592 = vpow2.f32 %v288_v52  ;;  %v3578_v56 = vsub.f32 %v3425_v7, %v195_v0  ;;  %v205_v4 = vpop.xlane.xlu1 %204 }
  0xe2   :  { %2594 = vpow2.f32 %v292_v53  ;;  %v3583_v58 = vsub.f32 %v3431_v8, %v205_v4 }
  0xe3   :  { %4920 = vst [vmem:[#allocation19_spill] sm:$0xff] %v3578_v56  ;;  %v290_v1 = vmul.f32 1.442695, %v3578_v56 }
  0xe4   :  { %4921 = vst [vmem:[#allocation20_spill] sm:$0xff] %v3583_v58  ;;  %v199_v59 = vpop.xlane.xlu0 %198  ;;  %v300_v13 = vmul.f32 1.442695, %v3583_v58 }
  0xe5   :  { %2596 = vpow2.f32 %v290_v1  ;;  %v3586_v62 = vsub.f32 %v3437_v10, %v199_v59  ;;  %v209_v5 = vpop.xlane.xlu1 %208 }
  0xe6   :  { %2598 = vpow2.f32 %v296_v2  ;;  %v3593_v27 = vsub.f32 %v3441_v11, %v209_v5 }
  0xe7   :  { %4922 = vst [vmem:[#allocation21_spill] sm:$0xff] %v3586_v62  ;;  %v3588_v63 = vpop.eup %2590  ;;  %v294_v7 = vmul.f32 1.442695, %v3586_v62 }
  0xe8   :  { %4923 = vst [vmem:[#allocation22_spill] sm:$0xff] %v3593_v27  ;;  %350 = vadd.xlane.f32.xlu0 %v3588_v63  ;;  %v203_v8 = vpop.xlane.xlu0 %202  ;;  %v304_v17 = vmul.f32 1.442695, %v3593_v27 }
  0xe9   :  { %2600 = vpow2.f32 %v294_v7  ;;  %v3597_v14 = vsub.f32 %v3447_v15, %v203_v8  ;;  %v213_v10 = vpop.xlane.xlu1 %212 }
  0xea   :  { %2602 = vpow2.f32 %v300_v13  ;;  %v3604_v18 = vsub.f32 %v3453_v20, %v213_v10 }
  0xeb   :  { %4924 = vst [vmem:[#allocation23_spill] sm:$0xff] %v3597_v14  ;;  %v3599_v16 = vpop.eup %2592  ;;  %v298_v12 = vmul.f32 1.442695, %v3597_v14 }
  0xec   :  { %4925 = vst [vmem:[#allocation24_spill] sm:$0xff] %v3604_v18  ;;  %352 = vadd.xlane.f32.xlu1 %v3599_v16  ;;  %v207_v11 = vpop.xlane.xlu0 %206  ;;  %v3607_v22 = vpop.eup %2594  ;;  %v308_v34 = vmul.f32 1.442695, %v3604_v18 }
  0xed   :  { %2604 = vpow2.f32 %v298_v12  ;;  %v3610_v15 = vsub.f32 %v3459_v23, %v207_v11  ;;  %v217_v30 = vpop.xlane.xlu1 %216 }
  0xee   :  { %2606 = vpow2.f32 %v304_v17  ;;  %v3617_v20 = vsub.f32 %v3463_v24, %v217_v30 }
  0xef   :  { %4926 = vst [vmem:[#allocation25_spill] sm:$0xff] %v3610_v15  ;;  %v3612_v32 = vpop.eup %2596  ;;  %v302_v33 = vmul.f32 1.442695, %v3610_v15 }
  0xf0   :  { %4927 = vst [vmem:[#allocation26_spill] sm:$0xff] %v3617_v20  ;;  %356 = vadd.xlane.f32.xlu1 %v3607_v22  ;;  %354 = vadd.xlane.f32.xlu0 %v3612_v32  ;;  %v211_v35 = vpop.xlane.xlu0 %210  ;;  %v3621_v38 = vpop.eup %2598  ;;  %v312_v24 = vmul.f32 1.442695, %v3617_v20 }
  0xf1   :  { %4928 = vst [vmem:[#allocation27_spill] sm:$0xff] %v3621_v38  ;;  %2608 = vpow2.f32 %v302_v33  ;;  %v3624_v23 = vsub.f32 %v3469_v26, %v211_v35  ;;  %v221_v39 = vpop.xlane.xlu1 %220 }
  0xf2   :  { %2610 = vpow2.f32 %v308_v34  ;;  %v3631_v46 = vsub.f32 %v3475_v28, %v221_v39 }
  0xf3   :  { %4929 = vst [vmem:[#allocation28_spill] sm:$0xff] %v3624_v23  ;;  %v3626_v41 = vpop.eup %2600  ;;  %v306_v42 = vmul.f32 1.442695, %v3624_v23 }
  0xf4   :  { %4930 = vst [vmem:[#allocation29_spill] sm:$0xff] %v3626_v41  ;;  %4931 = vst [vmem:[#allocation30_spill] sm:$0xff] %v3631_v46  ;;  %360 = vadd.xlane.f32.xlu1 %v3621_v38  ;;  %358 = vadd.xlane.f32.xlu0 %v3626_v41  ;;  %v215_v25 = vpop.xlane.xlu0 %214  ;;  %v3635_v48 = vpop.eup %2602  ;;  %v316_v28 = vmul.f32 1.442695, %v3631_v46 }
  0xf5   :  { %4932 = vst [vmem:[#allocation31_spill] sm:$0xff] %v3635_v48  ;;  %2612 = vpow2.f32 %v306_v42  ;;  %v3638_v26 = vsub.f32 %v3481_v37, %v215_v25  ;;  %v225_v50 = vpop.xlane.xlu1 %224  ;;  %v3705_v25 = vld [vmem:[%s4777_s4] ss:$0 sm:$0xff] }
  0xf6   :  { %2614 = vpow2.f32 %v312_v24  ;;  %v3645_v0 = vsub.f32 %v3485_v40, %v225_v50 }
  0xf7   :  { %4933 = vst [vmem:[#allocation32_spill] sm:$0xff] %v3638_v26  ;;  %v3640_v52 = vpop.eup %2604  ;;  %v310_v53 = vmul.f32 1.442695, %v3638_v26 }
  0xf8   :  { %4934 = vst [vmem:[#allocation33_spill] sm:$0xff] %v3640_v52  ;;  %4935 = vst [vmem:[#allocation34_spill] sm:$0xff] %v3645_v0  ;;  %364 = vadd.xlane.f32.xlu1 %v3635_v48  ;;  %362 = vadd.xlane.f32.xlu0 %v3640_v52  ;;  %v219_v4 = vpop.xlane.xlu0 %218  ;;  %v3649_v1 = vpop.eup %2606  ;;  %v320_v40 = vmul.f32 1.442695, %v3645_v0 }
  0xf9   :  { %4936 = vst [vmem:[#allocation35_spill] sm:$0xff] %v3649_v1  ;;  %2616 = vpow2.f32 %v310_v53  ;;  %v3652_v37 = vsub.f32 %v3489_v43, %v219_v4  ;;  %v229_v2 = vpop.xlane.xlu1 %228 }
  0xfa   :  { %2618 = vpow2.f32 %v316_v28  ;;  %v3659_v7 = vsub.f32 %v3493_v45, %v229_v2 }
  0xfb   :  { %4937 = vst [vmem:[#allocation36_spill] sm:$0xff] %v3652_v37  ;;  %v3654_v59 = vpop.eup %2608  ;;  %v314_v5 = vmul.f32 1.442695, %v3652_v37 }
  0xfc   :  { %4938 = vst [vmem:[#allocation37_spill] sm:$0xff] %v3654_v59  ;;  %4939 = vst [vmem:[#allocation38_spill] sm:$0xff] %v3659_v7  ;;  %368 = vadd.xlane.f32.xlu1 %v3649_v1  ;;  %366 = vadd.xlane.f32.xlu0 %v3654_v59  ;;  %v223_v13 = vpop.xlane.xlu0 %222  ;;  %v3663_v8 = vpop.eup %2610  ;;  %v324_v17 = vmul.f32 1.442695, %v3659_v7 }
  0xfd   :  { %4940 = vst [vmem:[#allocation39_spill] sm:$0xff] %v3663_v8  ;;  %2620 = vpow2.f32 %v314_v5  ;;  %v3666_v43 = vsub.f32 %v3499_v55, %v223_v13 }
  0xfe   :  { %2622 = vpow2.f32 %v320_v40 }
  0xff   :  { %4941 = vst [vmem:[#allocation40_spill] sm:$0xff] %v3666_v43  ;;  %v3668_v10 = vpop.eup %2612  ;;  %v318_v12 = vmul.f32 1.442695, %v3666_v43 }
 0x100   :  { %4942 = vst [vmem:[#allocation41_spill] sm:$0xff] %v3668_v10  ;;  %372 = vadd.xlane.f32.xlu1 %v3663_v8  ;;  %370 = vadd.xlane.f32.xlu0 %v3668_v10  ;;  %v227_v45 = vpop.xlane.xlu0 %226  ;;  %v3674_v11 = vpop.eup %2614 }
 0x101   :  { %4943 = vst [vmem:[#allocation42_spill] sm:$0xff] %v3674_v11  ;;  %2624 = vpow2.f32 %v318_v12  ;;  %v3677_v30 = vsub.f32 %v3507_v61, %v227_v45 }
 0x102   :  { %2626 = vpow2.f32 %v324_v17 }
 0x103   :  { %4944 = vst [vmem:[#allocation43_spill] sm:$0xff] %v3677_v30  ;;  %v3679_v55 = vpop.eup %2616  ;;  %v322_v33 = vmul.f32 1.442695, %v3677_v30 }
 0x104   :  { %4945 = vst [vmem:[#allocation44_spill] sm:$0xff] %v3679_v55  ;;  %376 = vadd.xlane.f32.xlu1 %v3674_v11  ;;  %374 = vadd.xlane.f32.xlu0 %v3679_v55  ;;  %v3684_v34 = vpop.eup %2618 }
 0x105   :  { %4946 = vst [vmem:[#allocation45_spill] sm:$0xff] %v3684_v34  ;;  %2628 = vpow2.f32 %v322_v33 }
 0x107   :  { %v3686_v35 = vpop.eup %2620 }
 0x108   :  { %4947 = vst [vmem:[#allocation46_spill] sm:$0xff] %v3686_v35  ;;  %380 = vadd.xlane.f32.xlu1 %v3684_v34  ;;  %378 = vadd.xlane.f32.xlu0 %v3686_v35  ;;  %v3690_v61 = vpop.eup %2622 }
 0x109   :  { %4948 = vst [vmem:[#allocation47_spill] sm:$0xff] %v3690_v61 }
 0x10b   :  { %v3692_v39 = vpop.eup %2624 }
 0x10c   :  { %4949 = vst [vmem:[#allocation48_spill] sm:$0xff] %v3692_v39  ;;  %384 = vadd.xlane.f32.xlu1 %v3690_v61  ;;  %382 = vadd.xlane.f32.xlu0 %v3692_v39  ;;  %v3696_v42 = vpop.eup %2626 }
 0x10d   :  { %4950 = vst [vmem:[#allocation49_spill] sm:$0xff] %v3696_v42 }
 0x10f   :  { %v3698_v24 = vpop.eup %2628 }
 0x110   :  { %4951 = vst [vmem:[#allocation50_spill] sm:$0xff] %v3698_v24  ;;  %388 = vadd.xlane.f32.xlu1 %v3696_v42  ;;  %386 = vadd.xlane.f32.xlu0 %v3698_v24 }
 0x13f   :  { %v2425_v50 = vpop.f32.mrb[0].mxu0 }
 0x140   :  { %v3708_v53 = vadd.f32 %v2425_v50, %v3705_v25  ;;  %v782_v28 = vpop.f32.mrb[1].mxu0 }
 0x141   :  { %v3711_v4 = vadd.f32 %v3705_v25, %v782_v28  ;;  %v2426_v2 = vpop.f32.mrb[2].mxu0 }
 0x142   :  { %913 = vmax.xlane.f32.xlu0 %v3708_v53  ;;  %v785_v5 = vpop.f32.mrb[3].mxu0  ;;  %v3716_v40 = vadd.f32 %v2426_v2, %v3705_v25 }
 0x143   :  { %909 = vmax.xlane.f32.xlu1 %v3711_v4  ;;  %v3723_v45 = vadd.f32 %v3705_v25, %v785_v5 }
 0x147   :  { %v2429_v13 = vpop.f32.mrb[4].mxu0  ;;  %915 = vmax.xlane.f32.xlu1 %v3716_v40 }
 0x148   :  { %v3720_v12 = vadd.f32 %v2429_v13, %v3705_v25  ;;  %v798_v17 = vpop.f32.mrb[5].mxu0 }
 0x149   :  { %v2430_v33 = vpop.f32.mrb[6].mxu0  ;;  %v3726_v50 = vadd.f32 %v3705_v25, %v798_v17 }
 0x14a   :  { %921 = vmax.xlane.f32.xlu0 %v3720_v12  ;;  %v801_v28 = vpop.f32.mrb[7].mxu0  ;;  %v3731_v2 = vadd.f32 %v2430_v33, %v3705_v25 }
 0x14b   :  { %911 = vmax.xlane.f32.xlu1 %v3723_v45  ;;  %v3739_v17 = vadd.f32 %v3705_v25, %v801_v28 }
 0x14e   :  { %917 = vmax.xlane.f32.xlu0 %v3726_v50 }
 0x14f   :  { %v2433_v13 = vpop.f32.mrb[8].mxu0  ;;  %923 = vmax.xlane.f32.xlu1 %v3731_v2 }
 0x150   :  { %v3736_v5 = vadd.f32 %v2433_v13, %v3705_v25  ;;  %v814_v7 = vpop.f32.mrb[9].mxu0 }
 0x151   :  { %v2434_v30 = vpop.f32.mrb[10].mxu0  ;;  %v3742_v0 = vadd.f32 %v3705_v25, %v814_v7 }
 0x152   :  { %v817_v43 = vpop.f32.mrb[11].mxu0  ;;  %929 = vmax.xlane.f32.xlu0 %v3736_v5  ;;  %v3747_v33 = vadd.f32 %v2434_v30, %v3705_v25 }
 0x153   :  { %919 = vmax.xlane.f32.xlu1 %v3739_v17  ;;  %v3755_v7 = vadd.f32 %v3705_v25, %v817_v43 }
 0x156   :  { %925 = vmax.xlane.f32.xlu0 %v3742_v0 }
 0x157   :  { %v2437_v13 = vpop.f32.mrb[12].mxu0  ;;  %931 = vmax.xlane.f32.xlu1 %v3747_v33 }
 0x158   :  { %v3752_v28 = vadd.f32 %v2437_v13, %v3705_v25  ;;  %v830_v46 = vpop.f32.mrb[13].mxu0 }
 0x159   :  { %v2438_v37 = vpop.f32.mrb[14].mxu0  ;;  %v3758_v20 = vadd.f32 %v3705_v25, %v830_v46 }
 0x15a   :  { %v833_v26 = vpop.f32.mrb[15].mxu0  ;;  %937 = vmax.xlane.f32.xlu0 %v3752_v28  ;;  %v3763_v30 = vadd.f32 %v2438_v37, %v3705_v25  ;;  %v231_v37 = vpop.xlane.xlu0 %230 }
 0x15b   :  { %927 = vmax.xlane.f32.xlu1 %v3755_v7  ;;  %v3771_v46 = vadd.f32 %v3705_v25, %v833_v26  ;;  %v3795_v44 = vsub.f32 %v3517_v31, %v231_v37 }
 0x15d   :  { %4952 = vst [vmem:[#allocation51_spill] sm:$0xff] %v3795_v44  ;;  %v326_v61 = vmul.f32 1.442695, %v3795_v44 }
 0x15e   :  { %933 = vmax.xlane.f32.xlu0 %v3758_v20  ;;  %v235_v47 = vpop.xlane.xlu0 %234 }
 0x15f   :  { %v2441_v13 = vpop.f32.mrb[16].mxu0  ;;  %939 = vmax.xlane.f32.xlu1 %v3763_v30  ;;  %v3807_v42 = vsub.f32 %v3525_v3, %v235_v47  ;;  %2630 = vpow2.f32 %v326_v61 }
 0x160   :  { %v3768_v43 = vadd.f32 %v2441_v13, %v3705_v25  ;;  %v846_v18 = vpop.f32.mrb[17].mxu0 }
 0x161   :  { %v2442_v23 = vpop.f32.mrb[18].mxu0  ;;  %v3774_v27 = vadd.f32 %v3705_v25, %v846_v18  ;;  %v233_v18 = vpop.xlane.xlu1 %232  ;;  %4953 = vst [vmem:[#allocation52_spill] sm:$0xff] %v3807_v42 }
 0x162   :  { %v849_v15 = vpop.f32.mrb[19].mxu0  ;;  %945 = vmax.xlane.f32.xlu0 %v3768_v43  ;;  %v3779_v58 = vadd.f32 %v2442_v23, %v3705_v25  ;;  %v239_v24 = vpop.xlane.xlu0 %238  ;;  %v3813_v37 = vsub.f32 %v3502_v60, %v233_v18 }
 0x163   :  { %935 = vmax.xlane.f32.xlu1 %v3771_v46  ;;  %v3787_v54 = vadd.f32 %v3705_v25, %v849_v15  ;;  %v3822_v3 = vsub.f32 %v3535_v51, %v239_v24 }
 0x164   :  { %4954 = vst [vmem:[#allocation53_spill] sm:$0xff] %v3813_v37  ;;  %v328_v60 = vmul.f32 1.442695, %v3813_v37 }
 0x165   :  { %v237_v15 = vpop.xlane.xlu1 %236  ;;  %4955 = vst [vmem:[#allocation54_spill] sm:$0xff] %v3822_v3  ;;  %v334_v24 = vmul.f32 1.442695, %v3822_v3 }
 0x166   :  { %941 = vmax.xlane.f32.xlu0 %v3774_v27  ;;  %v243_v18 = vpop.xlane.xlu0 %242 }
 0x167   :  { %v2445_v13 = vpop.f32.mrb[20].mxu0  ;;  %947 = vmax.xlane.f32.xlu1 %v3779_v58 }
 0x168   :  { %v3784_v26 = vadd.f32 %v2445_v13, %v3705_v25  ;;  %v862_v14 = vpop.f32.mrb[21].mxu0 }
 0x169   :  { %v2446_v62 = vpop.f32.mrb[22].mxu0  ;;  %v3790_v56 = vadd.f32 %v3705_v25, %v862_v14  ;;  %v241_v47 = vpop.xlane.xlu1 %240 }
 0x16a   :  { %v865_v23 = vpop.f32.mrb[23].mxu0  ;;  %953 = vmax.xlane.f32.xlu0 %v3784_v26  ;;  %v3798_v13 = vadd.f32 %v2446_v62, %v3705_v25  ;;  %v3845_v37 = vsub.f32 %v3520_v36, %v241_v47 }
 0x16b   :  { %943 = vmax.xlane.f32.xlu1 %v3787_v54  ;;  %v3810_v31 = vadd.f32 %v3705_v25, %v865_v23 }
 0x16c   :  { %4958 = vst [vmem:[#allocation57_spill] sm:$0xff] %v3845_v37  ;;  %v336_v36 = vmul.f32 1.442695, %v3845_v37 }
 0x16e   :  { %949 = vmax.xlane.f32.xlu0 %v3790_v56 }
 0x16f   :  { %v2449_v49 = vpop.f32.mrb[24].mxu0  ;;  %955 = vmax.xlane.f32.xlu1 %v3798_v13 }
 0x170   :  { %v3803_v14 = vadd.f32 %v2449_v49, %v3705_v25  ;;  %v878_v39 = vpop.f32.mrb[25].mxu0  ;;  %v330_v49 = vmul.f32 1.442695, %v3807_v42 }
 0x171   :  { %v2450_v62 = vpop.f32.mrb[26].mxu0  ;;  %v3816_v35 = vadd.f32 %v3705_v25, %v878_v39  ;;  %v3829_v39 = vsub.f32 %v3512_v19, %v237_v15 }
 0x172   :  { %v881_v55 = vpop.f32.mrb[27].mxu0  ;;  %961 = vmax.xlane.f32.xlu0 %v3803_v14  ;;  %v3825_v23 = vadd.f32 %v2450_v62, %v3705_v25  ;;  %2632 = vpow2.f32 %v330_v49  ;;  %v3838_v62 = vsub.f32 %v3543_v9, %v243_v18  ;;  %v245_v49 = vpop.xlane.xlu1 %244 }
 0x173   :  { %951 = vmax.xlane.f32.xlu1 %v3810_v31  ;;  %4956 = vst [vmem:[#allocation55_spill] sm:$0xff] %v3829_v39  ;;  %v3841_v42 = vadd.f32 %v3705_v25, %v881_v55  ;;  %2634 = vpow2.f32 %v328_v60  ;;  %v332_v15 = vmul.f32 1.442695, %v3829_v39  ;;  %v247_v9 = vpop.xlane.xlu0 %246  ;;  %v3861_v47 = vsub.f32 %v3530_v6, %v245_v49 }
 0x174   :  { %4957 = vst [vmem:[#allocation56_spill] sm:$0xff] %v3838_v62  ;;  %2636 = vpow2.f32 %v334_v24  ;;  %v338_v55 = vmul.f32 1.442695, %v3838_v62  ;;  %v3854_v60 = vsub.f32 %v3551_v29, %v247_v9 }
 0x175   :  { %2638 = vpow2.f32 %v332_v15  ;;  %4960 = vst [vmem:[#allocation59_spill] sm:$0xff] %v3861_v47 }
 0x176   :  { %957 = vmax.xlane.f32.xlu0 %v3816_v35  ;;  %4959 = vst [vmem:[#allocation58_spill] sm:$0xff] %v3854_v60  ;;  %2640 = vpow2.f32 %v338_v55  ;;  %v342_v24 = vmul.f32 1.442695, %v3854_v60  ;;  %v249_v29 = vpop.xlane.xlu1 %248 }
 0x177   :  { %v2453_v44 = vpop.f32.mrb[28].mxu0  ;;  %963 = vmax.xlane.f32.xlu1 %v3825_v23  ;;  %2642 = vpow2.f32 %v336_v36  ;;  %v3873_v15 = vsub.f32 %v3538_v57, %v249_v29 }
 0x178   :  { %v3834_v61 = vadd.f32 %v2453_v44, %v3705_v25  ;;  %v894_v51 = vpop.f32.mrb[29].mxu0  ;;  %2644 = vpow2.f32 %v342_v24 }
 0x179   :  { %v2454_v19 = vpop.f32.mrb[30].mxu0  ;;  %v3848_v44 = vadd.f32 %v3705_v25, %v894_v51  ;;  %v3864_v51 = vpop.eup %2630  ;;  %4962 = vst [vmem:[#allocation61_spill] sm:$0xff] %v3873_v15  ;;  %v344_v55 = vmul.f32 1.442695, %v3873_v15 }
 0x17a   :  { %v897_v11 = vpop.f32.mrb[31].mxu0  ;;  %969 = vmax.xlane.f32.xlu0 %v3834_v61  ;;  %v3857_v18 = vadd.f32 %v2454_v19, %v3705_v25  ;;  %4961 = vst [vmem:[#allocation60_spill] sm:$0xff] %v3864_v51  ;;  %v340_v19 = vmul.f32 1.442695, %v3861_v47  ;;  %v3902_v15 = vpop.xlane.xlu0 %250 }
 0x17b   :  { %959 = vmax.xlane.f32.xlu1 %v3841_v42  ;;  %v3869_v9 = vadd.f32 %v3705_v25, %v897_v11 }
 0x17c   :  { %v3876_v6 = vpop.eup %2632  ;;  %2646 = vpow2.f32 %v340_v19  ;;  %v3900_v19 = vpop.xlane.xlu1 %252 }
 0x17d   :  { %4963 = vst [vmem:[#allocation62_spill] sm:$0xff] %v3876_v6  ;;  %v3879_v49 = vpop.eup %2634  ;;  %2648 = vpow2.f32 %v344_v55 }
 0x17e   :  { %965 = vmax.xlane.f32.xlu0 %v3848_v44  ;;  %4964 = vst [vmem:[#allocation63_spill] sm:$0xff] %v3879_v49  ;;  %v3883_v11 = vpop.eup %2636  ;;  %v3910_v47 = vpop.xlane.xlu0 %350 }
 0x17f   :  { %971 = vmax.xlane.f32.xlu1 %v3857_v18  ;;  %4965 = vst [vmem:[#allocation64_spill] sm:$0xff] %v3883_v11  ;;  %v3886_v57 = vpop.eup %2638  ;;  %4973 = vst [vmem:[#allocation72_spill] sm:$0xff] %v3910_v47 }
 0x180   :  { %4966 = vst [vmem:[#allocation65_spill] sm:$0xff] %v3886_v57  ;;  %v3889_v25 = vpop.eup %2640  ;;  %v3908_v60 = vpop.xlane.xlu1 %352 }
 0x181   :  { %4967 = vst [vmem:[#allocation66_spill] sm:$0xff] %v3889_v25  ;;  %v3892_v36 = vpop.eup %2642  ;;  %4972 = vst [vmem:[#allocation71_spill] sm:$0xff] %v3908_v60 }
 0x182   :  { %390 = vadd.xlane.f32.xlu0 %v3864_v51  ;;  %4968 = vst [vmem:[#allocation67_spill] sm:$0xff] %v3892_v36  ;;  %v3895_v24 = vpop.eup %2644  ;;  %v3913_v62 = vpop.xlane.xlu0 %354 }
 0x183   :  { %967 = vmax.xlane.f32.xlu1 %v3869_v9  ;;  %4969 = vst [vmem:[#allocation68_spill] sm:$0xff] %v3895_v24  ;;  %4974 = vst [vmem:[#allocation73_spill] sm:$0xff] %v3913_v62 }
 0x184   :  { %v3915_v37 = vpop.xlane.xlu1 %356 }
 0x185   :  { %4975 = vst [vmem:[#allocation74_spill] sm:$0xff] %v3915_v37 }
 0x186   :  { %394 = vadd.xlane.f32.xlu0 %v3876_v6  ;;  %v3898_v29 = vpop.eup %2646  ;;  %v3917_v3 = vpop.xlane.xlu0 %358 }
 0x187   :  { %392 = vadd.xlane.f32.xlu1 %v3879_v49  ;;  %4970 = vst [vmem:[#allocation69_spill] sm:$0xff] %v3898_v29  ;;  %v3906_v55 = vpop.eup %2648  ;;  %4976 = vst [vmem:[#allocation75_spill] sm:$0xff] %v3917_v3 }
 0x188   :  { %4971 = vst [vmem:[#allocation70_spill] sm:$0xff] %v3906_v55  ;;  %v3919_v39 = vpop.xlane.xlu1 %360 }
 0x189   :  { %4977 = vst [vmem:[#allocation76_spill] sm:$0xff] %v3919_v39 }
 0x18a   :  { %398 = vadd.xlane.f32.xlu0 %v3883_v11 }
 0x18b   :  { %396 = vadd.xlane.f32.xlu1 %v3886_v57 }
 0x18e   :  { %402 = vadd.xlane.f32.xlu0 %v3889_v25  ;;  %v3921_v25 = vpop.xlane.xlu0 %362 }
 0x18f   :  { %400 = vadd.xlane.f32.xlu1 %v3892_v36  ;;  %4978 = vst [vmem:[#allocation77_spill] sm:$0xff] %v3921_v25 }
 0x192   :  { %406 = vadd.xlane.f32.xlu0 %v3895_v24  ;;  %v3923_v24 = vpop.xlane.xlu1 %364  ;;  %v3925_v36 = vpop.xlane.xlu0 %366 }
 0x193   :  { %404 = vadd.xlane.f32.xlu1 %v3898_v29  ;;  %4979 = vst [vmem:[#allocation78_spill] sm:$0xff] %v3923_v24 }
 0x196   :  { %v3927_v11 = vpop.xlane.xlu1 %368  ;;  %v3929_v29 = vpop.xlane.xlu0 %370 }
 0x197   :  { %408 = vadd.xlane.f32.xlu1 %v3906_v55  ;;  %4980 = vst [vmem:[#allocation79_spill] sm:$0xff] %v3927_v11  ;;  %4981 = vst [vmem:[#allocation80_spill] sm:$0xff] %v3929_v29 }
 0x19a   :  { %v3931_v6 = vpop.xlane.xlu1 %372  ;;  %v3933_v55 = vpop.xlane.xlu0 %374 }
 0x19b   :  { %4982 = vst [vmem:[#allocation81_spill] sm:$0xff] %v3931_v6  ;;  %4983 = vst [vmem:[#allocation82_spill] sm:$0xff] %v3933_v55 }
 0x19e   :  { %v3935_v49 = vpop.xlane.xlu1 %376  ;;  %v3937_v51 = vpop.xlane.xlu0 %378 }
 0x19f   :  { %4984 = vst [vmem:[#allocation83_spill] sm:$0xff] %v3935_v49  ;;  %4985 = vst [vmem:[#allocation84_spill] sm:$0xff] %v3937_v51 }
 0x1a2   :  { %v3939_v57 = vpop.xlane.xlu1 %380  ;;  %v3941_v34 = vpop.xlane.xlu0 %382 }
 0x1a3   :  { %4986 = vst [vmem:[#allocation85_spill] sm:$0xff] %v3939_v57  ;;  %4987 = vst [vmem:[#allocation86_spill] sm:$0xff] %v3941_v34 }
 0x1a6   :  { %v3943_v10 = vpop.xlane.xlu1 %384  ;;  %v3945_v59 = vpop.xlane.xlu0 %386 }
 0x1a7   :  { %4988 = vst [vmem:[#allocation87_spill] sm:$0xff] %v3943_v10  ;;  %4989 = vst [vmem:[#allocation88_spill] sm:$0xff] %v3945_v59 }
 0x1aa   :  { %v3947_v1 = vpop.xlane.xlu1 %388 }
 0x1ab   :  { %4990 = vst [vmem:[#allocation89_spill] sm:$0xff] %v3947_v1 }
 0x1cf   :  { %v914_v8 = vpop.xlane.xlu0 %913 }
 0x1d0   :  { %v975_v52 = vsub.f32 %v3708_v53, %v914_v8  ;;  %v910_v41 = vpop.xlane.xlu1 %909 }
 0x1d1   :  { %v973_v55 = vsub.f32 %v3711_v4, %v910_v41 }
 0x1d2   :  { %v1009_v38 = vmul.f32 1.442695, %v975_v52 }
 0x1d3   :  { %v1005_v48 = vmul.f32 1.442695, %v973_v55 }
 0x1d4   :  { %2650 = vpow2.f32 %v1009_v38  ;;  %v916_v51 = vpop.xlane.xlu1 %915 }
 0x1d5   :  { %v976_v57 = vsub.f32 %v3716_v40, %v916_v51  ;;  %2652 = vpow2.f32 %v1005_v48 }
 0x1d7   :  { %v1011_v49 = vmul.f32 1.442695, %v976_v57  ;;  %v922_v34 = vpop.xlane.xlu0 %921 }
 0x1d8   :  { %v979_v10 = vsub.f32 %v3720_v12, %v922_v34  ;;  %v912_v59 = vpop.xlane.xlu1 %911 }
 0x1d9   :  { %2654 = vpow2.f32 %v1011_v49  ;;  %v974_v1 = vsub.f32 %v3723_v45, %v912_v59 }
 0x1da   :  { %v1017_v29 = vmul.f32 1.442695, %v979_v10 }
 0x1db   :  { %v1007_v8 = vmul.f32 1.442695, %v974_v1  ;;  %v918_v53 = vpop.xlane.xlu0 %917 }
 0x1dc   :  { %2656 = vpow2.f32 %v1017_v29  ;;  %v977_v41 = vsub.f32 %v3726_v50, %v918_v53  ;;  %v924_v38 = vpop.xlane.xlu1 %923 }
 0x1dd   :  { %2658 = vpow2.f32 %v1007_v8  ;;  %v980_v52 = vsub.f32 %v3731_v2, %v924_v38 }
 0x1de   :  { %v3956_v4 = vpop.eup %2650  ;;  %v1013_v40 = vmul.f32 1.442695, %v977_v41 }
 0x1df   :  { %v1019_v48 = vmul.f32 1.442695, %v980_v52  ;;  %1073 = vadd.xlane.f32.xlu0 %v3956_v4  ;;  %v930_v34 = vpop.xlane.xlu0 %929  ;;  %v3961_v12 = vpop.eup %2652 }
 0x1e0   :  { %2660 = vpow2.f32 %v1013_v40  ;;  %v983_v59 = vsub.f32 %v3736_v5, %v930_v34  ;;  %v920_v10 = vpop.xlane.xlu1 %919 }
 0x1e1   :  { %2662 = vpow2.f32 %v1019_v48  ;;  %v978_v1 = vsub.f32 %v3739_v17, %v920_v10 }
 0x1e2   :  { %v1025_v45 = vmul.f32 1.442695, %v983_v59 }
 0x1e3   :  { %v3963_v50 = vpop.eup %2654  ;;  %v1015_v2 = vmul.f32 1.442695, %v978_v1  ;;  %v926_v51 = vpop.xlane.xlu0 %925  ;;  %1069 = vadd.xlane.f32.xlu0 %v3961_v12 }
 0x1e4   :  { %2664 = vpow2.f32 %v1025_v45  ;;  %v981_v49 = vsub.f32 %v3742_v0, %v926_v51  ;;  %1075 = vadd.xlane.f32.xlu1 %v3963_v50  ;;  %v932_v57 = vpop.xlane.xlu1 %931 }
 0x1e5   :  { %2666 = vpow2.f32 %v1015_v2  ;;  %v984_v5 = vsub.f32 %v3747_v33, %v932_v57 }
 0x1e6   :  { %v3969_v29 = vpop.eup %2656  ;;  %v1021_v17 = vmul.f32 1.442695, %v981_v49 }
 0x1e7   :  { %v3971_v55 = vpop.eup %2658  ;;  %v1027_v8 = vmul.f32 1.442695, %v984_v5  ;;  %v938_v53 = vpop.xlane.xlu0 %937  ;;  %1081 = vadd.xlane.f32.xlu0 %v3969_v29 }
 0x1e8   :  { %2668 = vpow2.f32 %v1021_v17  ;;  %v987_v41 = vsub.f32 %v3752_v28, %v938_v53  ;;  %1071 = vadd.xlane.f32.xlu1 %v3971_v55  ;;  %v928_v0 = vpop.xlane.xlu1 %927 }
 0x1e9   :  { %2670 = vpow2.f32 %v1027_v8  ;;  %v982_v38 = vsub.f32 %v3755_v7, %v928_v0 }
 0x1ea   :  { %v3977_v52 = vpop.eup %2660  ;;  %v1033_v33 = vmul.f32 1.442695, %v987_v41 }
 0x1eb   :  { %v3979_v40 = vpop.eup %2662  ;;  %v1023_v48 = vmul.f32 1.442695, %v982_v38  ;;  %v934_v34 = vpop.xlane.xlu0 %933  ;;  %1077 = vadd.xlane.f32.xlu0 %v3977_v52 }
 0x1ec   :  { %2672 = vpow2.f32 %v1033_v33  ;;  %v985_v59 = vsub.f32 %v3758_v20, %v934_v34  ;;  %1083 = vadd.xlane.f32.xlu1 %v3979_v40  ;;  %v940_v28 = vpop.xlane.xlu1 %939 }
 0x1ed   :  { %2674 = vpow2.f32 %v1023_v48  ;;  %v988_v10 = vsub.f32 %v3763_v30, %v940_v28 }
 0x1ee   :  { %v3985_v1 = vpop.eup %2664  ;;  %v1029_v7 = vmul.f32 1.442695, %v985_v59 }
 0x1ef   :  { %v3987_v45 = vpop.eup %2666  ;;  %v1035_v2 = vmul.f32 1.442695, %v988_v10  ;;  %v946_v51 = vpop.xlane.xlu0 %945  ;;  %1089 = vadd.xlane.f32.xlu0 %v3985_v1 }
 0x1f0   :  { %2676 = vpow2.f32 %v1029_v7  ;;  %v991_v49 = vsub.f32 %v3768_v43, %v946_v51  ;;  %1079 = vadd.xlane.f32.xlu1 %v3987_v45  ;;  %v936_v20 = vpop.xlane.xlu1 %935 }
 0x1f1   :  { %2678 = vpow2.f32 %v1035_v2  ;;  %v986_v57 = vsub.f32 %v3771_v46, %v936_v20 }
 0x1f2   :  { %v3993_v5 = vpop.eup %2668  ;;  %v1041_v30 = vmul.f32 1.442695, %v991_v49 }
 0x1f3   :  { %v3995_v17 = vpop.eup %2670  ;;  %v1031_v8 = vmul.f32 1.442695, %v986_v57  ;;  %v942_v53 = vpop.xlane.xlu0 %941  ;;  %1085 = vadd.xlane.f32.xlu0 %v3993_v5 }
 0x1f4   :  { %2680 = vpow2.f32 %v1041_v30  ;;  %v989_v41 = vsub.f32 %v3774_v27, %v942_v53  ;;  %1091 = vadd.xlane.f32.xlu1 %v3995_v17  ;;  %v948_v43 = vpop.xlane.xlu1 %947 }
 0x1f5   :  { %2682 = vpow2.f32 %v1031_v8  ;;  %v992_v0 = vsub.f32 %v3779_v58, %v948_v43 }
 0x1f6   :  { %v4001_v38 = vpop.eup %2672  ;;  %v1037_v46 = vmul.f32 1.442695, %v989_v41 }
 0x1f7   :  { %v4003_v33 = vpop.eup %2674  ;;  %v1043_v48 = vmul.f32 1.442695, %v992_v0  ;;  %v954_v34 = vpop.xlane.xlu0 %953  ;;  %1097 = vadd.xlane.f32.xlu0 %v4001_v38 }
 0x1f8   :  { %2684 = vpow2.f32 %v1037_v46  ;;  %v995_v59 = vsub.f32 %v3784_v26, %v954_v34  ;;  %1087 = vadd.xlane.f32.xlu1 %v4003_v33  ;;  %v944_v27 = vpop.xlane.xlu1 %943 }
 0x1f9   :  { %2686 = vpow2.f32 %v1043_v48  ;;  %v990_v28 = vsub.f32 %v3787_v54, %v944_v27 }
 0x1fa   :  { %v4009_v10 = vpop.eup %2676  ;;  %v1049_v58 = vmul.f32 1.442695, %v995_v59  ;;  %v4032_v59 = vsub.f32 %v3556_v21, %v3902_v15  ;;  %v3102_v15 = vld [vmem:[#allocation7 + $0xf8] sm:$0xff] }
 0x1fb   :  { %v4011_v7 = vpop.eup %2678  ;;  %v1039_v2 = vmul.f32 1.442695, %v990_v28  ;;  %v950_v51 = vpop.xlane.xlu0 %949  ;;  %1093 = vadd.xlane.f32.xlu0 %v4009_v10 }
 0x1fc   :  { %2688 = vpow2.f32 %v1049_v58  ;;  %v993_v49 = vsub.f32 %v3790_v56, %v950_v51  ;;  %1099 = vadd.xlane.f32.xlu1 %v4011_v7  ;;  %v956_v26 = vpop.xlane.xlu1 %955  ;;  %4991 = vst [vmem:[#allocation90_spill] sm:$0xff] %v4032_v59  ;;  %v346_v21 = vmul.f32 1.442695, %v4032_v59 }
 0x1fd   :  { %2690 = vpow2.f32 %v1039_v2  ;;  %v996_v20 = vsub.f32 %v3798_v13, %v956_v26  ;;  %v4045_v26 = vsub.f32 %v3102_v15, %v3900_v19 }
 0x1fe   :  { %v4017_v57 = vpop.eup %2680  ;;  %v1045_v54 = vmul.f32 1.442695, %v993_v49 }
 0x1ff   :  { %v4019_v30 = vpop.eup %2682  ;;  %v1051_v8 = vmul.f32 1.442695, %v996_v20  ;;  %v962_v53 = vpop.xlane.xlu0 %961  ;;  %1105 = vadd.xlane.f32.xlu0 %v4017_v57  ;;  %4992 = vst [vmem:[#allocation91_spill] sm:$0xff] %v4045_v26 }
 0x200   :  { %2692 = vpow2.f32 %v1045_v54  ;;  %v999_v41 = vsub.f32 %v3803_v14, %v962_v53  ;;  %1095 = vadd.xlane.f32.xlu1 %v4019_v30  ;;  %v952_v56 = vpop.xlane.xlu1 %951 }
 0x201   :  { %2694 = vpow2.f32 %v1051_v8  ;;  %v994_v43 = vsub.f32 %v3810_v31, %v952_v56 }
 0x202   :  { %v4025_v0 = vpop.eup %2684  ;;  %v1057_v13 = vmul.f32 1.442695, %v999_v41 }
 0x203   :  { %v4027_v46 = vpop.eup %2686  ;;  %v1047_v48 = vmul.f32 1.442695, %v994_v43  ;;  %v958_v34 = vpop.xlane.xlu0 %957  ;;  %1101 = vadd.xlane.f32.xlu0 %v4025_v0  ;;  %v348_v43 = vmul.f32 1.442695, %v4045_v26 }
 0x204   :  { %2696 = vpow2.f32 %v1057_v13  ;;  %v997_v14 = vsub.f32 %v3816_v35, %v958_v34  ;;  %1107 = vadd.xlane.f32.xlu1 %v4027_v46  ;;  %v964_v27 = vpop.xlane.xlu1 %963 }
 0x205   :  { %2698 = vpow2.f32 %v1047_v48  ;;  %v1000_v31 = vsub.f32 %v3825_v23, %v964_v27 }
 0x206   :  { %v4037_v28 = vpop.eup %2688  ;;  %v1053_v58 = vmul.f32 1.442695, %v997_v14 }
 0x207   :  { %v4039_v2 = vpop.eup %2690  ;;  %v1059_v51 = vmul.f32 1.442695, %v1000_v31  ;;  %v970_v49 = vpop.xlane.xlu0 %969  ;;  %1113 = vadd.xlane.f32.xlu0 %v4037_v28 }
 0x208   :  { %2700 = vpow2.f32 %v1053_v58  ;;  %1103 = vadd.xlane.f32.xlu1 %v4039_v2  ;;  %v960_v35 = vpop.xlane.xlu1 %959  ;;  %v1003_v41 = vsub.f32 %v3834_v61, %v970_v49 }
 0x209   :  { %2702 = vpow2.f32 %v1059_v51  ;;  %v998_v23 = vsub.f32 %v3841_v42, %v960_v35 }
 0x20a   :  { %v4048_v20 = vpop.eup %2692  ;;  %2704 = vpow2.f32 %v346_v21  ;;  %v1065_v34 = vmul.f32 1.442695, %v1003_v41 }
 0x20b   :  { %v4050_v54 = vpop.eup %2694  ;;  %v1055_v8 = vmul.f32 1.442695, %v998_v23  ;;  %v966_v53 = vpop.xlane.xlu0 %965  ;;  %1109 = vadd.xlane.f32.xlu0 %v4048_v20 }
 0x20c   :  { %v1001_v56 = vsub.f32 %v3848_v44, %v966_v53  ;;  %1115 = vadd.xlane.f32.xlu1 %v4050_v54  ;;  %v972_v19 = vpop.xlane.xlu1 %971 }
 0x20d   :  { %2706 = vpow2.f32 %v1055_v8  ;;  %v1004_v44 = vsub.f32 %v3857_v18, %v972_v19 }
 0x20e   :  { %v4057_v42 = vpop.eup %2696  ;;  %v1061_v13 = vmul.f32 1.442695, %v1001_v56 }
 0x20f   :  { %v4059_v48 = vpop.eup %2698  ;;  %1121 = vadd.xlane.f32.xlu0 %v4057_v42  ;;  %v1067_v51 = vmul.f32 1.442695, %v1004_v44  ;;  %v4092_v8 = vpop.xlane.xlu0 %390 }
 0x210   :  { %2708 = vpow2.f32 %v1061_v13  ;;  %1111 = vadd.xlane.f32.xlu1 %v4059_v48  ;;  %v968_v61 = vpop.xlane.xlu1 %967  ;;  %4997 = vst [vmem:[#allocation96_spill] sm:$0xff] %v4092_v8 }
 0x211   :  { %2710 = vpow2.f32 %v348_v43  ;;  %v1002_v14 = vsub.f32 %v3869_v9, %v968_v61 }
 0x212   :  { %v4065_v27 = vpop.eup %2700  ;;  %2712 = vpow2.f32 %v1065_v34 }
 0x213   :  { %v4067_v31 = vpop.eup %2702  ;;  %v1063_v58 = vmul.f32 1.442695, %v1002_v14  ;;  %1117 = vadd.xlane.f32.xlu0 %v4065_v27  ;;  %v4096_v41 = vpop.xlane.xlu0 %394 }
 0x214   :  { %1123 = vadd.xlane.f32.xlu1 %v4067_v31  ;;  %v4071_v49 = vpop.eup %2704  ;;  %v4094_v53 = vpop.xlane.xlu1 %392  ;;  %4999 = vst [vmem:[#allocation98_spill] sm:$0xff] %v4096_v41 }
 0x215   :  { %2714 = vpow2.f32 %v1063_v58  ;;  %4993 = vst [vmem:[#allocation92_spill] sm:$0xff] %v4071_v49  ;;  %4998 = vst [vmem:[#allocation97_spill] sm:$0xff] %v4094_v53 }
 0x216   :  { %2716 = vpow2.f32 %v1067_v51 }
 0x217   :  { %v4073_v21 = vpop.eup %2706  ;;  %410 = vadd.xlane.f32.xlu0 %v4071_v49  ;;  %v4100_v19 = vpop.xlane.xlu0 %398  ;;  %2718 = vrcp.f32 %v3910_v47 }
 0x218   :  { %1119 = vadd.xlane.f32.xlu1 %v4073_v21  ;;  %v4098_v56 = vpop.xlane.xlu1 %396  ;;  %5001 = vst [vmem:[#allocation100_spill] sm:$0xff] %v4100_v19  ;;  %2720 = vrcp.f32 %v3915_v37 }
 0x219   :  { %5000 = vst [vmem:[#allocation99_spill] sm:$0xff] %v4098_v56 }
 0x21a   :  { %v4077_v18 = vpop.eup %2708 }
 0x21b   :  { %v4079_v9 = vpop.eup %2710  ;;  %1125 = vadd.xlane.f32.xlu0 %v4077_v18  ;;  %v4104_v13 = vpop.xlane.xlu0 %402 }
 0x21c   :  { %4994 = vst [vmem:[#allocation93_spill] sm:$0xff] %v4079_v9  ;;  %412 = vadd.xlane.f32.xlu1 %v4079_v9  ;;  %v4083_v35 = vpop.eup %2712  ;;  %v4102_v43 = vpop.xlane.xlu1 %400  ;;  %5003 = vst [vmem:[#allocation102_spill] sm:$0xff] %v4104_v13 }
 0x21d   :  { %4995 = vst [vmem:[#allocation94_spill] sm:$0xff] %v4083_v35  ;;  %5002 = vst [vmem:[#allocation101_spill] sm:$0xff] %v4102_v43 }
 0x21f   :  { %v4085_v15 = vpop.eup %2714  ;;  %1129 = vadd.xlane.f32.xlu0 %v4083_v35  ;;  %v4108_v61 = vpop.xlane.xlu0 %406 }
 0x220   :  { %1127 = vadd.xlane.f32.xlu1 %v4085_v15  ;;  %v4089_v23 = vpop.eup %2716  ;;  %v4106_v34 = vpop.xlane.xlu1 %404  ;;  %5005 = vst [vmem:[#allocation104_spill] sm:$0xff] %v4108_v61 }
 0x221   :  { %4996 = vst [vmem:[#allocation95_spill] sm:$0xff] %v4089_v23  ;;  %5004 = vst [vmem:[#allocation103_spill] sm:$0xff] %v4106_v34  ;;  %v2719_v47 = vpop.eup %2718 }
 0x222   :  { %v2721_v9 = vpop.eup %2720 }
 0x224   :  { %1131 = vadd.xlane.f32.xlu1 %v4089_v23  ;;  %v4110_v14 = vpop.xlane.xlu1 %408 }
 0x225   :  { %5006 = vst [vmem:[#allocation105_spill] sm:$0xff] %v4110_v14 }
 0x26c   :  { %v1074_v44 = vpop.xlane.xlu0 %1073 }
 0x270   :  { %v1070_v58 = vpop.xlane.xlu0 %1069 }
 0x271   :  { %2722 = vrcp.f32 %v1070_v58  ;;  %v1076_v51 = vpop.xlane.xlu1 %1075 }
 0x272   :  { %2724 = vrcp.f32 %v1076_v51 }
 0x273   :  { %2726 = vrcp.f32 %v1074_v44 }
 0x274   :  { %2728 = vrcp.f32 %v3908_v60  ;;  %v1082_v26 = vpop.xlane.xlu0 %1081 }
 0x275   :  { %2730 = vrcp.f32 %v3913_v62  ;;  %v1072_v59 = vpop.xlane.xlu1 %1071 }
 0x276   :  { %2732 = vrcp.f32 %v1072_v59 }
 0x277   :  { %2734 = vrcp.f32 %v3919_v39 }
 0x278   :  { %2736 = vrcp.f32 %v3923_v24  ;;  %v1078_v23 = vpop.xlane.xlu0 %1077 }
 0x279   :  { %2738 = vrcp.f32 %v1078_v23  ;;  %v1084_v37 = vpop.xlane.xlu1 %1083 }
 0x27a   :  { %2740 = vrcp.f32 %v1084_v37 }
 0x27b   :  { %v2723_v58 = vpop.eup %2722  ;;  %2742 = vrcp.f32 %v1082_v26  ;;  %v4124_v26 = vmul.f32 %v2721_v9, %v3607_v22 }
 0x27c   :  { %v2725_v44 = vpop.eup %2724  ;;  %2744 = vrcp.f32 %v3917_v3  ;;  %v1090_v51 = vpop.xlane.xlu0 %1089  ;;  %v1165_v23 = vmul.f32 %v2723_v58, %v3961_v12 }
 0x27d   :  { %v2727_v60 = vpop.eup %2726  ;;  %2746 = vrcp.f32 %v3921_v25  ;;  %v1080_v59 = vpop.xlane.xlu1 %1079  ;;  %v1168_v24 = vmul.f32 %v2725_v44, %v3963_v50 }
 0x27e   :  { %v2729_v62 = vpop.eup %2728  ;;  %2748 = vrcp.f32 %v1080_v59  ;;  %v1167_v49 = vmul.f32 %v2727_v60, %v3956_v4  ;;  %v4129_v59 = vmul.f32 %v2719_v47, %v3588_v63  ;;  %v5007_v4 = vld [vmem:[#allocation80_spill] sm:$0xff] }
 0x27f   :  { %v2731_v39 = vpop.eup %2730  ;;  %2750 = vrcp.f32 %v3927_v11  ;;  %v4132_v50 = vmul.f32 %v2729_v62, %v3599_v16  ;;  %v1200_v9 = vsub.f32 %v1168_v24, %v4124_v26 }
 0x280   :  { %v2733_v37 = vpop.eup %2732  ;;  %2752 = vrcp.f32 %v3931_v6  ;;  %v1086_v3 = vpop.xlane.xlu0 %1085  ;;  %v4136_v22 = vmul.f32 %v2731_v39, %v3612_v32  ;;  %v5009_v6 = vld [vmem:[#allocation31_spill] sm:$0xff] }
 0x281   :  { %v2735_v25 = vpop.eup %2734  ;;  %2754 = vrcp.f32 %v1086_v3  ;;  %v1092_v35 = vpop.xlane.xlu1 %1091  ;;  %v1166_v12 = vmul.f32 %v2733_v37, %v3971_v55  ;;  %v1197_v3 = vsub.f32 %v1165_v23, %v4129_v59  ;;  %v5008_v23 = vld [vmem:[#allocation83_spill] sm:$0xff] }
 0x282   :  { %v2737_v58 = vpop.eup %2736  ;;  %2756 = vrcp.f32 %v1092_v35  ;;  %v1199_v62 = vsub.f32 %v1167_v49, %v4136_v22  ;;  %v5011_v49 = vld [vmem:[#allocation85_spill] sm:$0xff] }
 0x283   :  { %v2739_v44 = vpop.eup %2738  ;;  %2758 = vrcp.f32 %v1090_v51  ;;  %v1198_v60 = vsub.f32 %v1166_v12, %v4132_v50  ;;  %v4148_v11 = vmul.f32 %v2737_v58, %v5009_v6  ;;  %v5014_v58 = vld [vmem:[#allocation33_spill] sm:$0xff] }
 0x284   :  { %v2741_v63 = vpop.eup %2740  ;;  %2760 = vrcp.f32 %v3925_v36  ;;  %v1098_v16 = vpop.xlane.xlu0 %1097  ;;  %v1230_v24 = vpack.c.bf16 %v1200_v9, %v1199_v62  ;;  %v1169_v37 = vmul.f32 %v2739_v44, %v3977_v52  ;;  %v5012_v9 = vld [vmem:[#allocation27_spill] sm:$0xff]  ;;  %v3103_v44 = vld [vmem:[#allocation8] sm:$0xff]  }
 0x285   :  { %v2743_v47 = vpop.eup %2742  ;;  %2762 = vrcp.f32 %v5007_v4  ;;  %v1088_v32 = vpop.xlane.xlu1 %1087  ;;  %v1229_v39 = vpack.c.bf16 %v1198_v60, %v1197_v3  ;;  %v1172_v35 = vmul.f32 %v2741_v63, %v3979_v40  ;;  %5010 = vst [vmem:[#allocation31_spill] sm:$0xff] %v4148_v11  ;;  %v4153_v62 = vmul.f32 %v2735_v25, %v5012_v9  ;;  %v5013_v40 = vld [vmem:[#allocation29_spill] sm:$0xff]  ;;  %v5015_v9 = vld [vmem:[#allocation82_spill] sm:$0xff] }
 0x286   :  { %v2745_v55 = vpop.eup %2744  ;;  %2764 = vrcp.f32 %v1088_v32  ;;  %v1171_v3 = vmul.f32 %v2743_v47, %v3969_v29  ;;  %v3104_v47 = vld [vmem:[#allocation8 + $0x8] sm:$0xff]  }
 0x287   :  { %v2747_v51 = vpop.eup %2746  ;;  %2766 = vrcp.f32 %v5008_v23  ;;  %2471 = vmatprep.mubr.bf16.mxu1 %v1229_v39  ;;  %v4156_v63 = vmul.f32 %v2745_v55, %v5013_v40  ;;  %v1204_v29 = vsub.f32 %v1172_v35, %v4148_v11  ;;  %v5018_v11 = vld [vmem:[#allocation39_spill] sm:$0xff] }
 0x288   :  { %v2749_v12 = vpop.eup %2748  ;;  %2768 = vrcp.f32 %v5011_v49  ;;  %v1094_v4 = vpop.xlane.xlu0 %1093  ;;  %2472 = vmatmul.mubr.bf16.vlgmr.msra.gmra.mrb[0].mxu1 %v1230_v24  ;;  %v4160_v39 = vmul.f32 %v2747_v51, %v5014_v58  ;;  %v5016_v51 = vld [vmem:[#allocation84_spill] sm:$0xff]  ;;  %v5017_v49 = vld [vmem:[#allocation87_spill] sm:$0xff] }
 0x289   :  { %v2751_v60 = vpop.eup %2750  ;;  %2770 = vrcp.f32 %v1094_v4  ;;  %v1100_v32 = vpop.xlane.xlu1 %1099  ;;  %v1170_v52 = vmul.f32 %v2749_v12, %v3987_v45  ;;  %2559 = vmatpush3.bf16.msra.mxu1 %v3103_v44  ;;  %v1201_v55 = vsub.f32 %v1169_v37, %v4156_v63  ;;  %v3105_v37 = vld [vmem:[#allocation8 + $0x10] sm:$0xff]  }
 0x28a   :  { %v2753_v6 = vpop.eup %2752  ;;  %2772 = vrcp.f32 %v1100_v32  ;;  %2552 = vmatprep.subr.bf16.mxu1 %v3104_v47  ;;  %v1203_v12 = vsub.f32 %v1171_v3, %v4160_v39 }
 0x28b   :  { %v2755_v25 = vpop.eup %2754  ;;  %2774 = vrcp.f32 %v1098_v16  ;;  %v1202_v4 = vsub.f32 %v1170_v52, %v4153_v62 }
 0x28c   :  { %v2757_v24 = vpop.eup %2756  ;;  %2776 = vrcp.f32 %v5015_v9  ;;  %v1106_v45 = vpop.xlane.xlu0 %1105  ;;  %v1232_v58 = vpack.c.bf16 %v1204_v29, %v1203_v12  ;;  %v1173_v23 = vmul.f32 %v2755_v25, %v3993_v5  ;;  %v4172_v9 = vmul.f32 %v2753_v6, %v5018_v11  ;;  %v5022_v6 = vld [vmem:[#allocation41_spill] sm:$0xff] }
 0x28d   :  { %v2759_v40 = vpop.eup %2758  ;;  %2778 = vrcp.f32 %v5016_v51  ;;  %v1096_v32 = vpop.xlane.xlu1 %1095  ;;  %v1231_v44 = vpack.c.bf16 %v1202_v4, %v1201_v55  ;;  %2560 = vmatpush3.bf16.msra.mxu1 %v3104_v47  ;;  %v1176_v16 = vmul.f32 %v2757_v24, %v3995_v17  ;;  %v5019_v51 = vld [vmem:[#allocation89_spill] sm:$0xff]  ;;  %v5020_v17 = vld [vmem:[#allocation35_spill] sm:$0xff] }
 0x28e   :  { %v2761_v35 = vpop.eup %2760  ;;  %2780 = vrcp.f32 %v1096_v32  ;;  %2553 = vmatprep.subr.bf16.mxu1 %v3105_v37  ;;  %v1175_v29 = vmul.f32 %v2759_v40, %v3985_v1  ;;  %v4177_v4 = vmul.f32 %v2751_v60, %v5020_v17  ;;  %v5021_v24 = vld [vmem:[#allocation37_spill] sm:$0xff] }
 0x28f   :  { %v2763_v52 = vpop.eup %2762  ;;  %2782 = vrcp.f32 %v5017_v49  ;;  %2475 = vmatprep.mubr.bf16.mxu1 %v1231_v44  ;;  %v4180_v12 = vmul.f32 %v2761_v35, %v5021_v24  ;;  %v1208_v44 = vsub.f32 %v1176_v16, %v4172_v9  ;;  %v3106_v1 = vld [vmem:[#allocation8 + $0x18] sm:$0xff]  }
 0x290   :  { %v2765_v3 = vpop.eup %2764  ;;  %2784 = vrcp.f32 %v5019_v51  ;;  %v1102_v47 = vpop.xlane.xlu0 %1101  ;;  %2476 = vmatmul.mubr.bf16.gmra.mrb[4].mxu1 %v1232_v58  ;;  %v4184_v25 = vmul.f32 %v2763_v52, %v5022_v6  ;;  %v5024_v52 = vld [vmem:[#allocation88_spill] sm:$0xff]  ;;  %v5025_v51 = vld [vmem:[#allocation45_spill] sm:$0xff] }
 0x291   :  { %v2767_v55 = vpop.eup %2766  ;;  %2786 = vrcp.f32 %v1102_v47  ;;  %v1108_v32 = vpop.xlane.xlu1 %1107  ;;  %v1174_v5 = vmul.f32 %v2765_v3, %v4003_v33  ;;  %2561 = vmatpush3.bf16.msra.mxu1 %v3105_v37  ;;  %v1205_v60 = vsub.f32 %v1173_v23, %v4180_v12  ;;  %v5023_v47 = vld [vmem:[#allocation86_spill] sm:$0xff] }
 0x292   :  { %v2769_v11 = vpop.eup %2768  ;;  %2788 = vrcp.f32 %v1108_v32  ;;  %2554 = vmatprep.subr.bf16.mxu1 %v3106_v1  ;;  %v1207_v37 = vsub.f32 %v1175_v29, %v4184_v25  ;;  %v3107_v23 = vld [vmem:[#allocation8 + $0x20] sm:$0xff]  }
 0x293   :  { %v2771_v40 = vpop.eup %2770  ;;  %2790 = vrcp.f32 %v1106_v45  ;;  %v1206_v35 = vsub.f32 %v1174_v5, %v4177_v4  ;;  %v4196_v49 = vmul.f32 %v2769_v11, %v5025_v51  ;;  %v5030_v11 = vld [vmem:[#allocation46_spill] sm:$0xff] }
 0x294   :  { %v2773_v58 = vpop.eup %2772  ;;  %2792 = vrcp.f32 %v5023_v47  ;;  %v1114_v33 = vpop.xlane.xlu0 %1113  ;;  %v1234_v32 = vpack.c.bf16 %v1208_v44, %v1207_v37  ;;  %v1177_v6 = vmul.f32 %v2771_v40, %v4009_v10 }
 0x295   :  { %v2775_v3 = vpop.eup %2774  ;;  %2794 = vrcp.f32 %v5024_v52  ;;  %v1104_v17 = vpop.xlane.xlu1 %1103  ;;  %v1233_v24 = vpack.c.bf16 %v1206_v35, %v1205_v60  ;;  %2562 = vmatpush3.bf16.msra.mxu1 %v3106_v1  ;;  %v1180_v45 = vmul.f32 %v2773_v58, %v4011_v7  ;;  %5026 = vst [vmem:[#allocation27_spill] sm:$0xff] %v4196_v49  ;;  %v5027_v7 = vld [vmem:[#allocation42_spill] sm:$0xff]  ;;  %v5029_v58 = vld [vmem:[#allocation44_spill] sm:$0xff] }
 0x296   :  { %v2777_v16 = vpop.eup %2776  ;;  %2796 = vrcp.f32 %v1104_v17  ;;  %2555 = vmatprep.subr.bf16.mxu1 %v3107_v23  ;;  %v1179_v44 = vmul.f32 %v2775_v3, %v4001_v38  ;;  %v4201_v35 = vmul.f32 %v2767_v55, %v5027_v7  ;;  %v3108_v38 = vld [vmem:[#allocation8 + $0x28] sm:$0xff]  }
 0x297   :  { %v2779_v5 = vpop.eup %2778  ;;  %2798 = vrcp.f32 %v4092_v8  ;;  %2479 = vmatprep.mubr.bf16.mxu1 %v1233_v24  ;;  %v4204_v37 = vmul.f32 %v2777_v16, %v5029_v58  ;;  %v1212_v24 = vsub.f32 %v1180_v45, %v4196_v49 }
 0x298   :  { %v2781_v29 = vpop.eup %2780  ;;  %2800 = vrcp.f32 %v4098_v56  ;;  %v1110_v1 = vpop.xlane.xlu0 %1109  ;;  %2480 = vmatmul.mubr.bf16.gmra.mrb[8].mxu1 %v1234_v32  ;;  %5028 = vst [vmem:[#allocation29_spill] sm:$0xff] %v4201_v35  ;;  %v4208_v40 = vmul.f32 %v2779_v5, %v5030_v11  ;;  %v5032_v11 = vld [vmem:[#allocation49_spill] sm:$0xff] }
 0x299   :  { %v2783_v60 = vpop.eup %2782  ;;  %2802 = vrcp.f32 %v1110_v1  ;;  %v1116_v17 = vpop.xlane.xlu1 %1115  ;;  %v1178_v10 = vmul.f32 %v2781_v29, %v4019_v30  ;;  %2563 = vmatpush3.bf16.msra.mxu1 %v3107_v23  ;;  %v1209_v55 = vsub.f32 %v1177_v6, %v4204_v37  ;;  %v3109_v6 = vld [vmem:[#allocation8 + $0x30] sm:$0xff]  }
 0x29a   :  { %v2785_v51 = vpop.eup %2784  ;;  %5031 = vst [vmem:[#allocation33_spill] sm:$0xff] %v4208_v40  ;;  %2804 = vrcp.f32 %v1116_v17  ;;  %2556 = vmatprep.subr.bf16.mxu1 %v3108_v38  ;;  %v1211_v23 = vsub.f32 %v1179_v44, %v4208_v40 }
 0x29b   :  { %v2787_v3 = vpop.eup %2786  ;;  %2806 = vrcp.f32 %v1114_v33  ;;  %v1210_v16 = vsub.f32 %v1178_v10, %v4201_v35  ;;  %v4219_v44 = vmul.f32 %v2785_v51, %v5032_v11  ;;  %v3144_v35 = vld [vmem:[#allocation2 + $0x8] sm:$0xff] }
 0x29c   :  { %v2789_v32 = vpop.eup %2788  ;;  %2808 = vrcp.f32 %v4094_v53  ;;  %v1122_v30 = vpop.xlane.xlu0 %1121  ;;  %v1236_v7 = vpack.c.bf16 %v1212_v24, %v1211_v23  ;;  %v1181_v17 = vmul.f32 %v2787_v3, %v4025_v0  ;;  %v5034_v24 = vld [vmem:[#allocation47_spill] sm:$0xff]  ;;  %v5038_v23 = vld [vmem:[#allocation50_spill] sm:$0xff]  ;;  %v3142_v53 = vld [vmem:[#allocation5 + $0xf8] sm:$0xff] }
 0x29d   :  { %v2791_v29 = vpop.eup %2790  ;;  %2810 = vrcp.f32 %v4096_v41  ;;  %v1112_v5 = vpop.xlane.xlu1 %1111  ;;  %v1235_v1 = vpack.c.bf16 %v1210_v16, %v1209_v55  ;;  %2564 = vmatpush3.bf16.msra.mxu1 %v3108_v38  ;;  %v1184_v33 = vmul.f32 %v2789_v32, %v4027_v46  ;;  %5033 = vst [vmem:[#allocation39_spill] sm:$0xff] %v4219_v44  ;;  %v4224_v16 = vmul.f32 %v2783_v60, %v5034_v24  ;;  %v5036_v46 = vld [vmem:[#allocation48_spill] sm:$0xff] }
 0x29e   :  { %v2793_v45 = vpop.eup %2792  ;;  %2812 = vrcp.f32 %v1112_v5  ;;  %2557 = vmatprep.subr.bf16.mxu1 %v3109_v6  ;;  %v1183_v38 = vmul.f32 %v2791_v29, %v4017_v57  ;;  %v3110_v29 = vld [vmem:[#allocation8 + $0x38] sm:$0xff]  }
 0x29f   :  { %v2795_v58 = vpop.eup %2794  ;;  %2483 = vmatprep.mubr.bf16.mxu1 %v1235_v1  ;;  %2814 = vrcp.f32 %v4100_v19  ;;  %5035 = vst [vmem:[#allocation35_spill] sm:$0xff] %v4224_v16  ;;  %v4227_v32 = vmul.f32 %v2793_v45, %v5036_v46  ;;  %v1216_v57 = vsub.f32 %v1184_v33, %v4219_v44  ;;  %v3137_v19 = vld [vmem:[#allocation5 + $0xc8] sm:$0xff] }
 0x2a0   :  { %v2797_v10 = vpop.eup %2796  ;;  %v1118_v56 = vpop.xlane.xlu0 %1117  ;;  %2484 = vmatmul.mubr.bf16.gmra.mrb[12].mxu1 %v1236_v7  ;;  %2816 = vrcp.f32 %v4106_v34  ;;  %v4232_v5 = vmul.f32 %v2795_v58, %v5038_v23 }
 0x2a1   :  { %v2799_v55 = vpop.eup %2798  ;;  %5037 = vst [vmem:[#allocation37_spill] sm:$0xff] %v4227_v32  ;;  %v1124_v0 = vpop.xlane.xlu1 %1123  ;;  %v1182_v3 = vmul.f32 %v2797_v10, %v4039_v2  ;;  %2565 = vmatpush3.bf16.msra.mxu1 %v3109_v6  ;;  %v1213_v1 = vsub.f32 %v1181_v17, %v4227_v32 }
 0x2a2   :  { %v2801_v51 = vpop.eup %2800  ;;  %5039 = vst [vmem:[#allocation41_spill] sm:$0xff] %v4232_v5  ;;  %2818 = vrcp.f32 %v1124_v0  ;;  %2558 = vmatprep.subr.bf16.mxu1 %v3110_v29  ;;  %v1215_v2 = vsub.f32 %v1183_v38, %v4232_v5  ;;  %v5041_v0 = vld [vmem:[#allocation65_spill] sm:$0xff] }
 0x2a3   :  { %v2803_v60 = vpop.eup %2802  ;;  %2820 = vrcp.f32 %v1118_v56  ;;  %v1214_v45 = vsub.f32 %v1182_v3, %v4224_v16  ;;  %v4245_v38 = vmul.f32 %v2801_v51, %v5041_v0 }
 0x2a4   :  { %v2805_v7 = vpop.eup %2804  ;;  %2822 = vrcp.f32 %v1122_v30  ;;  %v4237_v11 = vpop.xlane.xlu0 %410  ;;  %v1238_v56 = vpack.c.bf16 %v1216_v57, %v1215_v2  ;;  %v1185_v30 = vmul.f32 %v2803_v60, %v4048_v20  ;;  %v5048_v20 = vld [vmem:[#allocation62_spill] sm:$0xff] }
 0x2a5   :  { %5040 = vst [vmem:[#allocation86_spill] sm:$0xff] %v4237_v11  ;;  %v2807_v6 = vpop.eup %2806  ;;  %2824 = vrcp.f32 %v4102_v43  ;;  %v1120_v58 = vpop.xlane.xlu1 %1119  ;;  %v1237_v10 = vpack.c.bf16 %v1214_v45, %v1213_v1  ;;  %2566 = vmatpush3.bf16.msra.mxu1 %v3110_v29  ;;  %v1188_v17 = vmul.f32 %v2805_v7, %v4050_v54  ;;  %5042 = vst [vmem:[#allocation45_spill] sm:$0xff] %v4245_v38  ;;  %v5043_v29 = vld [vmem:[#allocation60_spill] sm:$0xff]  ;;  %v5045_v45 = vld [vmem:[#allocation63_spill] sm:$0xff] }
 0x2a6   :  { %v2809_v33 = vpop.eup %2808  ;;  %2826 = vrcp.f32 %v4104_v13  ;;  %v1187_v23 = vmul.f32 %v2807_v6, %v4037_v28  ;;  %v4249_v1 = vmul.f32 %v2799_v55, %v5043_v29 }
 0x2a7   :  { %v2811_v24 = vpop.eup %2810  ;;  %2828 = vrcp.f32 %v1120_v58  ;;  %2487 = vmatprep.mubr.bf16.mxu1 %v1237_v10  ;;  %v4252_v57 = vmul.f32 %v2809_v33, %v5045_v45  ;;  %v1220_v51 = vsub.f32 %v1188_v17, %v4245_v38  ;;  %v5050_v45 = vld [vmem:[#allocation69_spill] sm:$0xff] }
 0x2a8   :  { %v2813_v46 = vpop.eup %2812  ;;  %v1126_v3 = vpop.xlane.xlu0 %1125  ;;  %2488 = vmatmul.mubr.bf16.gmra.mrb[16].mxu1 %v1238_v56  ;;  %5044 = vst [vmem:[#allocation42_spill] sm:$0xff] %v4249_v1  ;;  %v4258_v60 = vmul.f32 %v2811_v24, %v5048_v20  ;;  %v1217_v28 = vsub.f32 %v1185_v30, %v4249_v1 }
 0x2a9   :  { %5046 = vst [vmem:[#allocation44_spill] sm:$0xff] %v4252_v57  ;;  %v4254_v54 = vpop.xlane.xlu1 %412  ;;  %v1186_v7 = vmul.f32 %v2813_v46, %v4059_v48  ;;  %v2815_v2 = vpop.eup %2814  ;;  %2830 = vrcp.f32 %v1126_v3 }
 0x2aa   :  { %5047 = vst [vmem:[#allocation46_spill] sm:$0xff] %v4254_v54  ;;  %5049 = vst [vmem:[#allocation49_spill] sm:$0xff] %v4258_v60  ;;  %v2817_v58 = vpop.eup %2816  ;;  %2832 = vrcp.f32 %v4108_v61  ;;  %v1219_v48 = vsub.f32 %v1187_v23, %v4258_v60  ;;  %v3129_v61 = vld [vmem:[#allocation5 + $0x88] sm:$0xff] }
 0x2ab   :  { %v1218_v55 = vsub.f32 %v1186_v7, %v4252_v57  ;;  %2834 = vrcp.f32 %v4110_v14  ;;  %v4271_v7 = vmul.f32 %v2817_v58, %v5050_v45  ;;  %v3133_v57 = vld [vmem:[#allocation5 + $0xa8] sm:$0xff] }
 0x2ac   :  { %v2819_v6 = vpop.eup %2818  ;;  %v1130_v10 = vpop.xlane.xlu0 %1129  ;;  %v1240_v17 = vpack.c.bf16 %v1220_v51, %v1219_v48  ;;  %v5052_v51 = vld [vmem:[#allocation64_spill] sm:$0xff] }
 0x2ad   :  { %v2821_v33 = vpop.eup %2820  ;;  %2836 = vrcp.f32 %v1130_v10  ;;  %v1128_v56 = vpop.xlane.xlu1 %1127  ;;  %v1239_v24 = vpack.c.bf16 %v1218_v55, %v1217_v28  ;;  %v1192_v30 = vmul.f32 %v2819_v6, %v4067_v31  ;;  %5051 = vst [vmem:[#allocation47_spill] sm:$0xff] %v4271_v7  ;;  %v4275_v55 = vmul.f32 %v2815_v2, %v5052_v51  ;;  %v5054_v10 = vld [vmem:[#allocation67_spill] sm:$0xff]  ;;  %v5056_v6 = vld [vmem:[#allocation66_spill] sm:$0xff] }
 0x2ae   :  { %v2823_v46 = vpop.eup %2822  ;;  %2838 = vrcp.f32 %v1128_v56  ;;  %v1189_v29 = vmul.f32 %v2821_v33, %v4065_v27 }
 0x2af   :  { %v2825_v0 = vpop.eup %2824  ;;  %2840 = vrcp.f32 %v4237_v11  ;;  %2491 = vmatprep.mubr.bf16.mxu1 %v1239_v24  ;;  %v1191_v28 = vmul.f32 %v2823_v46, %v4057_v42  ;;  %5053 = vst [vmem:[#allocation48_spill] sm:$0xff] %v4275_v55  ;;  %v1224_v27 = vsub.f32 %v1192_v30, %v4271_v7  ;;  %v5060_v30 = vld [vmem:[#allocation70_spill] sm:$0xff]  ;;  %v3121_v7 = vld [vmem:[#allocation5 + $0x48] sm:$0xff] }
 0x2b0   :  { %v2827_v3 = vpop.eup %2826  ;;  %2842 = vrcp.f32 %v4254_v54  ;;  %2492 = vmatmul.mubr.bf16.gmra.mrb[20].mxu1 %v1240_v17  ;;  %v4278_v48 = vmul.f32 %v2825_v0, %v5054_v10  ;;  %v1221_v58 = vsub.f32 %v1189_v29, %v4275_v55  ;;  %v3125_v11 = vld [vmem:[#allocation5 + $0x68] sm:$0xff] }
 0x2b1   :  { %v2829_v23 = vpop.eup %2828  ;;  %v1132_v20 = vpop.xlane.xlu1 %1131  ;;  %v4282_v56 = vmul.f32 %v2827_v3, %v5056_v6 }
 0x2b2   :  { %5055 = vst [vmem:[#allocation50_spill] sm:$0xff] %v4278_v48  ;;  %2844 = vrcp.f32 %v1132_v20  ;;  %v1190_v31 = vmul.f32 %v2829_v23, %v4073_v21  ;;  %v5058_v23 = vld [vmem:[#allocation68_spill] sm:$0xff] }
 0x2b3   :  { %5057 = vst [vmem:[#allocation65_spill] sm:$0xff] %v4282_v56  ;;  %v2831_v33 = vpop.eup %2830  ;;  %v1223_v2 = vsub.f32 %v1191_v28, %v4282_v56 }
 0x2b4   :  { %v1222_v24 = vsub.f32 %v1190_v31, %v4278_v48  ;;  %v2833_v42 = vpop.eup %2832  ;;  %v1193_v20 = vmul.f32 %v2831_v33, %v4077_v18 }
 0x2b5   :  { %v2835_v46 = vpop.eup %2834  ;;  %v1242_v45 = vpack.c.bf16 %v1224_v27, %v1223_v2  ;;  %v4290_v51 = vmul.f32 %v2833_v42, %v5058_v23  ;;  %v5062_v27 = vld [vmem:[#allocation94_spill] sm:$0xff]  ;;  %v5065_v42 = vld [vmem:[#allocation93_spill] sm:$0xff] }
 0x2b6   :  { %v1241_v17 = vpack.c.bf16 %v1222_v24, %v1221_v58  ;;  %v4293_v29 = vmul.f32 %v2835_v46, %v5060_v30  ;;  %v5063_v24 = vld [vmem:[#allocation92_spill] sm:$0xff] }
 0x2b7   :  { %v2837_v0 = vpop.eup %2836  ;;  %5059 = vst [vmem:[#allocation60_spill] sm:$0xff] %v4290_v51  ;;  %v1225_v28 = vsub.f32 %v1193_v20, %v4290_v51 }
 0x2b8   :  { %v2839_v21 = vpop.eup %2838  ;;  %2495 = vmatprep.mubr.bf16.mxu1 %v1241_v17  ;;  %5061 = vst [vmem:[#allocation63_spill] sm:$0xff] %v4293_v29  ;;  %v1195_v58 = vmul.f32 %v2837_v0, %v5062_v27 }
 0x2b9   :  { %v2841_v3 = vpop.eup %2840  ;;  %2496 = vmatmul.mubr.bf16.gmra.mrb[24].mxu1 %v1242_v45  ;;  %v1194_v10 = vmul.f32 %v2839_v21, %v4085_v15  ;;  %v5067_v45 = vld [vmem:[#allocation95_spill] sm:$0xff] }
 0x2ba   :  { %v2843_v31 = vpop.eup %2842  ;;  %v4300_v2 = vmul.f32 %v2841_v3, %v5063_v24  ;;  %v3111_v3 = vld [vmem:[#allocation5] sm:$0xff] }
 0x2bb   :  { %v1226_v6 = vsub.f32 %v1194_v10, %v4293_v29  ;;  %v4303_v17 = vmul.f32 %v2843_v31, %v5065_v42  ;;  %v3112_v42 = vld [vmem:[#allocation5 + $0x10] sm:$0xff] }
 0x2bc   :  { %v2845_v18 = vpop.eup %2844  ;;  %5064 = vst [vmem:[#allocation62_spill] sm:$0xff] %v4300_v2  ;;  %v1227_v15 = vsub.f32 %v1195_v58, %v4300_v2 }
 0x2bd   :  { %v1243_v33 = vpack.c.bf16 %v1226_v6, %v1225_v28  ;;  %5066 = vst [vmem:[#allocation69_spill] sm:$0xff] %v4303_v17  ;;  %v1196_v46 = vmul.f32 %v2845_v18, %v5067_v45 }
 0x2bf   :  { %2499 = vmatprep.mubr.bf16.mxu1 %v1243_v33  ;;  %v1228_v21 = vsub.f32 %v1196_v46, %v4303_v17  ;;  %v3113_v33 = vld [vmem:[#allocation5 + $0x8] sm:$0xff]  ;;  %v3114_v46 = vld [vmem:[#allocation5 + $0x18] sm:$0xff] }
 0x2c0   :  { %v3117_v17 = vld [vmem:[#allocation5 + $0x28] sm:$0xff] }
 0x2c1   :  { %v1244_v20 = vpack.c.bf16 %v1228_v21, %v1227_v15 }
 0x2c3   :  { %2500 = vmatmul.mubr.bf16.gmra.mrb[28].mxu1 %v1244_v20 }
 0x35b   :  { %v2473_v23 = vpop.f32.mrb[0].mxu1 }
 0x35c   :  { %v1408_v30 = vmul.f32 3.90625e-06, %v2473_v23  ;;  %v1279_v0 = vpop.f32.mrb[1].mxu1 }
 0x35d   :  { %v1406_v10 = vmul.f32 3.90625e-06, %v1279_v0  ;;  %v2474_v28 = vpop.f32.mrb[2].mxu1 }
 0x35e   :  { %v1282_v6 = vpop.f32.mrb[3].mxu1  ;;  %v1409_v31 = vmul.f32 3.90625e-06, %v2474_v28  ;;  %v4310_v18 = vadd.f32 %v3112_v42, %v1408_v30 }
 0x35f   :  { %v4308_v27 = vadd.f32 %v3111_v3, %v1406_v10  ;;  %v1407_v24 = vmul.f32 3.90625e-06, %v1282_v6  ;;  %v3115_v3 = vld [vmem:[#allocation5 + $0x20] sm:$0xff] }
 0x360   :  { %v4315_v15 = vadd.f32 %v3114_v46, %v1409_v31  ;;  %v1472_v0 = vand.u32 2147483647, %v4310_v18 }
 0x361   :  { %v4312_v58 = vadd.f32 %v3113_v33, %v1407_v24  ;;  %v1470_v45 = vand.u32 2147483647, %v4308_v27 }
 0x362   :  { %v1473_v31 = vand.u32 2147483647, %v4315_v15 }
 0x363   :  { %1502 = vmax.xlane.f32.xlu0 %v1470_v45  ;;  %v2477_v21 = vpop.f32.mrb[4].mxu1  ;;  %v1471_v20 = vand.u32 2147483647, %v4312_v58  ;;  %v3116_v45 = vld [vmem:[#allocation5 + $0x30] sm:$0xff] }
 0x364   :  { %v1295_v23 = vpop.f32.mrb[5].mxu1  ;;  %v1412_v10 = vmul.f32 3.90625e-06, %v2477_v21 }
 0x365   :  { %v1410_v28 = vmul.f32 3.90625e-06, %v1295_v23  ;;  %1504 = vmax.xlane.f32.xlu1 %v1471_v20  ;;  %v2478_v30 = vpop.f32.mrb[6].mxu1  ;;  %v3118_v20 = vld [vmem:[#allocation5 + $0x38] sm:$0xff] }
 0x366   :  { %v1298_v6 = vpop.f32.mrb[7].mxu1  ;;  %v1413_v42 = vmul.f32 3.90625e-06, %v2478_v30  ;;  %v4322_v46 = vadd.f32 %v3116_v45, %v1412_v10 }
 0x367   :  { %v4319_v24 = vadd.f32 %v3115_v3, %v1410_v28  ;;  %v1411_v33 = vmul.f32 3.90625e-06, %v1298_v6  ;;  %1506 = vmax.xlane.f32.xlu0 %v1472_v0 }
 0x368   :  { %v4327_v23 = vadd.f32 %v3118_v20, %v1413_v42  ;;  %v1476_v10 = vand.u32 2147483647, %v4322_v46 }
 0x369   :  { %v4324_v2 = vadd.f32 %v3117_v17, %v1411_v33  ;;  %1508 = vmax.xlane.f32.xlu1 %v1473_v31  ;;  %v1474_v21 = vand.u32 2147483647, %v4319_v24  ;;  %v3119_v17 = vld [vmem:[#allocation5 + $0x40] sm:$0xff] }
 0x36a   :  { %v1477_v42 = vand.u32 2147483647, %v4327_v23 }
 0x36b   :  { %1510 = vmax.xlane.f32.xlu0 %v1474_v21  ;;  %v2481_v28 = vpop.f32.mrb[8].mxu1  ;;  %v1475_v30 = vand.u32 2147483647, %v4324_v2  ;;  %v3120_v21 = vld [vmem:[#allocation5 + $0x50] sm:$0xff] }
 0x36c   :  { %v1416_v6 = vmul.f32 3.90625e-06, %v2481_v28  ;;  %v1311_v0 = vpop.f32.mrb[9].mxu1 }
 0x36d   :  { %v1414_v3 = vmul.f32 3.90625e-06, %v1311_v0  ;;  %1512 = vmax.xlane.f32.xlu1 %v1475_v30  ;;  %v2482_v29 = vpop.f32.mrb[10].mxu1  ;;  %v3122_v0 = vld [vmem:[#allocation5 + $0x58] sm:$0xff] }
 0x36e   :  { %v1314_v45 = vpop.f32.mrb[11].mxu1  ;;  %v1417_v31 = vmul.f32 3.90625e-06, %v2482_v29  ;;  %v4334_v20 = vadd.f32 %v3120_v21, %v1416_v6 }
 0x36f   :  { %v4331_v33 = vadd.f32 %v3119_v17, %v1414_v3  ;;  %v1415_v51 = vmul.f32 3.90625e-06, %v1314_v45  ;;  %1514 = vmax.xlane.f32.xlu0 %v1476_v10 }
 0x370   :  { %v4339_v56 = vadd.f32 %v3122_v0, %v1417_v31  ;;  %v1480_v10 = vand.u32 2147483647, %v4334_v20 }
 0x371   :  { %v4336_v28 = vadd.f32 %v3121_v7, %v1415_v51  ;;  %1516 = vmax.xlane.f32.xlu1 %v1477_v42  ;;  %v1478_v30 = vand.u32 2147483647, %v4331_v33  ;;  %v3123_v7 = vld [vmem:[#allocation5 + $0x60] sm:$0xff] }
 0x372   :  { %v1481_v31 = vand.u32 2147483647, %v4339_v56 }
 0x373   :  { %1518 = vmax.xlane.f32.xlu0 %v1478_v30  ;;  %v2485_v3 = vpop.f32.mrb[12].mxu1  ;;  %v1479_v29 = vand.u32 2147483647, %v4336_v28  ;;  %v3124_v30 = vld [vmem:[#allocation5 + $0x70] sm:$0xff] }
 0x374   :  { %v1327_v45 = vpop.f32.mrb[13].mxu1  ;;  %v1420_v17 = vmul.f32 3.90625e-06, %v2485_v3 }
 0x375   :  { %v1418_v48 = vmul.f32 3.90625e-06, %v1327_v45  ;;  %1520 = vmax.xlane.f32.xlu1 %v1479_v29  ;;  %v2486_v6 = vpop.f32.mrb[14].mxu1  ;;  %v3126_v29 = vld [vmem:[#allocation5 + $0x78] sm:$0xff] }
 0x376   :  { %v1330_v21 = vpop.f32.mrb[15].mxu1  ;;  %v1421_v42 = vmul.f32 3.90625e-06, %v2486_v6  ;;  %v4346_v0 = vadd.f32 %v3124_v30, %v1420_v17 }
 0x377   :  { %v4343_v51 = vadd.f32 %v3123_v7, %v1418_v48  ;;  %v1419_v54 = vmul.f32 3.90625e-06, %v1330_v21  ;;  %1522 = vmax.xlane.f32.xlu0 %v1480_v10 }
 0x378   :  { %v4351_v45 = vadd.f32 %v3126_v29, %v1421_v42  ;;  %v1484_v17 = vand.u32 2147483647, %v4346_v0 }
 0x379   :  { %v4348_v55 = vadd.f32 %v3125_v11, %v1419_v54  ;;  %1524 = vmax.xlane.f32.xlu1 %v1481_v31  ;;  %v1482_v3 = vand.u32 2147483647, %v4343_v51  ;;  %v3127_v11 = vld [vmem:[#allocation5 + $0x80] sm:$0xff] }
 0x37a   :  { %v1485_v42 = vand.u32 2147483647, %v4351_v45 }
 0x37b   :  { %1526 = vmax.xlane.f32.xlu0 %v1482_v3  ;;  %v2489_v48 = vpop.f32.mrb[16].mxu1  ;;  %v1483_v6 = vand.u32 2147483647, %v4348_v55  ;;  %v3128_v3 = vld [vmem:[#allocation5 + $0x90] sm:$0xff] }
 0x37c   :  { %v1424_v21 = vmul.f32 3.90625e-06, %v2489_v48  ;;  %v1343_v10 = vpop.f32.mrb[17].mxu1 }
 0x37d   :  { %v1422_v7 = vmul.f32 3.90625e-06, %v1343_v10  ;;  %1528 = vmax.xlane.f32.xlu1 %v1483_v6  ;;  %v2490_v14 = vpop.f32.mrb[18].mxu1  ;;  %v3130_v10 = vld [vmem:[#allocation5 + $0x98] sm:$0xff] }
 0x37e   :  { %v1346_v30 = vpop.f32.mrb[19].mxu1  ;;  %v1425_v31 = vmul.f32 3.90625e-06, %v2490_v14  ;;  %v4358_v29 = vadd.f32 %v3128_v3, %v1424_v21 }
 0x37f   :  { %v4355_v54 = vadd.f32 %v3127_v11, %v1422_v7  ;;  %v1423_v38 = vmul.f32 3.90625e-06, %v1346_v30  ;;  %1530 = vmax.xlane.f32.xlu0 %v1484_v17 }
 0x380   :  { %v4363_v60 = vadd.f32 %v3130_v10, %v1425_v31  ;;  %v1488_v17 = vand.u32 2147483647, %v4358_v29 }
 0x381   :  { %v4360_v48 = vadd.f32 %v3129_v61, %v1423_v38  ;;  %1532 = vmax.xlane.f32.xlu1 %v1485_v42  ;;  %v1486_v6 = vand.u32 2147483647, %v4355_v54  ;;  %v3131_v61 = vld [vmem:[#allocation5 + $0xa0] sm:$0xff] }
 0x382   :  { %v1489_v31 = vand.u32 2147483647, %v4363_v60 }
 0x383   :  { %1534 = vmax.xlane.f32.xlu0 %v1486_v6  ;;  %v2493_v7 = vpop.f32.mrb[20].mxu1  ;;  %v1487_v14 = vand.u32 2147483647, %v4360_v48  ;;  %v3132_v6 = vld [vmem:[#allocation5 + $0xb0] sm:$0xff] }
 0x384   :  { %v1359_v30 = vpop.f32.mrb[21].mxu1  ;;  %v1428_v11 = vmul.f32 3.90625e-06, %v2493_v7 }
 0x385   :  { %v1426_v34 = vmul.f32 3.90625e-06, %v1359_v30  ;;  %1536 = vmax.xlane.f32.xlu1 %v1487_v14  ;;  %v2494_v21 = vpop.f32.mrb[22].mxu1  ;;  %v3134_v14 = vld [vmem:[#allocation5 + $0xb8] sm:$0xff] }
 0x386   :  { %v1362_v3 = vpop.f32.mrb[23].mxu1  ;;  %v1429_v42 = vmul.f32 3.90625e-06, %v2494_v21  ;;  %v4370_v10 = vadd.f32 %v3132_v6, %v1428_v11 }
 0x387   :  { %v4367_v38 = vadd.f32 %v3131_v61, %v1426_v34  ;;  %v1427_v13 = vmul.f32 3.90625e-06, %v1362_v3  ;;  %1538 = vmax.xlane.f32.xlu0 %v1488_v17 }
 0x388   :  { %v4375_v30 = vadd.f32 %v3134_v14, %v1429_v42  ;;  %v1492_v17 = vand.u32 2147483647, %v4370_v10 }
 0x389   :  { %v4372_v1 = vadd.f32 %v3133_v57, %v1427_v13  ;;  %1540 = vmax.xlane.f32.xlu1 %v1489_v31  ;;  %v1490_v7 = vand.u32 2147483647, %v4367_v38  ;;  %v3135_v31 = vld [vmem:[#allocation5 + $0xc0] sm:$0xff] }
 0x38a   :  { %v1493_v57 = vand.u32 2147483647, %v4375_v30 }
 0x38b   :  { %1542 = vmax.xlane.f32.xlu0 %v1490_v7  ;;  %v1491_v34 = vand.u32 2147483647, %v4372_v1  ;;  %v3136_v7 = vld [vmem:[#allocation5 + $0xd0] sm:$0xff] }
 0x38c   :  { %v2497_v21 = vpop.f32.mrb[24].mxu1 }
 0x38d   :  { %v1375_v3 = vpop.f32.mrb[25].mxu1  ;;  %1544 = vmax.xlane.f32.xlu1 %v1491_v34  ;;  %v1432_v61 = vmul.f32 3.90625e-06, %v2497_v21 }
 0x38e   :  { %v1430_v11 = vmul.f32 3.90625e-06, %v1375_v3  ;;  %v2498_v6 = vpop.f32.mrb[26].mxu1  ;;  %v3138_v3 = vld [vmem:[#allocation5 + $0xd8] sm:$0xff] }
 0x38f   :  { %v1433_v44 = vmul.f32 3.90625e-06, %v2498_v6  ;;  %v1378_v13 = vpop.f32.mrb[27].mxu1  ;;  %1546 = vmax.xlane.f32.xlu0 %v1492_v17  ;;  %v4382_v14 = vadd.f32 %v3136_v7, %v1432_v61  ;;  %v3139_v7 = vld [vmem:[#allocation5 + $0xe0] sm:$0xff] }
 0x390   :  { %v4380_v43 = vadd.f32 %v3135_v31, %v1430_v11  ;;  %v1431_v42 = vmul.f32 3.90625e-06, %v1378_v13 }
 0x391   :  { %1548 = vmax.xlane.f32.xlu1 %v1493_v57  ;;  %v4387_v5 = vadd.f32 %v3138_v3, %v1433_v44  ;;  %v1496_v11 = vand.u32 2147483647, %v4382_v14  ;;  %v3140_v3 = vld [vmem:[#allocation5 + $0xf0] sm:$0xff] }
 0x392   :  { %v4384_v34 = vadd.f32 %v3137_v19, %v1431_v42  ;;  %v1494_v21 = vand.u32 2147483647, %v4380_v43 }
 0x393   :  { %v1497_v57 = vand.u32 2147483647, %v4387_v5 }
 0x394   :  { %1550 = vmax.xlane.f32.xlu0 %v1494_v21  ;;  %v1495_v17 = vand.u32 2147483647, %v4384_v34 }
 0x396   :  { %1552 = vmax.xlane.f32.xlu1 %v1495_v17  ;;  %v2501_v6 = vpop.f32.mrb[28].mxu1  ;;  %v3141_v17 = vld [vmem:[#allocation5 + $0xe8] sm:$0xff] }
 0x397   :  { %v1391_v13 = vpop.f32.mrb[29].mxu1  ;;  %v1436_v61 = vmul.f32 3.90625e-06, %v2501_v6 }
 0x398   :  { %1554 = vmax.xlane.f32.xlu0 %v1496_v11  ;;  %v1434_v31 = vmul.f32 3.90625e-06, %v1391_v13  ;;  %v2502_v19 = vpop.f32.mrb[30].mxu1 }
 0x399   :  { %v1394_v42 = vpop.f32.mrb[31].mxu1  ;;  %v1437_v44 = vmul.f32 3.90625e-06, %v2502_v19  ;;  %v4394_v41 = vadd.f32 %v3140_v3, %v1436_v61 }
 0x39a   :  { %v4392_v16 = vadd.f32 %v3139_v7, %v1434_v31  ;;  %1556 = vmax.xlane.f32.xlu1 %v1497_v57  ;;  %v1435_v21 = vmul.f32 3.90625e-06, %v1394_v42 }
 0x39b   :  { %v4399_v6 = vadd.f32 %v3142_v53, %v1437_v44  ;;  %v1500_v13 = vand.u32 2147483647, %v4394_v41 }
 0x39c   :  { %v4396_v32 = vadd.f32 %v3141_v17, %v1435_v21  ;;  %v1498_v49 = vand.u32 2147483647, %v4392_v16 }
 0x39d   :  { %v1501_v57 = vand.u32 2147483647, %v4399_v6 }
 0x39e   :  { %1558 = vmax.xlane.f32.xlu0 %v1498_v49  ;;  %v1499_v11 = vand.u32 2147483647, %v4396_v32 }
 0x3a0   :  { %1560 = vmax.xlane.f32.xlu1 %v1499_v11 }
 0x3a2   :  { %1562 = vmax.xlane.f32.xlu0 %v1500_v13 }
 0x3a4   :  { %1564 = vmax.xlane.f32.xlu1 %v1501_v57 }
 0x3f0   :  { %v1503_v61 = vpop.xlane.xlu0 %1502 }
 0x3f1   :  { %v1566_v31 = vadd.f32 1e-06, %v1503_v61 }
 0x3f2   :  { %v1505_v19 = vpop.xlane.xlu1 %1504 }
 0x3f3   :  { %2846 = vrcp.f32 %v1566_v31  ;;  %v1567_v42 = vadd.f32 1e-06, %v1505_v19 }
 0x3f4   :  { %v1507_v7 = vpop.xlane.xlu0 %1506 }
 0x3f5   :  { %2848 = vrcp.f32 %v1567_v42  ;;  %v1568_v21 = vadd.f32 1e-06, %v1507_v7 }
 0x3f6   :  { %v1509_v53 = vpop.xlane.xlu1 %1508 }
 0x3f7   :  { %2850 = vrcp.f32 %v1568_v21  ;;  %v1569_v49 = vadd.f32 1e-06, %v1509_v53 }
 0x3f8   :  { %v1511_v44 = vpop.xlane.xlu0 %1510 }
 0x3f9   :  { %2852 = vrcp.f32 %v1569_v49  ;;  %v1570_v3 = vadd.f32 1e-06, %v1511_v44 }
 0x3fa   :  { %v1513_v17 = vpop.xlane.xlu1 %1512 }
 0x3fb   :  { %2854 = vrcp.f32 %v1570_v3  ;;  %v1571_v11 = vadd.f32 1e-06, %v1513_v17  ;;  %v3143_v17 = vld [vmem:[#allocation2] sm:$0xff] }
 0x3fc   :  { %v1515_v13 = vpop.xlane.xlu0 %1514 }
 0x3fd   :  { %v2847_v8 = vpop.eup %2846  ;;  %2856 = vrcp.f32 %v1571_v11  ;;  %v1572_v57 = vadd.f32 1e-06, %v1515_v13 }
 0x3fe   :  { %v1517_v61 = vpop.xlane.xlu1 %1516  ;;  %v1630_v31 = vmul.f32 %v2847_v8, %v4308_v27 }
 0x3ff   :  { %v2849_v19 = vpop.eup %2848  ;;  %2858 = vrcp.f32 %v1572_v57  ;;  %v1573_v42 = vadd.f32 1e-06, %v1517_v61 }
 0x400   :  { %v1519_v7 = vpop.xlane.xlu0 %1518  ;;  %v1631_v21 = vmul.f32 %v2849_v19, %v4312_v58  ;;  %v1662_v40 = vadd.f32 %v3143_v17, %v1630_v31 }
 0x401   :  { %v2851_v53 = vpop.eup %2850  ;;  %2860 = vrcp.f32 %v1573_v42  ;;  %v1574_v49 = vadd.f32 1e-06, %v1519_v7  ;;  %v3145_v42 = vld [vmem:[#allocation2 + $0x10] sm:$0xff] }
 0x402   :  { %v1632_v44 = vmul.f32 %v2851_v53, %v4310_v18  ;;  %v1521_v3 = vpop.xlane.xlu1 %1520  ;;  %v1663_v11 = vadd.f32 %v3144_v35, %v1631_v21  ;;  %v3146_v18 = vld [vmem:[#allocation2 + $0x18] sm:$0xff] }
 0x403   :  { %v2853_v13 = vpop.eup %2852  ;;  %2862 = vrcp.f32 %v1574_v49  ;;  %v1575_v52 = vadd.f32 1e-06, %v1521_v3 }
 0x404   :  { %v1633_v8 = vmul.f32 %v2853_v13, %v4315_v15  ;;  %v1523_v27 = vpop.xlane.xlu0 %1522  ;;  %v1694_v57 = vpack.c.bf16 %v1663_v11, %v1662_v40  ;;  %v1664_v7 = vadd.f32 %v3145_v42, %v1632_v44  ;;  %v3147_v11 = vld [vmem:[#allocation2 + $0x20] sm:$0xff] }
 0x405   :  { %v2855_v61 = vpop.eup %2854  ;;  %2864 = vrcp.f32 %v1575_v52  ;;  %v1576_v58 = vadd.f32 1e-06, %v1523_v27  ;;  %v3148_v27 = vld [vmem:[#allocation2 + $0x28] sm:$0xff] }
 0x406   :  { %2519 = vmatprep.mubr.bf16.mxu0 %v1694_v57  ;;  %v1525_v19 = vpop.xlane.xlu1 %1524  ;;  %v1665_v53 = vadd.f32 %v3146_v18, %v1633_v8  ;;  %v1634_v31 = vmul.f32 %v2855_v61, %v4319_v24  ;;  %v3149_v18 = vld [vmem:[#allocation2 + $0x30] sm:$0xff] }
 0x407   :  { %v2857_v17 = vpop.eup %2856  ;;  %2866 = vrcp.f32 %v1576_v58  ;;  %v1577_v35 = vadd.f32 1e-06, %v1525_v19 }
 0x408   :  { %v1527_v21 = vpop.xlane.xlu0 %1526  ;;  %v1695_v49 = vpack.c.bf16 %v1665_v53, %v1664_v7  ;;  %v1635_v15 = vmul.f32 %v2857_v17, %v4324_v2  ;;  %v1666_v13 = vadd.f32 %v3147_v11, %v1634_v31  ;;  %v3150_v17 = vld [vmem:[#allocation2 + $0x38] sm:$0xff]  ;;  %v3151_v11 = vld [vmem:[#allocation2 + $0x40] sm:$0xff] }
 0x409   :  { %v2859_v3 = vpop.eup %2858  ;;  %2868 = vrcp.f32 %v1577_v35  ;;  %v1578_v40 = vadd.f32 1e-06, %v1527_v21 }
 0x40a   :  { %2520 = vmatmul.mubr.bf16.vlgmr.msra.gmra.mrb[32].mxu0 %v1695_v49  ;;  %v1529_v52 = vpop.xlane.xlu1 %1528  ;;  %v1667_v44 = vadd.f32 %v3148_v27, %v1635_v15  ;;  %v1636_v8 = vmul.f32 %v2859_v3, %v4322_v46  ;;  %v3152_v27 = vld [vmem:[#allocation2 + $0x48] sm:$0xff] }
 0x40b   :  { %v2861_v57 = vpop.eup %2860  ;;  %2870 = vrcp.f32 %v1578_v40  ;;  %v1579_v24 = vadd.f32 1e-06, %v1529_v52 }
 0x40c   :  { %v1531_v61 = vpop.xlane.xlu0 %1530  ;;  %v1696_v58 = vpack.c.bf16 %v1667_v44, %v1666_v13  ;;  %v1637_v19 = vmul.f32 %v2861_v57, %v4327_v23  ;;  %v1668_v53 = vadd.f32 %v3149_v18, %v1636_v8  ;;  %v3154_v18 = vld [vmem:[#allocation2 + $0x58] sm:$0xff] }
 0x40d   :  { %v2863_v42 = vpop.eup %2862  ;;  %2872 = vrcp.f32 %v1579_v24  ;;  %v1580_v2 = vadd.f32 1e-06, %v1531_v61 }
 0x40e   :  { %2523 = vmatprep.mubr.bf16.mxu0 %v1696_v58  ;;  %v1533_v7 = vpop.xlane.xlu1 %1532  ;;  %v1669_v31 = vadd.f32 %v3150_v17, %v1637_v19  ;;  %v1638_v35 = vmul.f32 %v2863_v42, %v4331_v33 }
 0x40f   :  { %v2865_v21 = vpop.eup %2864  ;;  %2874 = vrcp.f32 %v1580_v2  ;;  %v1581_v46 = vadd.f32 1e-06, %v1533_v7  ;;  %v3153_v2 = vld [vmem:[#allocation2 + $0x50] sm:$0xff] }
 0x410   :  { %v1535_v49 = vpop.xlane.xlu0 %1534  ;;  %v1697_v15 = vpack.c.bf16 %v1669_v31, %v1668_v53  ;;  %v1639_v3 = vmul.f32 %v2865_v21, %v4336_v28  ;;  %v1670_v13 = vadd.f32 %v3151_v11, %v1638_v35 }
 0x411   :  { %v2867_v40 = vpop.eup %2866  ;;  %2876 = vrcp.f32 %v1581_v46  ;;  %v1582_v23 = vadd.f32 1e-06, %v1535_v49 }
 0x412   :  { %2524 = vmatmul.mubr.bf16.gmra.mrb[36].mxu0 %v1697_v15  ;;  %v1537_v52 = vpop.xlane.xlu1 %1536  ;;  %v1671_v44 = vadd.f32 %v3152_v27, %v1639_v3  ;;  %v1640_v8 = vmul.f32 %v2867_v40, %v4334_v20  ;;  %v3155_v3 = vld [vmem:[#allocation2 + $0x60] sm:$0xff] }
 0x413   :  { %v2869_v57 = vpop.eup %2868  ;;  %2878 = vrcp.f32 %v1582_v23  ;;  %v1583_v33 = vadd.f32 1e-06, %v1537_v52  ;;  %v3156_v23 = vld [vmem:[#allocation2 + $0x68] sm:$0xff] }
 0x414   :  { %v1539_v24 = vpop.xlane.xlu0 %1538  ;;  %v1698_v61 = vpack.c.bf16 %v1671_v44, %v1670_v13  ;;  %v1641_v58 = vmul.f32 %v2869_v57, %v4339_v56  ;;  %v1672_v7 = vadd.f32 %v3153_v2, %v1640_v8 }
 0x415   :  { %v2871_v19 = vpop.eup %2870  ;;  %2880 = vrcp.f32 %v1583_v33  ;;  %v1584_v28 = vadd.f32 1e-06, %v1539_v24  ;;  %v3157_v24 = vld [vmem:[#allocation2 + $0x70] sm:$0xff] }
 0x416   :  { %2527 = vmatprep.mubr.bf16.mxu0 %v1698_v61  ;;  %v1541_v42 = vpop.xlane.xlu1 %1540  ;;  %v1673_v53 = vadd.f32 %v3154_v18, %v1641_v58  ;;  %v1642_v17 = vmul.f32 %v2871_v19, %v4343_v51  ;;  %v3158_v58 = vld [vmem:[#allocation2 + $0x78] sm:$0xff] }
 0x417   :  { %v2873_v31 = vpop.eup %2872  ;;  %2882 = vrcp.f32 %v1584_v28  ;;  %v1585_v20 = vadd.f32 1e-06, %v1541_v42 }
 0x418   :  { %v1543_v35 = vpop.xlane.xlu0 %1542  ;;  %v1699_v21 = vpack.c.bf16 %v1673_v53, %v1672_v7  ;;  %v1643_v46 = vmul.f32 %v2873_v31, %v4348_v55  ;;  %v1674_v40 = vadd.f32 %v3155_v3, %v1642_v17  ;;  %v3159_v17 = vld [vmem:[#allocation2 + $0x80] sm:$0xff] }
 0x419   :  { %v2875_v49 = vpop.eup %2874  ;;  %2884 = vrcp.f32 %v1585_v20  ;;  %v1586_v56 = vadd.f32 1e-06, %v1543_v35  ;;  %v3160_v20 = vld [vmem:[#allocation2 + $0x88] sm:$0xff] }
 0x41a   :  { %2528 = vmatmul.mubr.bf16.gmra.mrb[40].mxu0 %v1699_v21  ;;  %v1545_v15 = vpop.xlane.xlu1 %1544  ;;  %v1675_v52 = vadd.f32 %v3156_v23, %v1643_v46  ;;  %v1644_v11 = vmul.f32 %v2875_v49, %v4346_v0 }
 0x41b   :  { %v2877_v13 = vpop.eup %2876  ;;  %2886 = vrcp.f32 %v1586_v56  ;;  %v1587_v51 = vadd.f32 1e-06, %v1545_v15 }
 0x41c   :  { %v1547_v27 = vpop.xlane.xlu0 %1546  ;;  %v1700_v44 = vpack.c.bf16 %v1675_v52, %v1674_v40  ;;  %v1645_v8 = vmul.f32 %v2877_v13, %v4351_v45  ;;  %v1676_v61 = vadd.f32 %v3157_v24, %v1644_v11  ;;  %v3161_v40 = vld [vmem:[#allocation2 + $0x90] sm:$0xff]  ;;  %v3162_v11 = vld [vmem:[#allocation2 + $0x98] sm:$0xff]  ;;  %v3164_v24 = vld [vmem:[#allocation2 + $0xa8] sm:$0xff] }
 0x41d   :  { %v2879_v57 = vpop.eup %2878  ;;  %2888 = vrcp.f32 %v1587_v51  ;;  %v1588_v55 = vadd.f32 1e-06, %v1547_v27 }
 0x41e   :  { %2531 = vmatprep.mubr.bf16.mxu0 %v1700_v44  ;;  %v1549_v33 = vpop.xlane.xlu1 %1548  ;;  %v1677_v19 = vadd.f32 %v3158_v58, %v1645_v8  ;;  %v1646_v28 = vmul.f32 %v2879_v57, %v4355_v54 }
 0x41f   :  { %v2881_v42 = vpop.eup %2880  ;;  %2890 = vrcp.f32 %v1588_v55  ;;  %v1589_v0 = vadd.f32 1e-06, %v1549_v33 }
 0x420   :  { %v1701_v2 = vpack.c.bf16 %v1677_v19, %v1676_v61  ;;  %v1647_v7 = vmul.f32 %v2881_v42, %v4360_v48  ;;  %v1678_v31 = vadd.f32 %v3159_v17, %v1646_v28 }
 0x421   :  { %v2883_v18 = vpop.eup %2882  ;;  %2892 = vrcp.f32 %v1589_v0  ;;  %v1551_v45 = vpop.xlane.xlu0 %1550 }
 0x422   :  { %v1590_v53 = vadd.f32 1e-06, %v1551_v45  ;;  %2532 = vmatmul.mubr.bf16.gmra.mrb[44].mxu0 %v1701_v2  ;;  %v1679_v35 = vadd.f32 %v3160_v20, %v1647_v7  ;;  %v1648_v21 = vmul.f32 %v2883_v18, %v4358_v29 }
 0x423   :  { %v2885_v46 = vpop.eup %2884  ;;  %v1553_v49 = vpop.xlane.xlu1 %1552 }
 0x424   :  { %2894 = vrcp.f32 %v1590_v53  ;;  %v1591_v54 = vadd.f32 1e-06, %v1553_v49  ;;  %v1702_v56 = vpack.c.bf16 %v1679_v35, %v1678_v31  ;;  %v1649_v15 = vmul.f32 %v2885_v46, %v4363_v60  ;;  %v3163_v60 = vld [vmem:[#allocation2 + $0xa0] sm:$0xff]  ;;  %v3166_v53 = vld [vmem:[#allocation2 + $0xb8] sm:$0xff] }
 0x425   :  { %v2887_v3 = vpop.eup %2886  ;;  %v1555_v48 = vpop.xlane.xlu0 %1554  ;;  %v1680_v23 = vadd.f32 %v3161_v40, %v1648_v21 }
 0x426   :  { %2896 = vrcp.f32 %v1591_v54  ;;  %v1592_v52 = vadd.f32 1e-06, %v1555_v48  ;;  %2535 = vmatprep.mubr.bf16.mxu0 %v1702_v56  ;;  %v1681_v13 = vadd.f32 %v3162_v11, %v1649_v15  ;;  %v1650_v51 = vmul.f32 %v2887_v3, %v4367_v38  ;;  %v3167_v15 = vld [vmem:[#allocation2 + $0xc0] sm:$0xff]  ;;  %v3168_v48 = vld [vmem:[#allocation2 + $0xc8] sm:$0xff]  ;;  %v3169_v11 = vld [vmem:[#allocation2 + $0xd0] sm:$0xff] }
 0x427   :  { %v2889_v27 = vpop.eup %2888  ;;  %v1557_v29 = vpop.xlane.xlu1 %1556 }
 0x428   :  { %2898 = vrcp.f32 %v1592_v52  ;;  %v1593_v44 = vadd.f32 1e-06, %v1557_v29  ;;  %v1703_v8 = vpack.c.bf16 %v1681_v13, %v1680_v23  ;;  %v1651_v57 = vmul.f32 %v2889_v27, %v4372_v1  ;;  %v3165_v1 = vld [vmem:[#allocation2 + $0xb0] sm:$0xff] }
 0x429   :  { %v2891_v55 = vpop.eup %2890  ;;  %v1682_v33 = vadd.f32 %v3163_v60, %v1650_v51  ;;  %v3170_v51 = vld [vmem:[#allocation2 + $0xd8] sm:$0xff] }
 0x42a   :  { %2900 = vrcp.f32 %v1593_v44  ;;  %2536 = vmatmul.mubr.bf16.gmra.mrb[48].mxu0 %v1703_v8  ;;  %v1683_v61 = vadd.f32 %v3164_v24, %v1651_v57  ;;  %v1652_v58 = vmul.f32 %v2891_v55, %v4370_v10  ;;  %v3171_v55 = vld [vmem:[#allocation2 + $0xe0] sm:$0xff] }
 0x42b   :  { %v2893_v19 = vpop.eup %2892  ;;  %v1559_v28 = vpop.xlane.xlu0 %1558 }
 0x42c   :  { %v1594_v42 = vadd.f32 1e-06, %v1559_v28  ;;  %v1704_v38 = vpack.c.bf16 %v1683_v61, %v1682_v33  ;;  %v1653_v0 = vmul.f32 %v2893_v19, %v4375_v30  ;;  %v1684_v45 = vadd.f32 %v3165_v1, %v1652_v58  ;;  %v3172_v33 = vld [vmem:[#allocation2 + $0xe8] sm:$0xff]  ;;  %v3173_v28 = vld [vmem:[#allocation2 + $0xf0] sm:$0xff] }
 0x42d   :  { %v1561_v2 = vpop.xlane.xlu1 %1560 }
 0x42e   :  { %v2895_v7 = vpop.eup %2894  ;;  %2902 = vrcp.f32 %v1594_v42  ;;  %v1595_v18 = vadd.f32 1e-06, %v1561_v2  ;;  %2539 = vmatprep.mubr.bf16.mxu0 %v1704_v38  ;;  %v1685_v17 = vadd.f32 %v3166_v53, %v1653_v0  ;;  %v3174_v38 = vld [vmem:[#allocation2 + $0xf8] sm:$0xff] }
 0x42f   :  { %v1563_v31 = vpop.xlane.xlu0 %1562  ;;  %v1654_v20 = vmul.f32 %v2895_v7, %v4380_v43  ;;  %v4439_v7 = vld [vmem:[%s4777_s4] ss:$0 sm:$0xff] }
 0x430   :  { %v2897_v35 = vpop.eup %2896  ;;  %2904 = vrcp.f32 %v1595_v18  ;;  %v1596_v10 = vadd.f32 1e-06, %v1563_v31  ;;  %v1705_v21 = vpack.c.bf16 %v1685_v17, %v1684_v45 }
 0x431   :  { %v1565_v46 = vpop.xlane.xlu1 %1564  ;;  %v1655_v49 = vmul.f32 %v2897_v35, %v4384_v34  ;;  %v1686_v3 = vadd.f32 %v3167_v15, %v1654_v20 }
 0x432   :  { %v2899_v30 = vpop.eup %2898  ;;  %2906 = vrcp.f32 %v1596_v10  ;;  %v1597_v54 = vadd.f32 1e-06, %v1565_v46  ;;  %2540 = vmatmul.mubr.bf16.gmra.mrb[52].mxu0 %v1705_v21 }
 0x433   :  { %v1656_v56 = vmul.f32 %v2899_v30, %v4382_v14  ;;  %v1687_v40 = vadd.f32 %v3168_v48, %v1655_v49 }
 0x434   :  { %v2901_v23 = vpop.eup %2900  ;;  %2908 = vrcp.f32 %v1597_v54 }
 0x435   :  { %v1657_v43 = vmul.f32 %v2901_v23, %v4387_v5  ;;  %v1706_v52 = vpack.c.bf16 %v1687_v40, %v1686_v3  ;;  %v1688_v13 = vadd.f32 %v3169_v11, %v1656_v56 }
 0x437   :  { %2543 = vmatprep.mubr.bf16.mxu1 %v1706_v52  ;;  %v1689_v34 = vadd.f32 %v3170_v51, %v1657_v43 }
 0x438   :  { %v2903_v27 = vpop.eup %2902 }
 0x439   :  { %v1707_v29 = vpack.c.bf16 %v1689_v34, %v1688_v13  ;;  %v1658_v44 = vmul.f32 %v2903_v27, %v4392_v16 }
 0x43a   :  { %v2905_v8 = vpop.eup %2904 }
 0x43b   :  { %2544 = vmatmul.mubr.bf16.vlgmr.msra.gmra.mrb[32].mxu1 %v1707_v29  ;;  %v1659_v14 = vmul.f32 %v2905_v8, %v4396_v32  ;;  %v1690_v60 = vadd.f32 %v3171_v55, %v1658_v44 }
 0x43c   :  { %v2907_v57 = vpop.eup %2906 }
 0x43d   :  { %v1691_v24 = vadd.f32 %v3172_v33, %v1659_v14  ;;  %v1660_v5 = vmul.f32 %v2907_v57, %v4394_v41 }
 0x43e   :  { %v2909_v61 = vpop.eup %2908 }
 0x43f   :  { %v1708_v58 = vpack.c.bf16 %v1691_v24, %v1690_v60  ;;  %v1661_v19 = vmul.f32 %v2909_v61, %v4399_v6  ;;  %v1692_v42 = vadd.f32 %v3173_v28, %v1660_v5 }
 0x441   :  { %2547 = vmatprep.mubr.bf16.mxu1 %v1708_v58  ;;  %v1693_v16 = vadd.f32 %v3174_v38, %v1661_v19 }
 0x443   :  { %v1709_v0 = vpack.c.bf16 %v1693_v16, %v1692_v42 }
 0x445   :  { %2548 = vmatmul.mubr.bf16.gmra.mrb[36].mxu1 %v1709_v0 }
 0x4dd   :  { %v2521_v2 = vpop.f32.mrb[32].mxu0 }
 0x4de   :  { %v1744_v32 = vpop.f32.mrb[33].mxu0  ;;  %v4449_v45 = vadd.f32 %v4439_v7, %v2521_v2 }
 0x4df   :  { %v4442_v41 = vadd.f32 %v4439_v7, %v1744_v32  ;;  %v2522_v18 = vpop.f32.mrb[34].mxu0 }
 0x4e0   :  { %v1747_v1 = vpop.f32.mrb[35].mxu0  ;;  %v4453_v53 = vadd.f32 %v4439_v7, %v2522_v18 }
 0x4e1   :  { %v4445_v6 = vadd.f32 %v4439_v7, %v1747_v1  ;;  %1871 = vmax.xlane.f32.xlu0 %v4442_v41 }
 0x4e3   :  { %1873 = vmax.xlane.f32.xlu1 %v4445_v6 }
 0x4e5   :  { %1875 = vmax.xlane.f32.xlu0 %v4449_v45  ;;  %v2525_v17 = vpop.f32.mrb[36].mxu0 }
 0x4e6   :  { %v1760_v31 = vpop.f32.mrb[37].mxu0  ;;  %v4465_v46 = vadd.f32 %v4439_v7, %v2525_v17 }
 0x4e7   :  { %v4457_v20 = vadd.f32 %v4439_v7, %v1760_v31  ;;  %1877 = vmax.xlane.f32.xlu1 %v4453_v53  ;;  %v2526_v35 = vpop.f32.mrb[38].mxu0 }
 0x4e8   :  { %v1763_v10 = vpop.f32.mrb[39].mxu0  ;;  %v4469_v49 = vadd.f32 %v4439_v7, %v2526_v35 }
 0x4e9   :  { %v4461_v21 = vadd.f32 %v4439_v7, %v1763_v10  ;;  %1879 = vmax.xlane.f32.xlu0 %v4457_v20 }
 0x4eb   :  { %1881 = vmax.xlane.f32.xlu1 %v4461_v21 }
 0x4ed   :  { %1883 = vmax.xlane.f32.xlu0 %v4465_v46  ;;  %v2529_v30 = vpop.f32.mrb[40].mxu0 }
 0x4ee   :  { %v1776_v54 = vpop.f32.mrb[41].mxu0  ;;  %v4481_v40 = vadd.f32 %v4439_v7, %v2529_v30 }
 0x4ef   :  { %v4473_v56 = vadd.f32 %v4439_v7, %v1776_v54  ;;  %1885 = vmax.xlane.f32.xlu1 %v4469_v49  ;;  %v2530_v15 = vpop.f32.mrb[42].mxu0 }
 0x4f0   :  { %v1779_v3 = vpop.f32.mrb[43].mxu0  ;;  %v4485_v23 = vadd.f32 %v4439_v7, %v2530_v15 }
 0x4f1   :  { %v4477_v48 = vadd.f32 %v4439_v7, %v1779_v3  ;;  %1887 = vmax.xlane.f32.xlu0 %v4473_v56 }
 0x4f3   :  { %1889 = vmax.xlane.f32.xlu1 %v4477_v48 }
 0x4f5   :  { %1891 = vmax.xlane.f32.xlu0 %v4481_v40  ;;  %v2533_v43 = vpop.f32.mrb[44].mxu0 }
 0x4f6   :  { %v1792_v52 = vpop.f32.mrb[45].mxu0  ;;  %v4497_v27 = vadd.f32 %v4439_v7, %v2533_v43 }
 0x4f7   :  { %v4489_v11 = vadd.f32 %v4439_v7, %v1792_v52  ;;  %1893 = vmax.xlane.f32.xlu1 %v4485_v23  ;;  %v2534_v13 = vpop.f32.mrb[46].mxu0 }
 0x4f8   :  { %v1795_v51 = vpop.f32.mrb[47].mxu0  ;;  %v4501_v29 = vadd.f32 %v4439_v7, %v2534_v13 }
 0x4f9   :  { %v4493_v34 = vadd.f32 %v4439_v7, %v1795_v51  ;;  %1895 = vmax.xlane.f32.xlu0 %v4489_v11  ;;  %v5072_v51 = vld [vmem:[#allocation71_spill] sm:$0xff] }
 0x4fa   :  { %2910 = vlog2.f32 %v5072_v51  ;;  %v5081_v51 = vld [vmem:[#allocation19_spill] sm:$0xff] }
 0x4fb   :  { %1897 = vmax.xlane.f32.xlu1 %v4493_v34 }
 0x4fd   :  { %1899 = vmax.xlane.f32.xlu0 %v4497_v27  ;;  %v2537_v44 = vpop.f32.mrb[48].mxu0 }
 0x4fe   :  { %v1808_v8 = vpop.f32.mrb[49].mxu0  ;;  %v4513_v33 = vadd.f32 %v4439_v7, %v2537_v44  ;;  %v5073_v44 = vld [vmem:[#allocation72_spill] sm:$0xff] }
 0x4ff   :  { %v4505_v14 = vadd.f32 %v4439_v7, %v1808_v8  ;;  %1901 = vmax.xlane.f32.xlu1 %v4501_v29  ;;  %v2538_v57 = vpop.f32.mrb[50].mxu0  ;;  %2912 = vlog2.f32 %v5073_v44  ;;  %v5074_v8 = vld [vmem:[#allocation73_spill] sm:$0xff] }
 0x500   :  { %v1811_v55 = vpop.f32.mrb[51].mxu0  ;;  %v4517_v24 = vadd.f32 %v4439_v7, %v2538_v57  ;;  %2914 = vlog2.f32 %v5074_v8  ;;  %v5075_v57 = vld [vmem:[#allocation74_spill] sm:$0xff] }
 0x501   :  { %v4509_v60 = vadd.f32 %v4439_v7, %v1811_v55  ;;  %1903 = vmax.xlane.f32.xlu0 %v4505_v14  ;;  %2916 = vlog2.f32 %v5075_v57 }
 0x503   :  { %1905 = vmax.xlane.f32.xlu1 %v4509_v60 }
 0x504   :  { %v2911_v55 = vpop.eup %2910 }
 0x505   :  { %1907 = vmax.xlane.f32.xlu0 %v4513_v33  ;;  %v2541_v5 = vpop.f32.mrb[52].mxu0 }
 0x506   :  { %v1824_v61 = vpop.f32.mrb[53].mxu0  ;;  %v4529_v38 = vadd.f32 %v4439_v7, %v2541_v5  ;;  %v5076_v5 = vld [vmem:[#allocation75_spill] sm:$0xff] }
 0x507   :  { %v4521_v58 = vadd.f32 %v4439_v7, %v1824_v61  ;;  %1909 = vmax.xlane.f32.xlu1 %v4517_v24  ;;  %v2542_v19 = vpop.f32.mrb[54].mxu0  ;;  %2918 = vlog2.f32 %v5076_v5 }
 0x508   :  { %v1827_v28 = vpop.f32.mrb[55].mxu0  ;;  %v4533_v16 = vadd.f32 %v4439_v7, %v2542_v19 }
 0x509   :  { %v4525_v42 = vadd.f32 %v4439_v7, %v1827_v28  ;;  %1911 = vmax.xlane.f32.xlu0 %v4521_v58  ;;  %v2913_v61 = vpop.eup %2912  ;;  %v481_v28 = vmul.f32 0.6931472, %v2911_v55 }
 0x50a   :  { %v2915_v19 = vpop.eup %2914 }
 0x50b   :  { %1913 = vmax.xlane.f32.xlu1 %v4525_v42 }
 0x50d   :  { %1915 = vmax.xlane.f32.xlu0 %v4529_v38 }
 0x50e   :  { %v2545_v0 = vpop.f32.mrb[32].mxu1 }
 0x50f   :  { %v1840_v2 = vpop.f32.mrb[33].mxu1  ;;  %1917 = vmax.xlane.f32.xlu1 %v4533_v16  ;;  %v4545_v31 = vadd.f32 %v4439_v7, %v2545_v0  ;;  %v483_v0 = vmul.f32 0.6931472, %v2915_v19  ;;  %v5082_v19 = vld [vmem:[#allocation78_spill] sm:$0xff] }
 0x510   :  { %v4538_v32 = vadd.f32 %v4439_v7, %v1840_v2  ;;  %v2546_v18 = vpop.f32.mrb[34].mxu1  ;;  %v5077_v2 = vld [vmem:[#allocation76_spill] sm:$0xff] }
 0x511   :  { %v1843_v1 = vpop.f32.mrb[35].mxu1  ;;  %v4549_v35 = vadd.f32 %v4439_v7, %v2546_v18  ;;  %2920 = vlog2.f32 %v5077_v2  ;;  %v5078_v18 = vld [vmem:[#allocation17_spill] sm:$0xff]  ;;  %v544_v44 = vsub.f32 %v5081_v51, %v483_v0  ;;  %v5083_v2 = vld [vmem:[#allocation16_spill] sm:$0xff] }
 0x512   :  { %v4541_v17 = vadd.f32 %v4439_v7, %v1843_v1  ;;  %1919 = vmax.xlane.f32.xlu0 %v4538_v32  ;;  %v543_v1 = vsub.f32 %v5078_v18, %v481_v28 }
 0x514   :  { %1921 = vmax.xlane.f32.xlu1 %v4541_v17  ;;  %v575_v5 = vmul.f32 %v543_v1, %v4132_v50 }
 0x516   :  { %1923 = vmax.xlane.f32.xlu0 %v4545_v31 }
 0x518   :  { %1925 = vmax.xlane.f32.xlu1 %v4549_v35  ;;  %v2549_v10 = vpop.f32.mrb[36].mxu1 }
 0x519   :  { %v1856_v30 = vpop.f32.mrb[37].mxu1  ;;  %v4561_v52 = vadd.f32 %v4439_v7, %v2549_v10  ;;  %v2917_v10 = vpop.eup %2916 }
 0x51a   :  { %v4554_v54 = vadd.f32 %v4439_v7, %v1856_v30  ;;  %v2550_v15 = vpop.f32.mrb[38].mxu1  ;;  %v5079_v30 = vld [vmem:[#allocation77_spill] sm:$0xff]  ;;  %v2919_v8 = vpop.eup %2918  ;;  %v485_v57 = vmul.f32 0.6931472, %v2917_v10 }
 0x51b   :  { %v1859_v3 = vpop.f32.mrb[39].mxu1  ;;  %5070 = vst [vmem:[#allocation66_spill] sm:$0xff] %v4561_v52  ;;  %v4565_v13 = vadd.f32 %v4439_v7, %v2550_v15  ;;  %2922 = vlog2.f32 %v5079_v30  ;;  %v5080_v15 = vld [vmem:[#allocation15_spill] sm:$0xff]  ;;  %v487_v55 = vmul.f32 0.6931472, %v2919_v8 }
 0x51c   :  { %5068 = vst [vmem:[#allocation64_spill] sm:$0xff] %v4554_v54  ;;  %v4557_v43 = vadd.f32 %v4439_v7, %v1859_v3  ;;  %1927 = vmax.xlane.f32.xlu0 %v4554_v54  ;;  %v479_v7 = vmul.f32 0.6931472, %v2913_v61  ;;  %2924 = vlog2.f32 %v5082_v19  ;;  %v545_v28 = vsub.f32 %v5083_v2, %v485_v57  ;;  %v5086_v19 = vld [vmem:[#allocation18_spill] sm:$0xff] }
 0x51d   :  { %5071 = vst [vmem:[#allocation68_spill] sm:$0xff] %v4565_v13  ;;  %2926 = vlog2.f32 %v3925_v36 }
 0x51e   :  { %5069 = vst [vmem:[#allocation67_spill] sm:$0xff] %v4557_v43  ;;  %1929 = vmax.xlane.f32.xlu1 %v4557_v43  ;;  %v542_v3 = vsub.f32 %v5080_v15, %v479_v7  ;;  %v5084_v7 = vld [vmem:[#allocation21_spill] sm:$0xff]  ;;  %v577_v10 = vmul.f32 %v545_v28, %v4124_v26 }
 0x51f   :  { %v546_v30 = vsub.f32 %v5084_v7, %v487_v55 }
 0x520   :  { %1931 = vmax.xlane.f32.xlu0 %v4561_v52  ;;  %v574_v61 = vmul.f32 %v542_v3, %v4129_v59  ;;  %v2921_v52 = vpop.eup %2920  ;;  %v5085_v3 = vld [vmem:[#allocation79_spill] sm:$0xff] }
 0x521   :  { %v489_v1 = vmul.f32 0.6931472, %v2921_v52  ;;  %v578_v51 = vmul.f32 %v546_v30, %v4156_v63  ;;  %2928 = vlog2.f32 %v5085_v3  ;;  %v5089_v30 = vld [vmem:[#allocation81_spill] sm:$0xff] }
 0x522   :  { %1933 = vmax.xlane.f32.xlu1 %v4565_v13  ;;  %v576_v13 = vmul.f32 %v544_v44, %v4136_v22  ;;  %v606_v18 = vadd.f32 %v575_v5, %v574_v61  ;;  %v5087_v5 = vld [vmem:[#allocation80_spill] sm:$0xff]  ;;  %v5088_v61 = vld [vmem:[#allocation23_spill] sm:$0xff]  ;;  %v5092_v3 = vld [vmem:[#allocation25_spill] sm:$0xff] }
 0x523   :  { %v547_v43 = vsub.f32 %v5086_v19, %v489_v1  ;;  %2930 = vlog2.f32 %v5087_v5  ;;  %v5091_v1 = vld [vmem:[#allocation82_spill] sm:$0xff] }
 0x524   :  { %v607_v0 = vadd.f32 %v606_v18, %v576_v13  ;;  %2932 = vlog2.f32 %v5089_v30 }
 0x525   :  { %v2923_v15 = vpop.eup %2922  ;;  %v579_v13 = vmul.f32 %v547_v43, %v4153_v62  ;;  %2934 = vlog2.f32 %v5091_v1 }
 0x526   :  { %v491_v44 = vmul.f32 0.6931472, %v2923_v15  ;;  %v608_v8 = vadd.f32 %v607_v0, %v577_v10  ;;  %v2925_v57 = vpop.eup %2924  ;;  %v5090_v0 = vld [vmem:[#allocation20_spill] sm:$0xff] }
 0x527   :  { %v2927_v55 = vpop.eup %2926  ;;  %v493_v18 = vmul.f32 0.6931472, %v2925_v57 }
 0x528   :  { %v548_v36 = vsub.f32 %v5088_v61, %v491_v44  ;;  %v609_v2 = vadd.f32 %v608_v8, %v578_v51  ;;  %v495_v28 = vmul.f32 0.6931472, %v2927_v55  ;;  %v5093_v51 = vld [vmem:[#allocation31_spill] sm:$0xff] }
 0x529   :  { %v549_v15 = vsub.f32 %v5090_v0, %v493_v18  ;;  %v5094_v55 = vld [vmem:[#allocation83_spill] sm:$0xff]  ;;  %v5096_v18 = vld [vmem:[#allocation84_spill] sm:$0xff] }
 0x52a   :  { %v580_v52 = vmul.f32 %v548_v36, %v4160_v39  ;;  %v610_v7 = vadd.f32 %v609_v2, %v579_v13  ;;  %v550_v19 = vsub.f32 %v5092_v3, %v495_v28  ;;  %2936 = vlog2.f32 %v5094_v55  ;;  %v5095_v2 = vld [vmem:[#allocation22_spill] sm:$0xff]  ;;  %v5097_v0 = vld [vmem:[#allocation28_spill] sm:$0xff]  ;;  %v5098_v3 = vld [vmem:[#allocation85_spill] sm:$0xff] }
 0x52b   :  { %v2929_v10 = vpop.eup %2928  ;;  %v581_v8 = vmul.f32 %v549_v15, %v5093_v51  ;;  %2938 = vlog2.f32 %v5096_v18 }
 0x52c   :  { %v611_v5 = vadd.f32 %v610_v7, %v580_v52  ;;  %v497_v61 = vmul.f32 0.6931472, %v2929_v10  ;;  %v582_v43 = vmul.f32 %v550_v19, %v4180_v12  ;;  %2940 = vlog2.f32 %v5098_v3 }
 0x52d   :  { %v2931_v44 = vpop.eup %2930  ;;  %2942 = vlog2.f32 %v5023_v47 }
 0x52e   :  { %v499_v57 = vmul.f32 0.6931472, %v2931_v44  ;;  %v612_v36 = vadd.f32 %v611_v5, %v581_v8  ;;  %v551_v13 = vsub.f32 %v5095_v2, %v497_v61  ;;  %v2933_v30 = vpop.eup %2932  ;;  %v5099_v8 = vld [vmem:[#allocation24_spill] sm:$0xff] }
 0x52f   :  { %v2935_v28 = vpop.eup %2934  ;;  %v501_v7 = vmul.f32 0.6931472, %v2933_v30  ;;  %v5100_v2 = vld [vmem:[#allocation32_spill] sm:$0xff] }
 0x530   :  { %v552_v1 = vsub.f32 %v5097_v0, %v499_v57  ;;  %v613_v54 = vadd.f32 %v612_v36, %v582_v43  ;;  %v583_v52 = vmul.f32 %v551_v13, %v4177_v4  ;;  %v503_v10 = vmul.f32 0.6931472, %v2935_v28 }
 0x531   :  { %v553_v61 = vsub.f32 %v5099_v8, %v501_v7  ;;  %v5101_v7 = vld [vmem:[#allocation87_spill] sm:$0xff] }
 0x532   :  { %v584_v15 = vmul.f32 %v552_v1, %v4184_v25  ;;  %v614_v19 = vadd.f32 %v613_v54, %v583_v52  ;;  %v554_v13 = vsub.f32 %v5100_v2, %v503_v10 }
 0x533   :  { %v585_v28 = vmul.f32 %v553_v61, %v4172_v9 }
 0x534   :  { %v2937_v57 = vpop.eup %2936  ;;  %v615_v30 = vadd.f32 %v614_v19, %v584_v15 }
 0x535   :  { %v2939_v1 = vpop.eup %2938  ;;  %v505_v52 = vmul.f32 0.6931472, %v2937_v57 }
 0x536   :  { %v507_v19 = vmul.f32 0.6931472, %v2939_v1  ;;  %v2941_v61 = vpop.eup %2940 }
 0x56e   :  { %v1872_v5 = vpop.xlane.xlu0 %1871 }
 0x56f   :  { %v1935_v44 = vsub.f32 %v4442_v41, %v1872_v5  ;;  %v616_v5 = vadd.f32 %v615_v30, %v585_v28 }
 0x570   :  { %v1874_v55 = vpop.xlane.xlu1 %1873 }
 0x571   :  { %v1967_v43 = vmul.f32 1.442695, %v1935_v44  ;;  %v1936_v36 = vsub.f32 %v4445_v6, %v1874_v55  ;;  %v2095_v18 = vmul.f32 %v1935_v44, %v4129_v59  ;;  %v586_v59 = vmul.f32 %v554_v13, %v4204_v37  ;;  %v5102_v55 = vld [vmem:[#allocation26_spill] sm:$0xff] }
 0x572   :  { %v1876_v0 = vpop.xlane.xlu0 %1875  ;;  %v555_v57 = vsub.f32 %v5102_v55, %v505_v52  ;;  %v5105_v52 = vld [vmem:[#allocation29_spill] sm:$0xff] }
 0x573   :  { %2944 = vpow2.f32 %v1967_v43  ;;  %v1969_v54 = vmul.f32 1.442695, %v1936_v36  ;;  %v2096_v47 = vmul.f32 %v1936_v36, %v4132_v50  ;;  %v1937_v41 = vsub.f32 %v4449_v45, %v1876_v0  ;;  %v5104_v0 = vld [vmem:[#allocation36_spill] sm:$0xff] }
 0x574   :  { %2946 = vlog2.f32 %v5101_v7  ;;  %v1878_v3 = vpop.xlane.xlu1 %1877  ;;  %v556_v1 = vsub.f32 %v5104_v0, %v507_v19  ;;  %v587_v7 = vmul.f32 %v555_v57, %v5105_v52 }
 0x575   :  { %2948 = vpow2.f32 %v1969_v54  ;;  %v2127_v6 = vadd.f32 %v2096_v47, %v2095_v18  ;;  %v1971_v10 = vmul.f32 1.442695, %v1937_v41  ;;  %v2097_v15 = vmul.f32 %v1937_v41, %v4136_v22  ;;  %v2943_v18 = vpop.eup %2942  ;;  %v5103_v22 = vld [vmem:[#allocation88_spill] sm:$0xff] }
 0x576   :  { %v1938_v44 = vsub.f32 %v4453_v53, %v1878_v3  ;;  %v1880_v50 = vpop.xlane.xlu0 %1879  ;;  %v617_v54 = vadd.f32 %v616_v5, %v586_v59  ;;  %v509_v3 = vmul.f32 0.6931472, %v2941_v61 }
 0x577   :  { %2950 = vpow2.f32 %v1971_v10  ;;  %v2128_v45 = vadd.f32 %v2127_v6, %v2097_v15  ;;  %v1939_v8 = vsub.f32 %v4457_v20, %v1880_v50  ;;  %v511_v6 = vmul.f32 0.6931472, %v2943_v18  ;;  %v5110_v18 = vld [vmem:[#allocation96_spill] sm:$0xff] }
 0x578   :  { %v1973_v43 = vmul.f32 1.442695, %v1938_v44  ;;  %v2098_v36 = vmul.f32 %v1938_v44, %v4124_v26  ;;  %v1882_v2 = vpop.xlane.xlu1 %1881  ;;  %2952 = vlog2.f32 %v5103_v22  ;;  %v5106_v44 = vld [vmem:[#allocation33_spill] sm:$0xff] }
 0x579   :  { %v1975_v13 = vmul.f32 1.442695, %v1939_v8  ;;  %v2099_v30 = vmul.f32 %v1939_v8, %v4156_v63  ;;  %v1940_v53 = vsub.f32 %v4461_v21, %v1882_v2  ;;  %v588_v50 = vmul.f32 %v556_v1, %v5106_v44  ;;  %v5109_v2 = vld [vmem:[#allocation40_spill] sm:$0xff] }
 0x57a   :  { %2954 = vpow2.f32 %v1973_v43  ;;  %v2129_v20 = vadd.f32 %v2128_v45, %v2098_v36  ;;  %v1884_v47 = vpop.xlane.xlu0 %1883  ;;  %v5107_v45 = vld [vmem:[#allocation89_spill] sm:$0xff]  ;;  %v5108_v36 = vld [vmem:[#allocation30_spill] sm:$0xff] }
 0x57b   :  { %2956 = vpow2.f32 %v1975_v13  ;;  %v1977_v41 = vmul.f32 1.442695, %v1940_v53  ;;  %v2100_v28 = vmul.f32 %v1940_v53, %v4153_v62  ;;  %v1941_v26 = vsub.f32 %v4465_v46, %v1884_v47 }
 0x57c   :  { %v2130_v10 = vadd.f32 %v2129_v20, %v2099_v30  ;;  %v1886_v63 = vpop.xlane.xlu1 %1885  ;;  %v618_v62 = vadd.f32 %v617_v54, %v587_v7  ;;  %v5111_v54 = vld [vmem:[#allocation97_spill] sm:$0xff] }
 0x57d   :  { %v2945_v15 = vpop.eup %2944  ;;  %2958 = vpow2.f32 %v1977_v41  ;;  %v1979_v21 = vmul.f32 1.442695, %v1941_v26  ;;  %v2101_v59 = vmul.f32 %v1941_v26, %v4160_v39  ;;  %v1942_v19 = vsub.f32 %v4469_v49, %v1886_v63 }
 0x57e   :  { %v2947_v5 = vpop.eup %2946  ;;  %2960 = vlog2.f32 %v5107_v45  ;;  %v2131_v46 = vadd.f32 %v2130_v10, %v2100_v28  ;;  %v1888_v8 = vpop.xlane.xlu0 %1887  ;;  %2031 = vadd.xlane.f32.xlu0 %v2945_v15  ;;  %v557_v39 = vsub.f32 %v5108_v36, %v509_v3  ;;  %v558_v49 = vsub.f32 %v5109_v2, %v511_v6  ;;  %v5112_v3 = vld [vmem:[#allocation27_spill] sm:$0xff] }
 0x57f   :  { %v2949_v61 = vpop.eup %2948  ;;  %2962 = vpow2.f32 %v1979_v21  ;;  %v1981_v55 = vmul.f32 1.442695, %v1942_v19  ;;  %v2102_v57 = vmul.f32 %v1942_v19, %v5093_v51  ;;  %v1943_v43 = vsub.f32 %v4473_v56, %v1888_v8  ;;  %v5116_v36 = vld [vmem:[#allocation99_spill] sm:$0xff] }
 0x580   :  { %2964 = vlog2.f32 %v5110_v18  ;;  %v2132_v22 = vadd.f32 %v2131_v46, %v2101_v59  ;;  %2033 = vadd.xlane.f32.xlu1 %v2949_v61  ;;  %v1890_v13 = vpop.xlane.xlu1 %1889  ;;  %v619_v20 = vadd.f32 %v618_v62, %v588_v50  ;;  %v589_v6 = vmul.f32 %v557_v39, %v5112_v3 }
 0x581   :  { %v2951_v30 = vpop.eup %2950  ;;  %2966 = vpow2.f32 %v1981_v55  ;;  %v1983_v53 = vmul.f32 1.442695, %v1943_v43  ;;  %v2103_v0 = vmul.f32 %v1943_v43, %v4180_v12  ;;  %v1944_v1 = vsub.f32 %v4477_v48, %v1890_v13  ;;  %v5113_v12 = vld [vmem:[#allocation37_spill] sm:$0xff]  ;;  %v5115_v43 = vld [vmem:[#allocation34_spill] sm:$0xff] }
 0x582   :  { %2968 = vlog2.f32 %v5111_v54  ;;  %v2133_v51 = vadd.f32 %v2132_v22, %v2102_v57  ;;  %v1892_v56 = vpop.xlane.xlu0 %1891  ;;  %2035 = vadd.xlane.f32.xlu0 %v2951_v30  ;;  %v2953_v47 = vpop.eup %2952  ;;  %v513_v10 = vmul.f32 0.6931472, %v2947_v5  ;;  %v590_v63 = vmul.f32 %v558_v49, %v5113_v12  ;;  %v5117_v30 = vld [vmem:[#allocation43_spill] sm:$0xff] }
 0x583   :  { %2970 = vpow2.f32 %v1983_v53  ;;  %v1985_v41 = vmul.f32 1.442695, %v1944_v1  ;;  %v2104_v28 = vmul.f32 %v1944_v1, %v4177_v4  ;;  %v1945_v26 = vsub.f32 %v4481_v40, %v1892_v56  ;;  %v5114_v4 = vld [vmem:[#allocation98_spill] sm:$0xff] }
 0x584   :  { %v2955_v7 = vpop.eup %2954  ;;  %v2134_v48 = vadd.f32 %v2133_v51, %v2103_v0  ;;  %v1894_v15 = vpop.xlane.xlu1 %1893  ;;  %v515_v45 = vmul.f32 0.6931472, %v2953_v47  ;;  %v620_v46 = vadd.f32 %v619_v20, %v589_v6  ;;  %v5118_v47 = vld [vmem:[#allocation35_spill] sm:$0xff] }
 0x585   :  { %v2957_v21 = vpop.eup %2956  ;;  %2972 = vpow2.f32 %v1985_v41  ;;  %v1987_v59 = vmul.f32 1.442695, %v1945_v26  ;;  %v2105_v19 = vmul.f32 %v1945_v26, %v4184_v25  ;;  %2037 = vadd.xlane.f32.xlu1 %v2955_v7  ;;  %v1946_v50 = vsub.f32 %v4485_v23, %v1894_v15 }
 0x586   :  { %2974 = vlog2.f32 %v5114_v4  ;;  %v2135_v40 = vadd.f32 %v2134_v48, %v2104_v28  ;;  %v1896_v62 = vpop.xlane.xlu0 %1895  ;;  %2039 = vadd.xlane.f32.xlu0 %v2957_v21  ;;  %v559_v25 = vsub.f32 %v5115_v43, %v513_v10  ;;  %v621_v0 = vadd.f32 %v620_v46, %v590_v63  ;;  %v5119_v63 = vld [vmem:[#allocation41_spill] sm:$0xff]  ;;  %v5121_v46 = vld [vmem:[#allocation100_spill] sm:$0xff] }
 0x587   :  { %v2959_v5 = vpop.eup %2958  ;;  %2976 = vpow2.f32 %v1987_v59  ;;  %v1989_v8 = vmul.f32 1.442695, %v1946_v50  ;;  %v2106_v61 = vmul.f32 %v1946_v50, %v4172_v9  ;;  %v1947_v55 = vsub.f32 %v4489_v11, %v1896_v62 }
 0x588   :  { %v2961_v57 = vpop.eup %2960  ;;  %2978 = vlog2.f32 %v5116_v36  ;;  %v2136_v23 = vadd.f32 %v2135_v40, %v2105_v19  ;;  %v1898_v39 = vpop.xlane.xlu1 %1897  ;;  %v560_v9 = vsub.f32 %v5117_v30, %v515_v45  ;;  %v5120_v40 = vld [vmem:[#allocation38_spill] sm:$0xff] }
 0x589   :  { %v2963_v2 = vpop.eup %2962  ;;  %2980 = vpow2.f32 %v1989_v8  ;;  %v1991_v49 = vmul.f32 1.442695, %v1947_v55  ;;  %v2107_v18 = vmul.f32 %v1947_v55, %v4204_v37  ;;  %2041 = vadd.xlane.f32.xlu1 %v2959_v5  ;;  %v1948_v22 = vsub.f32 %v4493_v34, %v1898_v39 }
 0x58a   :  { %v2965_v13 = vpop.eup %2964  ;;  %v2137_v53 = vadd.f32 %v2136_v23, %v2106_v61  ;;  %v1900_v11 = vpop.xlane.xlu0 %1899  ;;  %2043 = vadd.xlane.f32.xlu0 %v2963_v2  ;;  %v591_v37 = vmul.f32 %v559_v25, %v5118_v47  ;;  %v517_v41 = vmul.f32 0.6931472, %v2961_v57  ;;  %v592_v48 = vmul.f32 %v560_v9, %v5119_v63 }
 0x58b   :  { %v2967_v1 = vpop.eup %2966  ;;  %2982 = vpow2.f32 %v1991_v49  ;;  %v1993_v54 = vmul.f32 1.442695, %v1948_v22  ;;  %v2108_v51 = vmul.f32 %v1948_v22, %v5105_v52  ;;  %v1949_v56 = vsub.f32 %v4497_v27, %v1900_v11 }
 0x58c   :  { %v2969_v20 = vpop.eup %2968  ;;  %v2138_v28 = vadd.f32 %v2137_v53, %v2107_v18  ;;  %v1902_v34 = vpop.xlane.xlu1 %1901  ;;  %v519_v15 = vmul.f32 0.6931472, %v2965_v13  ;;  %v622_v27 = vadd.f32 %v621_v0, %v591_v37 }
 0x58d   :  { %v2971_v26 = vpop.eup %2970  ;;  %2984 = vpow2.f32 %v1993_v54  ;;  %v1995_v7 = vmul.f32 1.442695, %v1949_v56  ;;  %v2109_v6 = vmul.f32 %v1949_v56, %v5106_v44  ;;  %2045 = vadd.xlane.f32.xlu1 %v2967_v1  ;;  %v1950_v10 = vsub.f32 %v4501_v29, %v1902_v34  ;;  %v5126_v56 = vld [vmem:[#allocation42_spill] sm:$0xff] }
 0x58e   :  { %v2139_v52 = vadd.f32 %v2138_v28, %v2108_v51  ;;  %v1904_v21 = vpop.xlane.xlu0 %1903  ;;  %2047 = vadd.xlane.f32.xlu0 %v2971_v26  ;;  %v561_v44 = vsub.f32 %v5120_v40, %v517_v41  ;;  %v521_v62 = vmul.f32 0.6931472, %v2969_v20  ;;  %v623_v39 = vadd.f32 %v622_v27, %v592_v48 }
 0x58f   :  { %v2973_v59 = vpop.eup %2972  ;;  %2986 = vpow2.f32 %v1995_v7  ;;  %v1997_v19 = vmul.f32 1.442695, %v1950_v10  ;;  %v2110_v50 = vmul.f32 %v1950_v10, %v5112_v3  ;;  %v1951_v45 = vsub.f32 %v4505_v14, %v1904_v21  ;;  %v5122_v3 = vld [vmem:[#allocation51_spill] sm:$0xff]  ;;  %v5123_v14 = vld [vmem:[#allocation101_spill] sm:$0xff] }
 0x590   :  { %v2975_v4 = vpop.eup %2974  ;;  %2988 = vlog2.f32 %v5121_v46  ;;  %v2140_v29 = vadd.f32 %v2139_v52, %v2109_v6  ;;  %v1906_v5 = vpop.xlane.xlu1 %1905  ;;  %v562_v25 = vsub.f32 %v5122_v3, %v519_v15  ;;  %v5127_v6 = vld [vmem:[#allocation52_spill] sm:$0xff]  ;;  %v5129_v15 = vld [vmem:[#allocation102_spill] sm:$0xff] }
 0x591   :  { %v2977_v8 = vpop.eup %2976  ;;  %2990 = vpow2.f32 %v1997_v19  ;;  %v1999_v61 = vmul.f32 1.442695, %v1951_v45  ;;  %v2111_v55 = vmul.f32 %v1951_v45, %v5113_v12  ;;  %2049 = vadd.xlane.f32.xlu1 %v2973_v59  ;;  %v1952_v57 = vsub.f32 %v4509_v60, %v1906_v5  ;;  %v5124_v12 = vld [vmem:[#allocation39_spill] sm:$0xff]  ;;  %v5125_v60 = vld [vmem:[#allocation53_spill] sm:$0xff] }
 0x592   :  { %v2979_v43 = vpop.eup %2978  ;;  %2992 = vlog2.f32 %v5123_v14  ;;  %v2141_v36 = vadd.f32 %v2140_v29, %v2110_v50  ;;  %v1908_v23 = vpop.xlane.xlu0 %1907  ;;  %2051 = vadd.xlane.f32.xlu0 %v2977_v8  ;;  %v593_v13 = vmul.f32 %v561_v44, %v5124_v12  ;;  %v523_v30 = vmul.f32 0.6931472, %v2975_v4  ;;  %v5130_v45 = vld [vmem:[#allocation55_spill] sm:$0xff] }
 0x593   :  { %v2981_v2 = vpop.eup %2980  ;;  %2994 = vpow2.f32 %v1999_v61  ;;  %v2001_v49 = vmul.f32 1.442695, %v1952_v57  ;;  %v2112_v18 = vmul.f32 %v1952_v57, %v5118_v47  ;;  %v1953_v22 = vsub.f32 %v4513_v33, %v1908_v23 }
 0x594   :  { %v563_v9 = vsub.f32 %v5125_v60, %v521_v62  ;;  %v2142_v53 = vadd.f32 %v2141_v36, %v2111_v55  ;;  %v1910_v11 = vpop.xlane.xlu1 %1909  ;;  %v594_v20 = vmul.f32 %v562_v25, %v5126_v56  ;;  %v525_v47 = vmul.f32 0.6931472, %v2979_v43  ;;  %v5132_v25 = vld [vmem:[#allocation49_spill] sm:$0xff] }
 0x595   :  { %v2983_v0 = vpop.eup %2982  ;;  %2996 = vpow2.f32 %v2001_v49  ;;  %v2003_v1 = vmul.f32 1.442695, %v1953_v22  ;;  %v2113_v54 = vmul.f32 %v1953_v22, %v5119_v63  ;;  %2053 = vadd.xlane.f32.xlu1 %v2981_v2  ;;  %v1954_v51 = vsub.f32 %v4517_v24, %v1910_v11  ;;  %v5128_v63 = vld [vmem:[#allocation44_spill] sm:$0xff] }
 0x596   :  { %v2143_v37 = vadd.f32 %v2142_v53, %v2112_v18  ;;  %v1912_v33 = vpop.xlane.xlu0 %1911  ;;  %2055 = vadd.xlane.f32.xlu0 %v2983_v0  ;;  %v624_v41 = vadd.f32 %v623_v39, %v593_v13  ;;  %v564_v10 = vsub.f32 %v5127_v6, %v523_v30  ;;  %v595_v48 = vmul.f32 %v563_v9, %v5128_v63  ;;  %v5133_v2 = vld [vmem:[#allocation104_spill] sm:$0xff]  ;;  %v5134_v18 = vld [vmem:[#allocation45_spill] sm:$0xff] }
 0x597   :  { %v2985_v28 = vpop.eup %2984  ;;  %2998 = vpow2.f32 %v2003_v1  ;;  %v2005_v34 = vmul.f32 1.442695, %v1954_v51  ;;  %v2114_v26 = vmul.f32 %v1954_v51, %v5124_v12  ;;  %v1955_v7 = vsub.f32 %v4521_v58, %v1912_v33  ;;  %v5131_v58 = vld [vmem:[#allocation103_spill] sm:$0xff] }
 0x598   :  { %3000 = vlog2.f32 %v5129_v15  ;;  %v2144_v24 = vadd.f32 %v2143_v37, %v2113_v54  ;;  %v1914_v52 = vpop.xlane.xlu1 %1913  ;;  %v565_v4 = vsub.f32 %v5130_v45, %v525_v47  ;;  %v625_v62 = vadd.f32 %v624_v41, %v594_v20  ;;  %v5135_v54 = vld [vmem:[#allocation54_spill] sm:$0xff]  ;;  %v5137_v41 = vld [vmem:[#allocation48_spill] sm:$0xff] }
 0x599   :  { %v2987_v21 = vpop.eup %2986  ;;  %3002 = vpow2.f32 %v2005_v34  ;;  %v2007_v27 = vmul.f32 1.442695, %v1955_v7  ;;  %v2115_v59 = vmul.f32 %v1955_v7, %v5126_v56  ;;  %2057 = vadd.xlane.f32.xlu1 %v2985_v28  ;;  %v1956_v19 = vsub.f32 %v4525_v42, %v1914_v52  ;;  %v5136_v56 = vld [vmem:[#allocation105_spill] sm:$0xff] }
 0x59a   :  { %v2989_v50 = vpop.eup %2988  ;;  %3004 = vlog2.f32 %v5131_v58  ;;  %v2145_v40 = vadd.f32 %v2144_v24, %v2114_v26  ;;  %v1916_v44 = vpop.xlane.xlu0 %1915  ;;  %2059 = vadd.xlane.f32.xlu0 %v2987_v21  ;;  %v626_v42 = vadd.f32 %v625_v62, %v595_v48  ;;  %v596_v23 = vmul.f32 %v564_v10, %v5132_v25  ;;  %v5138_v26 = vld [vmem:[#allocation57_spill] sm:$0xff]  ;;  %v5139_v48 = vld [vmem:[#allocation86_spill] sm:$0xff] }
 0x59b   :  { %v2991_v46 = vpop.eup %2990  ;;  %3006 = vpow2.f32 %v2007_v27  ;;  %v2009_v29 = vmul.f32 1.442695, %v1956_v19  ;;  %v2116_v5 = vmul.f32 %v1956_v19, %v5128_v63  ;;  %v1957_v8 = vsub.f32 %v4529_v38, %v1916_v44 }
 0x59c   :  { %v2993_v61 = vpop.eup %2992  ;;  %v2146_v55 = vadd.f32 %v2145_v40, %v2115_v59  ;;  %v1918_v57 = vpop.xlane.xlu1 %1917  ;;  %v527_v39 = vmul.f32 0.6931472, %v2989_v50  ;;  %v597_v22 = vmul.f32 %v565_v4, %v5134_v18  ;;  %v5140_v59 = vld [vmem:[#allocation46_spill] sm:$0xff] }
 0x59d   :  { %v2995_v43 = vpop.eup %2994  ;;  %3008 = vpow2.f32 %v2009_v29  ;;  %v2011_v3 = vmul.f32 1.442695, %v1957_v8  ;;  %v2117_v14 = vmul.f32 %v1957_v8, %v5132_v25  ;;  %2061 = vadd.xlane.f32.xlu1 %v2991_v46  ;;  %v1958_v36 = vsub.f32 %v4533_v16, %v1918_v57  ;;  %v5141_v50 = vld [vmem:[#allocation50_spill] sm:$0xff]  ;;  %v5143_v8 = vld [vmem:[#allocation64_spill] sm:$0xff] }
 0x59e   :  { %3010 = vlog2.f32 %v5133_v2  ;;  %v2147_v49 = vadd.f32 %v2146_v55, %v2116_v5  ;;  %2063 = vadd.xlane.f32.xlu0 %v2995_v43  ;;  %v529_v60 = vmul.f32 0.6931472, %v2993_v61  ;;  %v627_v16 = vadd.f32 %v626_v42, %v596_v23  ;;  %v5142_v5 = vld [vmem:[#allocation56_spill] sm:$0xff]  ;;  %v5144_v42 = vld [vmem:[#allocation65_spill] sm:$0xff] }
 0x59f   :  { %v2997_v38 = vpop.eup %2996  ;;  %3012 = vpow2.f32 %v2011_v3  ;;  %v2013_v12 = vmul.f32 1.442695, %v1958_v36  ;;  %v2118_v13 = vmul.f32 %v1958_v36, %v5134_v18  ;;  %v1920_v30 = vpop.xlane.xlu0 %1919  ;;  %v566_v51 = vsub.f32 %v5135_v54, %v527_v39  ;;  %v5146_v39 = vld [vmem:[#allocation67_spill] sm:$0xff] }
 0x5a0   :  { %v2148_v9 = vadd.f32 %v2147_v49, %v2117_v14  ;;  %v1959_v53 = vsub.f32 %v4538_v32, %v1920_v30  ;;  %v567_v7 = vsub.f32 %v5138_v26, %v529_v60  ;;  %v628_v10 = vadd.f32 %v627_v16, %v597_v22  ;;  %v5145_v14 = vld [vmem:[#allocation59_spill] sm:$0xff] }
 0x5a1   :  { %v2999_v11 = vpop.eup %2998  ;;  %3014 = vpow2.f32 %v2013_v12  ;;  %2065 = vadd.xlane.f32.xlu1 %v2997_v38  ;;  %v1922_v0 = vpop.xlane.xlu1 %1921 }
 0x5a2   :  { %v3001_v1 = vpop.eup %3000  ;;  %3016 = vlog2.f32 %v5136_v56  ;;  %v2015_v20 = vmul.f32 1.442695, %v1959_v53  ;;  %v1960_v47 = vsub.f32 %v4541_v17, %v1922_v0  ;;  %2067 = vadd.xlane.f32.xlu0 %v2999_v11  ;;  %v2149_v33 = vadd.f32 %v2148_v9, %v2118_v13  ;;  %v5148_v11 = vld [vmem:[#allocation66_spill] sm:$0xff]  ;;  %v5149_v56 = vld [vmem:[#allocation68_spill] sm:$0xff] }
 0x5a3   :  { %v3003_v37 = vpop.eup %3002  ;;  %v2119_v28 = vmul.f32 %v1959_v53, %v5137_v41  ;;  %v1924_v34 = vpop.xlane.xlu0 %1923  ;;  %v598_v17 = vmul.f32 %v566_v51, %v5137_v41  ;;  %v531_v52 = vmul.f32 0.6931472, %v3001_v1  ;;  %v599_v40 = vmul.f32 %v567_v7, %v5141_v50  ;;  %v5147_v53 = vld [vmem:[#allocation47_spill] sm:$0xff] }
 0x5a4   :  { %v3005_v32 = vpop.eup %3004  ;;  %3018 = vpow2.f32 %v2015_v20  ;;  %v2017_v6 = vmul.f32 1.442695, %v1960_v47  ;;  %v1961_v15 = vsub.f32 %v4545_v31, %v1924_v34  ;;  %v2120_v45 = vmul.f32 %v1960_v47, %v5141_v50  ;;  %v5151_v34 = vld [vmem:[#allocation58_spill] sm:$0xff] }
 0x5a5   :  { %v3007_v63 = vpop.eup %3006  ;;  %3020 = vlog2.f32 %v5139_v48  ;;  %2069 = vadd.xlane.f32.xlu1 %v3003_v37  ;;  %v1926_v24 = vpop.xlane.xlu1 %1925  ;;  %v2150_v19 = vadd.f32 %v2149_v33, %v2119_v28  ;;  %v533_v31 = vmul.f32 0.6931472, %v3005_v32  ;;  %v629_v62 = vadd.f32 %v628_v10, %v598_v17  ;;  %v5150_v33 = vld [vmem:[#allocation60_spill] sm:$0xff]  ;;  %v5152_v48 = vld [vmem:[#allocation61_spill] sm:$0xff] }
 0x5a6   :  { %3022 = vpow2.f32 %v2017_v6  ;;  %v1962_v21 = vsub.f32 %v4549_v35, %v1926_v24  ;;  %2071 = vadd.xlane.f32.xlu0 %v3007_v63  ;;  %v2019_v4 = vmul.f32 1.442695, %v1961_v15  ;;  %v568_v35 = vsub.f32 %v5142_v5, %v531_v52 }
 0x5a7   :  { %v3009_v27 = vpop.eup %3008  ;;  %3024 = vlog2.f32 %v5140_v59  ;;  %v2151_v57 = vadd.f32 %v2150_v19, %v2120_v45  ;;  %v2121_v43 = vmul.f32 %v1961_v15, %v5144_v42  ;;  %v569_v36 = vsub.f32 %v5145_v14, %v533_v31  ;;  %v5154_v19 = vld [vmem:[#allocation90_spill] sm:$0xff] }
 0x5a8   :  { %v3011_v58 = vpop.eup %3010  ;;  %v2021_v44 = vmul.f32 1.442695, %v1962_v21  ;;  %3026 = vpow2.f32 %v2019_v4  ;;  %v630_v49 = vadd.f32 %v629_v62, %v599_v40  ;;  %v600_v22 = vmul.f32 %v568_v35, %v5144_v42  ;;  %v5155_v4 = vld [vmem:[#allocation91_spill] sm:$0xff]  ;;  %v5156_v62 = vld [vmem:[#allocation62_spill] sm:$0xff]  ;;  %v5157_v35 = vld [vmem:[#allocation69_spill] sm:$0xff] }
 0x5a9   :  { %v3013_v46 = vpop.eup %3012  ;;  %2073 = vadd.xlane.f32.xlu1 %v3009_v27  ;;  %v1928_v29 = vpop.xlane.xlu0 %1927  ;;  %v535_v12 = vmul.f32 0.6931472, %v3011_v58  ;;  %v2152_v9 = vadd.f32 %v2151_v57, %v2121_v43  ;;  %v2122_v16 = vmul.f32 %v1962_v21, %v5147_v53  ;;  %v601_v51 = vmul.f32 %v569_v36, %v5147_v53  ;;  %v5153_v21 = vld [vmem:[#allocation63_spill] sm:$0xff] }
 0x5aa   :  { %3028 = vpow2.f32 %v2021_v44  ;;  %v1963_v61 = vsub.f32 %v5143_v8, %v1928_v29  ;;  %2075 = vadd.xlane.f32.xlu0 %v3013_v46  ;;  %v631_v47 = vadd.f32 %v630_v49, %v600_v22 }
 0x5ab   :  { %v3015_v55 = vpop.eup %3014  ;;  %v1930_v3 = vpop.xlane.xlu1 %1929  ;;  %v570_v32 = vsub.f32 %v5151_v34, %v535_v12  ;;  %v2153_v10 = vadd.f32 %v2152_v9, %v2122_v16 }
 0x5ac   :  { %v3017_v25 = vpop.eup %3016  ;;  %v2023_v23 = vmul.f32 1.442695, %v1963_v61  ;;  %v1964_v2 = vsub.f32 %v5146_v39, %v1930_v3  ;;  %v2123_v41 = vmul.f32 %v1963_v61, %v5150_v33  ;;  %v632_v17 = vadd.f32 %v631_v47, %v601_v51 }
 0x5ad   :  { %2077 = vadd.xlane.f32.xlu1 %v3015_v55  ;;  %v1932_v38 = vpop.xlane.xlu0 %1931  ;;  %v537_v60 = vmul.f32 0.6931472, %v3017_v25  ;;  %v602_v59 = vmul.f32 %v570_v32, %v5150_v33 }
 0x5ae   :  { %v3019_v18 = vpop.eup %3018  ;;  %3030 = vpow2.f32 %v2023_v23  ;;  %v2025_v13 = vmul.f32 1.442695, %v1964_v2  ;;  %v1965_v0 = vsub.f32 %v5148_v11, %v1932_v38  ;;  %v2154_v52 = vadd.f32 %v2153_v10, %v2123_v41 }
 0x5af   :  { %v3021_v30 = vpop.eup %3020  ;;  %2079 = vadd.xlane.f32.xlu0 %v3019_v18  ;;  %v1934_v1 = vpop.xlane.xlu1 %1933  ;;  %v571_v15 = vsub.f32 %v5152_v48, %v537_v60  ;;  %v2124_v27 = vmul.f32 %v1964_v2, %v5153_v21  ;;  %v633_v31 = vadd.f32 %v632_v17, %v602_v59 }
 0x5b0   :  { %v3023_v54 = vpop.eup %3022  ;;  %3032 = vpow2.f32 %v2025_v13  ;;  %v1966_v20 = vsub.f32 %v5149_v56, %v1934_v1  ;;  %v2027_v28 = vmul.f32 1.442695, %v1965_v0  ;;  %v539_v26 = vmul.f32 0.6931472, %v3021_v30 }
 0x5b1   :  { %v3025_v37 = vpop.eup %3024  ;;  %2081 = vadd.xlane.f32.xlu1 %v3023_v54  ;;  %v603_v40 = vmul.f32 %v571_v15, %v5153_v21  ;;  %v2155_v44 = vadd.f32 %v2154_v52, %v2124_v27  ;;  %v2125_v46 = vmul.f32 %v1965_v0, %v5156_v62 }
 0x5b2   :  { %v2029_v7 = vmul.f32 1.442695, %v1966_v20  ;;  %v3027_v6 = vpop.eup %3026  ;;  %3034 = vpow2.f32 %v2027_v28  ;;  %v541_v24 = vmul.f32 0.6931472, %v3025_v37  ;;  %v572_v50 = vsub.f32 %v5154_v19, %v539_v26 }
 0x5b3   :  { %2083 = vadd.xlane.f32.xlu0 %v3027_v6  ;;  %v634_v61 = vadd.f32 %v633_v31, %v603_v40  ;;  %v2156_v57 = vadd.f32 %v2155_v44, %v2125_v46  ;;  %v2126_v42 = vmul.f32 %v1966_v20, %v5157_v35 }
 0x5b4   :  { %v3029_v63 = vpop.eup %3028  ;;  %3036 = vpow2.f32 %v2029_v7  ;;  %v573_v58 = vsub.f32 %v5155_v4, %v541_v24  ;;  %v604_v5 = vmul.f32 %v572_v50, %v5156_v62 }
 0x5b5   :  { %2085 = vadd.xlane.f32.xlu1 %v3029_v63  ;;  %v2157_v14 = vadd.f32 %v2156_v57, %v2126_v42 }
 0x5b6   :  { %v605_v8 = vmul.f32 %v573_v58, %v5157_v35  ;;  %v635_v3 = vadd.f32 %v634_v61, %v604_v5 }
 0x5b8   :  { %v3031_v45 = vpop.eup %3030  ;;  %v636_v25 = vadd.f32 %v635_v3, %v605_v8 }
 0x5b9   :  { %2087 = vadd.xlane.f32.xlu0 %v3031_v45 }
 0x5ba   :  { %v3033_v29 = vpop.eup %3032 }
 0x5bb   :  { %2089 = vadd.xlane.f32.xlu1 %v3033_v29 }
 0x5bc   :  { %v3035_v55 = vpop.eup %3034 }
 0x5bd   :  { %2091 = vadd.xlane.f32.xlu0 %v3035_v55 }
 0x5be   :  { %v3037_v43 = vpop.eup %3036 }
 0x5bf   :  { %2093 = vadd.xlane.f32.xlu1 %v3037_v43 }
 0x5c1   :  { %637 = vadd.xlane.f32.xlu0 %v636_v25 }
 0x5c3   :  { %2158 = vadd.xlane.f32.xlu1 %v2157_v14 }
 0x60b   :  { %v2032_v36 = vpop.xlane.xlu0 %2031 }
 0x60c   :  { %3038 = vlog2.f32 %v2032_v36 }
 0x60d   :  { %v2034_v23 = vpop.xlane.xlu1 %2033 }
 0x60e   :  { %3040 = vlog2.f32 %v2034_v23 }
 0x60f   :  { %v2036_v39 = vpop.xlane.xlu0 %2035 }
 0x610   :  { %3042 = vlog2.f32 %v2036_v39 }
 0x612   :  { %v2038_v2 = vpop.xlane.xlu1 %2037 }
 0x613   :  { %3044 = vlog2.f32 %v2038_v2  ;;  %v2040_v49 = vpop.xlane.xlu0 %2039 }
 0x614   :  { %3046 = vlog2.f32 %v2040_v49 }
 0x616   :  { %v3039_v38 = vpop.eup %3038  ;;  %v2042_v18 = vpop.xlane.xlu1 %2041 }
 0x617   :  { %v2169_v22 = vmul.f32 0.6931472, %v3039_v38  ;;  %3048 = vlog2.f32 %v2042_v18  ;;  %v2044_v12 = vpop.xlane.xlu0 %2043 }
 0x618   :  { %v3041_v13 = vpop.eup %3040  ;;  %3050 = vlog2.f32 %v2044_v12 }
 0x619   :  { %v2171_v30 = vmul.f32 0.6931472, %v3041_v13  ;;  %v2233_v53 = vsel %vm2232_vm0, %v2169_v22, 0.0 }
 0x61a   :  { %v3043_v60 = vpop.eup %3042  ;;  %v2046_v9 = vpop.xlane.xlu1 %2045 }
 0x61b   :  { %v2234_v16 = vsel %vm2232_vm0, %v2171_v30, 0.0  ;;  %v2173_v11 = vmul.f32 0.6931472, %v3043_v60  ;;  %3052 = vlog2.f32 %v2046_v9  ;;  %v2048_v0 = vpop.xlane.xlu0 %2047 }
 0x61c   :  { %v2235_v1 = vadd.f32 %v2234_v16, %v2233_v53  ;;  %3054 = vlog2.f32 %v2048_v0 }
 0x61d   :  { %v3045_v54 = vpop.eup %3044  ;;  %v2236_v51 = vsel %vm2232_vm0, %v2173_v11, 0.0 }
 0x61e   :  { %v3047_v56 = vpop.eup %3046  ;;  %v2237_v20 = vadd.f32 %v2236_v51, %v2235_v1  ;;  %v2175_v47 = vmul.f32 0.6931472, %v3045_v54  ;;  %v2050_v37 = vpop.xlane.xlu1 %2049 }
 0x61f   :  { %v2177_v33 = vmul.f32 0.6931472, %v3047_v56  ;;  %3056 = vlog2.f32 %v2050_v37  ;;  %v2052_v41 = vpop.xlane.xlu0 %2051 }
 0x620   :  { %v2238_v28 = vsel %vm2232_vm0, %v2175_v47, 0.0  ;;  %3058 = vlog2.f32 %v2052_v41 }
 0x621   :  { %v3049_v34 = vpop.eup %3048  ;;  %v2239_v32 = vadd.f32 %v2238_v28, %v2237_v20  ;;  %v2240_v26 = vsel %vm2232_vm0, %v2177_v33, 0.0 }
 0x622   :  { %v3051_v7 = vpop.eup %3050  ;;  %v2179_v6 = vmul.f32 0.6931472, %v3049_v34  ;;  %v2054_v10 = vpop.xlane.xlu1 %2053 }
 0x623   :  { %v2241_v63 = vadd.f32 %v2240_v26, %v2239_v32  ;;  %v2181_v48 = vmul.f32 0.6931472, %v3051_v7  ;;  %3060 = vlog2.f32 %v2054_v10  ;;  %v2056_v15 = vpop.xlane.xlu0 %2055 }
 0x624   :  { %v2242_v24 = vsel %vm2232_vm0, %v2179_v6, 0.0  ;;  %3062 = vlog2.f32 %v2056_v15 }
 0x625   :  { %v3053_v17 = vpop.eup %3052  ;;  %v2243_v52 = vadd.f32 %v2242_v24, %v2241_v63  ;;  %v2244_v21 = vsel %vm2232_vm0, %v2181_v48, 0.0 }
 0x626   :  { %v3055_v27 = vpop.eup %3054  ;;  %v2183_v59 = vmul.f32 0.6931472, %v3053_v17  ;;  %v2058_v19 = vpop.xlane.xlu1 %2057 }
 0x627   :  { %v2245_v50 = vadd.f32 %v2244_v21, %v2243_v52  ;;  %v2185_v45 = vmul.f32 0.6931472, %v3055_v27  ;;  %3064 = vlog2.f32 %v2058_v19  ;;  %v2060_v4 = vpop.xlane.xlu0 %2059 }
 0x628   :  { %v2246_v58 = vsel %vm2232_vm0, %v2183_v59, 0.0  ;;  %3066 = vlog2.f32 %v2060_v4 }
 0x629   :  { %v3057_v40 = vpop.eup %3056  ;;  %v2247_v31 = vadd.f32 %v2246_v58, %v2245_v50  ;;  %v2248_v44 = vsel %vm2232_vm0, %v2185_v45, 0.0 }
 0x62a   :  { %v3059_v62 = vpop.eup %3058  ;;  %v2187_v46 = vmul.f32 0.6931472, %v3057_v40  ;;  %v2062_v29 = vpop.xlane.xlu1 %2061 }
 0x62b   :  { %v2249_v5 = vadd.f32 %v2248_v44, %v2247_v31  ;;  %v2189_v35 = vmul.f32 0.6931472, %v3059_v62  ;;  %3068 = vlog2.f32 %v2062_v29  ;;  %v2064_v8 = vpop.xlane.xlu0 %2063 }
 0x62c   :  { %v2250_v61 = vsel %vm2232_vm0, %v2187_v46, 0.0  ;;  %3070 = vlog2.f32 %v2064_v8 }
 0x62d   :  { %v3061_v55 = vpop.eup %3060  ;;  %v2251_v57 = vadd.f32 %v2250_v61, %v2249_v5  ;;  %v2252_v42 = vsel %vm2232_vm0, %v2189_v35, 0.0 }
 0x62e   :  { %v3063_v43 = vpop.eup %3062  ;;  %v2191_v3 = vmul.f32 0.6931472, %v3061_v55  ;;  %v2066_v25 = vpop.xlane.xlu1 %2065 }
 0x62f   :  { %v2253_v14 = vadd.f32 %v2252_v42, %v2251_v57  ;;  %v2193_v36 = vmul.f32 0.6931472, %v3063_v43  ;;  %3072 = vlog2.f32 %v2066_v25  ;;  %v2068_v23 = vpop.xlane.xlu0 %2067 }
 0x630   :  { %v2254_v39 = vsel %vm2232_vm0, %v2191_v3, 0.0  ;;  %3074 = vlog2.f32 %v2068_v23 }
 0x631   :  { %v3065_v2 = vpop.eup %3064  ;;  %v2255_v49 = vadd.f32 %v2254_v39, %v2253_v14  ;;  %v2256_v38 = vsel %vm2232_vm0, %v2193_v36, 0.0 }
 0x632   :  { %v3067_v18 = vpop.eup %3066  ;;  %v2195_v22 = vmul.f32 0.6931472, %v3065_v2  ;;  %v2070_v12 = vpop.xlane.xlu1 %2069 }
 0x633   :  { %v2257_v13 = vadd.f32 %v2256_v38, %v2255_v49  ;;  %v2197_v30 = vmul.f32 0.6931472, %v3067_v18  ;;  %3076 = vlog2.f32 %v2070_v12  ;;  %v2072_v60 = vpop.xlane.xlu0 %2071 }
 0x634   :  { %v2258_v9 = vsel %vm2232_vm0, %v2195_v22, 0.0  ;;  %3078 = vlog2.f32 %v2072_v60 }
 0x635   :  { %v3069_v53 = vpop.eup %3068  ;;  %v2259_v16 = vadd.f32 %v2258_v9, %v2257_v13  ;;  %v2260_v11 = vsel %vm2232_vm0, %v2197_v30, 0.0 }
 0x636   :  { %v3071_v0 = vpop.eup %3070  ;;  %v2199_v1 = vmul.f32 0.6931472, %v3069_v53  ;;  %v2074_v54 = vpop.xlane.xlu1 %2073 }
 0x637   :  { %v2261_v51 = vadd.f32 %v2260_v11, %v2259_v16  ;;  %v2201_v56 = vmul.f32 0.6931472, %v3071_v0  ;;  %3080 = vlog2.f32 %v2074_v54  ;;  %v2076_v20 = vpop.xlane.xlu0 %2075 }
 0x638   :  { %v2262_v47 = vsel %vm2232_vm0, %v2199_v1, 0.0  ;;  %3082 = vlog2.f32 %v2076_v20 }
 0x639   :  { %v3073_v37 = vpop.eup %3072  ;;  %v2263_v33 = vadd.f32 %v2262_v47, %v2261_v51  ;;  %v2264_v41 = vsel %vm2232_vm0, %v2201_v56, 0.0 }
 0x63a   :  { %v3075_v28 = vpop.eup %3074  ;;  %v2203_v34 = vmul.f32 0.6931472, %v3073_v37  ;;  %v2078_v32 = vpop.xlane.xlu1 %2077 }
 0x63b   :  { %v2265_v26 = vadd.f32 %v2264_v41, %v2263_v33  ;;  %v2205_v7 = vmul.f32 0.6931472, %v3075_v28  ;;  %3084 = vlog2.f32 %v2078_v32 }
 0x63c   :  { %v2266_v6 = vsel %vm2232_vm0, %v2203_v34, 0.0  ;;  %v2080_v10 = vpop.xlane.xlu0 %2079 }
 0x63d   :  { %v3077_v63 = vpop.eup %3076  ;;  %v2267_v48 = vadd.f32 %v2266_v6, %v2265_v26  ;;  %v2268_v15 = vsel %vm2232_vm0, %v2205_v7, 0.0  ;;  %3086 = vlog2.f32 %v2080_v10 }
 0x63e   :  { %v3079_v24 = vpop.eup %3078  ;;  %v2207_v17 = vmul.f32 0.6931472, %v3077_v63  ;;  %v2082_v52 = vpop.xlane.xlu1 %2081 }
 0x63f   :  { %v2269_v21 = vadd.f32 %v2268_v15, %v2267_v48  ;;  %v2209_v27 = vmul.f32 0.6931472, %v3079_v24  ;;  %3088 = vlog2.f32 %v2082_v52 }
 0x640   :  { %v2270_v59 = vsel %vm2232_vm0, %v2207_v17, 0.0  ;;  %v2084_v4 = vpop.xlane.xlu0 %2083 }
 0x641   :  { %v3081_v19 = vpop.eup %3080  ;;  %v2271_v50 = vadd.f32 %v2270_v59, %v2269_v21  ;;  %v2272_v45 = vsel %vm2232_vm0, %v2209_v27, 0.0  ;;  %3090 = vlog2.f32 %v2084_v4 }
 0x642   :  { %v3083_v58 = vpop.eup %3082  ;;  %v2211_v40 = vmul.f32 0.6931472, %v3081_v19  ;;  %v2086_v31 = vpop.xlane.xlu1 %2085 }
 0x643   :  { %v2273_v44 = vadd.f32 %v2272_v45, %v2271_v50  ;;  %v2213_v62 = vmul.f32 0.6931472, %v3083_v58  ;;  %3092 = vlog2.f32 %v2086_v31 }
 0x644   :  { %v2274_v46 = vsel %vm2232_vm0, %v2211_v40, 0.0 }
 0x645   :  { %v3085_v29 = vpop.eup %3084  ;;  %v2275_v5 = vadd.f32 %v2274_v46, %v2273_v44  ;;  %v2276_v35 = vsel %vm2232_vm0, %v2213_v62, 0.0 }
 0x646   :  { %v2215_v8 = vmul.f32 0.6931472, %v3085_v29  ;;  %v2088_v61 = vpop.xlane.xlu0 %2087 }
 0x647   :  { %v3087_v55 = vpop.eup %3086  ;;  %v2277_v57 = vadd.f32 %v2276_v35, %v2275_v5  ;;  %3094 = vlog2.f32 %v2088_v61 }
 0x648   :  { %v2278_v42 = vsel %vm2232_vm0, %v2215_v8, 0.0  ;;  %v2217_v43 = vmul.f32 0.6931472, %v3087_v55  ;;  %v2090_v3 = vpop.xlane.xlu1 %2089 }
 0x649   :  { %v3089_v25 = vpop.eup %3088  ;;  %v2279_v14 = vadd.f32 %v2278_v42, %v2277_v57  ;;  %3096 = vlog2.f32 %v2090_v3 }
 0x64a   :  { %v2280_v36 = vsel %vm2232_vm0, %v2217_v43, 0.0  ;;  %v2219_v23 = vmul.f32 0.6931472, %v3089_v25  ;;  %v2092_v2 = vpop.xlane.xlu0 %2091 }
 0x64b   :  { %v2281_v39 = vadd.f32 %v2280_v36, %v2279_v14  ;;  %v3091_v49 = vpop.eup %3090  ;;  %3098 = vlog2.f32 %v2092_v2 }
 0x64c   :  { %v2282_v38 = vsel %vm2232_vm0, %v2219_v23, 0.0  ;;  %v2094_v18 = vpop.xlane.xlu1 %2093  ;;  %v2221_v13 = vmul.f32 0.6931472, %v3091_v49 }
 0x64d   :  { %v3093_v22 = vpop.eup %3092  ;;  %v2283_v12 = vadd.f32 %v2282_v38, %v2281_v39  ;;  %3100 = vlog2.f32 %v2094_v18 }
 0x64e   :  { %v2223_v30 = vmul.f32 0.6931472, %v3093_v22  ;;  %v2284_v60 = vsel %vm2232_vm0, %v2221_v13, 0.0  ;;  %v638_v9 = vpop.xlane.xlu0 %637 }
 0x64f   :  { %v2285_v53 = vadd.f32 %v2284_v60, %v2283_v12  ;;  %v639_v11 = vrot.slane %v638_v9, 4 }
 0x650   :  { %v2286_v16 = vsel %vm2232_vm0, %v2223_v30, 0.0  ;;  %v2159_v0 = vpop.xlane.xlu1 %2158 }
 0x651   :  { %v3095_v1 = vpop.eup %3094  ;;  %v2160_v54 = vrot.slane %v2159_v0, 4  ;;  %v640_v56 = vadd.f32 %v639_v11, %v638_v9  ;;  %v2287_v47 = vadd.f32 %v2286_v16, %v2285_v53 }
 0x652   :  { %v2225_v51 = vmul.f32 0.6931472, %v3095_v1 }
 0x653   :  { %v3097_v20 = vpop.eup %3096  ;;  %v2161_v37 = vadd.f32 %v2160_v54, %v2159_v0  ;;  %v641_v28 = vrot.slane %v640_v56, 2 }
 0x654   :  { %v2288_v33 = vsel %vm2232_vm0, %v2225_v51, 0.0  ;;  %v2227_v41 = vmul.f32 0.6931472, %v3097_v20 }
 0x655   :  { %v2289_v34 = vadd.f32 %v2288_v33, %v2287_v47  ;;  %v2162_v32 = vrot.slane %v2161_v37, 2  ;;  %v3099_v26 = vpop.eup %3098  ;;  %v642_v6 = vadd.f32 %v641_v28, %v640_v56 }
 0x656   :  { %v2290_v7 = vsel %vm2232_vm0, %v2227_v41, 0.0  ;;  %v2229_v48 = vmul.f32 0.6931472, %v3099_v26 }
 0x657   :  { %v3101_v10 = vpop.eup %3100  ;;  %v2291_v63 = vadd.f32 %v2290_v7, %v2289_v34  ;;  %v2163_v15 = vadd.f32 %v2162_v32, %v2161_v37  ;;  %v643_v17 = vrot.slane %v642_v6, 1 }
 0x658   :  { %v2231_v24 = vmul.f32 0.6931472, %v3101_v10  ;;  %v2292_v52 = vsel %vm2232_vm0, %v2229_v48, 0.0 }
 0x659   :  { %v2164_v21 = vrot.slane %v2163_v15, 1  ;;  %v644_v27 = vadd.f32 %v643_v17, %v642_v6  ;;  %v2293_v59 = vadd.f32 %v2292_v52, %v2291_v63 }
 0x65a   :  { %v2294_v19 = vsel %vm2232_vm0, %v2231_v24, 0.0 }
 0x65b   :  { %v2165_v50 = vadd.f32 %v2164_v21, %v2163_v15  ;;  %2567 = vpush %v644_v27  ;;  %v2295_v45 = vadd.f32 %v2294_v19, %v2293_v59 }
 0x65d   :  { %2569 = vpush %v2165_v50  ;;  %2296 = vadd.xlane.f32.xlu0 %v2295_v45 }
 0x68c   :  { %s2568_s4 = spop %2567 }
 0x68e   :  { %s2570_s19 = spop %2569 }
 0x68f   :  { %s2167_s20 = ssub.f32 %s2568_s4, %s2570_s19 }
 0x6ea   :  { %v2297_v4 = vpop.xlane.xlu0 %2296 }
 0x6eb   :  { %v2298_v58 = vrot.slane %v2297_v4, 4 }
 0x6ed   :  { %v2299_v40 = vadd.f32 %v2298_v58, %v2297_v4 }
 0x6ef   :  { %v2300_v31 = vrot.slane %v2299_v40, 2 }
 0x6f1   :  { %v2301_v44 = vadd.f32 %v2300_v31, %v2299_v40 }
 0x6f3   :  { %v2302_v62 = vrot.slane %v2301_v44, 1 }
 0x6f5   :  { %v2303_v46 = vadd.f32 %v2302_v62, %v2301_v44 }
 0x6f7   :  { %2571 = vpush %v2303_v46 }
 0x728   :  { %s2572_s22 = spop %2571 }
 0x729   :  { %s2305_s23 = sadd.f32 %s2572_s22, %s2167_s20 }
 0x72b   :  { %s2306_s26 = smul.f32 0.00390625, %s2305_s23 }
 0x72d   :  { %v2307_v29 = vstv %s2306_s26 }
 0x72e   :  { %2308 = vst [vmem:[#allocation10] sm:$0xff] %v2307_v29 }
 0x72f   :  { %3275 = shalt.err (!%p3272_p8)
}
 0x730   :  { %s3276_s0 = scalar_lea.hbm %s4778_s5, 128 }
 0x731   :  { %p3277_p9 = scmp.ne.s32.totalorder %s4778_s5, %s3276_s0  ;;  %p3280_p10 = scmp.lt.u32.totalorder %s3276_s0, %s4778_s5 }
 0x733   :  { %p3282_p11 = pnand %p3280_p10, %p3277_p9 }
 0x735   :  { %3285 = shalt.err (!%p3282_p11)
}
 0x736   :  { %2318 = dma.vmem_to_hbm [thread:$0]  %s2316_s25, 128, %s4778_s5, [#allocation4]  }
 0x737   :  { %3292 = dma.done.wait [#allocation4], 128  }
 0x738   :  { %3293 = vsyncadd [#allocation4], 4294967168 }
 0x739   :  { %2322 = vsyncpa [#allocation3], 1 }
 0x73a   :  { %2323 = vsyncpa [#allocation6], 1 }
 0x73b   :  { %2324 = vsyncpa [#allocation9], 1 }
 0x73c   :  { %2325 = vsyncpa [#allocation4], 1 }

</bundles_post_ra>
